<compile_context>
chip_gen: v7x
topology: tpu7x:2x2x1
jax: 0.10.0
libtpu: 0.0.40
codegen_flags: <defaults>
</compile_context>

<pallas_src>
import functools
import math

import jax
import jax.numpy as jnp
from jax import lax
from jax.experimental import pallas as pl
from jax.experimental.pallas import tpu as pltpu


def _mha_kernel(x_ref, wq_ref, wkv_ref, wo_ref, o_ref, *, num_heads, dk, tq):
    # x_ref  : (1, S, D)  bf16 — full sequence for this batch element.
    # wq_ref : (D, D)     bf16 — Q projection with 1/sqrt(dk) folded in.
    # wkv_ref: (D, 2D)    bf16 — [Wk | Wv] stacked -> one wide MXU matmul.
    # wo_ref : (D, D)     bf16 — output projection.
    # o_ref  : (1, tq, D)      — output rows for this query tile.
    D = wq_ref.shape[0]
    qi = pl.program_id(1)

    x_all = x_ref[0]                                   # (S, D) full sequence (K/V source)
    row0 = pl.multiple_of(qi * tq, tq)
    xq = x_ref[0, pl.ds(row0, tq), :]                  # (tq, D) query rows of this tile

    # Projections: bf16 MXU inputs, f32 accumulation, then back to bf16 so the
    # attention matmuls also run at bf16 MXU rate.
    q = jnp.dot(xq, wq_ref[...],
                preferred_element_type=jnp.float32).astype(jnp.bfloat16)    # (tq, D)
    kv = jnp.dot(x_all, wkv_ref[...],
                 preferred_element_type=jnp.float32).astype(jnp.bfloat16)   # (S, 2D)
    k = kv[:, :D]                                      # (S, D)  lane-aligned slice
    v = kv[:, D:]                                      # (S, D)  lane-aligned slice

    ctx_heads = []
    for hh in range(num_heads):                        # h is small & static -> unrolled
        lo = hh * dk
        q_h = q[:, lo:lo + dk]                         # (tq, dk)
        k_h = k[:, lo:lo + dk]                         # (S, dk)
        v_h = v[:, lo:lo + dk]                         # (S, dv)

        # q_h @ k_h^T without materializing the transpose: contract last dims.
        s = lax.dot_general(q_h, k_h, (((1,), (1,)), ((), ())),
                            preferred_element_type=jnp.float32)             # (tq, S)

        # Numerically-stable softmax; reciprocal goes to the EUP (free slot).
        m = jnp.max(s, axis=-1, keepdims=True)
        e = jnp.exp(s - m)
        inv = pl.reciprocal(jnp.sum(e, axis=-1, keepdims=True), approx=True)
        p = (e * inv).astype(jnp.bfloat16)                                  # (tq, S)

        ctx_heads.append(jnp.dot(p, v_h,
                                 preferred_element_type=jnp.float32))       # (tq, dv)

    # Concat heads (lane axis) and do ONE full-width output projection.
    ctx = jnp.concatenate(ctx_heads, axis=-1).astype(jnp.bfloat16)          # (tq, h*dv)
    out = jnp.dot(ctx, wo_ref[...], preferred_element_type=jnp.float32)     # (tq, D)
    o_ref[0] = out.astype(o_ref.dtype)


def multi_head_attention(x, wq, wk, wv, wo, num_heads, *, tq=256):
    """x: (B, S, D); wq/wk/wv/wo: nn.Linear.weight layout (out_features, in_features)."""
    B, S, D = x.shape
    assert D % num_heads == 0, "embedding dim must divide by num_heads"
    dk = D // num_heads

    tq = min(tq, S)
    assert S % tq == 0, "sequence length must be divisible by the query tile"
    num_q = S // tq

    scale = 1.0 / math.sqrt(dk)

    # Host-side (cheap, one-time) layout prep: transpose to x @ W form, fold the
    # attention scale into Wq, stack Wk|Wv, cast everything the MXU touches to bf16.
    x_b = x.astype(jnp.bfloat16)
    wq_t = (wq.T * scale).astype(jnp.bfloat16)                          # (D, h*dk)
    wkv_t = jnp.concatenate([wk.T, wv.T], axis=1).astype(jnp.bfloat16)  # (D, 2*D)
    wo_t = wo.T.astype(jnp.bfloat16)                                    # (h*dv, D)

    kernel = functools.partial(_mha_kernel, num_heads=num_heads, dk=dk, tq=tq)

    return pl.pallas_call(
        kernel,
        out_shape=jax.ShapeDtypeStruct((B, S, D), x.dtype),
        grid_spec=pltpu.PrefetchScalarGridSpec(
            num_scalar_prefetch=0,
            grid=(B, num_q),
            in_specs=[
                # Full sequence for this batch; constant across the q-tile axis
                # so Pallas keeps the block resident (single DMA per batch).
                pl.BlockSpec((1, S, D), lambda b, qi: (b, 0, 0)),
                # Weights: constant index_map -> fetched once, reused all steps.
                pl.BlockSpec((D, D), lambda b, qi: (0, 0)),
                pl.BlockSpec((D, 2 * D), lambda b, qi: (0, 0)),
                pl.BlockSpec((D, D), lambda b, qi: (0, 0)),
            ],
            out_specs=pl.BlockSpec((1, tq, D), lambda b, qi: (b, qi, 0)),
        ),
        compiler_params=pltpu.CompilerParams(
            dimension_semantics=("parallel", "parallel"),
        ),
    )(x_b, wq_t, wkv_t, wo_t)


def _reference(x, wq, wk, wv, wo, num_heads):
    """Pure-JAX f32 reference mirroring the PyTorch forward (mask=None)."""
    B, S, D = x.shape
    dk = D // num_heads
    q = x @ wq.T
    k = x @ wk.T
    v = x @ wv.T
    q = q.reshape(B, S, num_heads, dk).transpose(0, 2, 1, 3)
    k = k.reshape(B, S, num_heads, dk).transpose(0, 2, 1, 3)
    v = v.reshape(B, S, num_heads, dk).transpose(0, 2, 1, 3)
    scores = (q @ k.transpose(0, 1, 3, 2)) / jnp.sqrt(jnp.float32(dk))
    probs = jax.nn.softmax(scores, axis=-1)
    ctx = probs @ v
    ctx = ctx.transpose(0, 2, 1, 3).reshape(B, S, num_heads * dk)
    return ctx @ wo.T


if __name__ == "__main__":
    # Small but lane-dense config: D and S multiples of 128 so stores are
    # unmasked and the MXU contractions are reasonably shaped. dk = dv = 32.
    B, S, D, H = 2, 128, 128, 4

    key = jax.random.PRNGKey(0)
    kx, kq, kk, kv, ko = jax.random.split(key, 5)

    x = jax.random.normal(kx, (B, S, D), dtype=jnp.float32)

    # Deterministic nn.Linear-style init: U(-1/sqrt(fan_in), 1/sqrt(fan_in)).
    bound = 1.0 / math.sqrt(D)
    wq = jax.random.uniform(kq, (D, D), jnp.float32, -bound, bound)  # Wq.weight (h*dk, D)
    wk = jax.random.uniform(kk, (D, D), jnp.float32, -bound, bound)  # Wk.weight
    wv = jax.random.uniform(kv, (D, D), jnp.float32, -bound, bound)  # Wv.weight
    wo = jax.random.uniform(ko, (D, D), jnp.float32, -bound, bound)  # Wo.weight (D, h*dv)

    out = multi_head_attention(x, wq, wk, wv, wo, H, tq=128)
    out = jax.block_until_ready(out)

    ref = _reference(x, wq, wk, wv, wo, H)
    assert out.shape == (B, S, D)
    max_err = float(jnp.max(jnp.abs(out - ref)))
    # bf16 MXU operands (f32 accumulation) + approx reciprocal -> looser tolerance.
    assert jnp.allclose(out, ref, atol=2e-2, rtol=2e-2), (
        f"mismatch vs JAX reference (max abs err {max_err})")

    print("KERNEL_OK")
</pallas_src>

<mosaic_0001>
module attributes {stable_mosaic.version = 11 : i64} {
  func.func @_mha_kernel(%arg0: i32, %arg1: i32, %arg2: memref<1x128x128xbf16, #tpu.memory_space<vmem>>, %arg3: memref<128x128xbf16, #tpu.memory_space<vmem>>, %arg4: memref<128x256xbf16, #tpu.memory_space<vmem>>, %arg5: memref<128x128xbf16, #tpu.memory_space<vmem>>, %arg6: memref<1x128x128xf32, #tpu.memory_space<vmem>>) attributes {dimension_semantics = [#tpu.dimension_semantics<parallel>, #tpu.dimension_semantics<parallel>], iteration_bounds = array<i64: 2, 1>, scalar_prefetch = 0 : i64, scratch_operands = 0 : i64, tpu.core_type = #tpu.core_type<tc>, window_params = [{transform_indices = @transform_0, window_bounds = array<i64: 1, 128, 128>}, {pipeline_mode = #tpu.pipeline_mode<synchronous>, transform_indices = @transform_1, window_bounds = array<i64: 128, 128>}, {pipeline_mode = #tpu.pipeline_mode<synchronous>, transform_indices = @transform_2, window_bounds = array<i64: 128, 256>}, {pipeline_mode = #tpu.pipeline_mode<synchronous>, transform_indices = @transform_3, window_bounds = array<i64: 128, 128>}, {transform_indices = @transform_4, window_bounds = array<i64: 1, 128, 128>}]} {
    %c0 = arith.constant 0 : index
    %c0_0 = arith.constant 0 : index
    %c0_1 = arith.constant 0 : index
    %0 = vector.load %arg2[%c0, %c0_0, %c0_1] : memref<1x128x128xbf16, #tpu.memory_space<vmem>>, vector<1x128x128xbf16>
    %1 = vector.shape_cast %0 : vector<1x128x128xbf16> to vector<128x128xbf16>
    %c128_i32 = arith.constant 128 : i32
    %2 = arith.muli %arg1, %c128_i32 : i32
    %3 = tpu.assume_multiple %2, 128 : i32
    %c0_2 = arith.constant 0 : index
    %4 = arith.index_cast %3 : i32 to index
    %c0_3 = arith.constant 0 : index
    %5 = vector.load %arg2[%c0_2, %4, %c0_3] : memref<1x128x128xbf16, #tpu.memory_space<vmem>>, vector<1x128x128xbf16>
    %6 = vector.shape_cast %5 : vector<1x128x128xbf16> to vector<128x128xbf16>
    %c0_4 = arith.constant 0 : index
    %c0_5 = arith.constant 0 : index
    %7 = vector.load %arg3[%c0_4, %c0_5] : memref<128x128xbf16, #tpu.memory_space<vmem>>, vector<128x128xbf16>
    %cst = arith.constant dense<0.000000e+00> : vector<128x128xf32>
    %8 = tpu.matmul %6, %7, %cst {dimension_numbers = #tpu.dot_dimension_numbers<[1], [0], [0], [1], [0, 0, 1, 1], [], []>} : vector<128x128xbf16>, vector<128x128xbf16>, vector<128x128xf32> -> vector<128x128xf32>
    %9 = arith.truncf %8 : vector<128x128xf32> to vector<128x128xbf16>
    %c0_6 = arith.constant 0 : index
    %c0_7 = arith.constant 0 : index
    %10 = vector.load %arg4[%c0_6, %c0_7] : memref<128x256xbf16, #tpu.memory_space<vmem>>, vector<128x256xbf16>
    %cst_8 = arith.constant dense<0.000000e+00> : vector<128x256xf32>
    %11 = tpu.matmul %1, %10, %cst_8 {dimension_numbers = #tpu.dot_dimension_numbers<[1], [0], [0], [1], [0, 0, 1, 1], [], []>} : vector<128x128xbf16>, vector<128x256xbf16>, vector<128x256xf32> -> vector<128x256xf32>
    %12 = arith.truncf %11 : vector<128x256xf32> to vector<128x256xbf16>
    %13 = vector.extract_strided_slice %12 {offsets = [0, 0], sizes = [128, 128], strides = [1, 1]} : vector<128x256xbf16> to vector<128x128xbf16>
    %14 = vector.extract_strided_slice %12 {offsets = [0, 128], sizes = [128, 128], strides = [1, 1]} : vector<128x256xbf16> to vector<128x128xbf16>
    %15 = vector.extract_strided_slice %9 {offsets = [0, 0], sizes = [128, 32], strides = [1, 1]} : vector<128x128xbf16> to vector<128x32xbf16>
    %16 = vector.extract_strided_slice %13 {offsets = [0, 0], sizes = [128, 32], strides = [1, 1]} : vector<128x128xbf16> to vector<128x32xbf16>
    %17 = vector.extract_strided_slice %14 {offsets = [0, 0], sizes = [128, 32], strides = [1, 1]} : vector<128x128xbf16> to vector<128x32xbf16>
    %cst_9 = arith.constant dense<0.000000e+00> : vector<128x128xf32>
    %18 = tpu.matmul %15, %16, %cst_9 {dimension_numbers = #tpu.dot_dimension_numbers<[1], [1], [0], [0], [0, 0, 1, 0], [], []>} : vector<128x32xbf16>, vector<128x32xbf16>, vector<128x128xf32> -> vector<128x128xf32>
    %cst_10 = arith.constant dense<0xFF800000> : vector<128xf32>
    %19 = vector.multi_reduction <maximumf>, %18, %cst_10 [1] : vector<128x128xf32> to vector<128xf32>
    %20 = vector.shape_cast %19 : vector<128xf32> to vector<128x1xf32>
    %21 = vector.broadcast %20 : vector<128x1xf32> to vector<128x128xf32>
    %22 = arith.subf %18, %21 : vector<128x128xf32>
    %23 = math.exp %22 : vector<128x128xf32>
    %cst_11 = arith.constant dense<0.000000e+00> : vector<128xf32>
    %24 = vector.multi_reduction <add>, %23, %cst_11 [1] : vector<128x128xf32> to vector<128xf32>
    %25 = vector.shape_cast %24 : vector<128xf32> to vector<128x1xf32>
    %26 = tpu.reciprocal %25 {approx = true} : vector<128x1xf32> -> vector<128x1xf32>
    %27 = vector.broadcast %26 : vector<128x1xf32> to vector<128x128xf32>
    %28 = arith.mulf %23, %27 : vector<128x128xf32>
    %29 = arith.truncf %28 : vector<128x128xf32> to vector<128x128xbf16>
    %cst_12 = arith.constant dense<0.000000e+00> : vector<128x32xf32>
    %30 = tpu.matmul %29, %17, %cst_12 {dimension_numbers = #tpu.dot_dimension_numbers<[1], [0], [0], [1], [0, 0, 1, 1], [], []>} : vector<128x128xbf16>, vector<128x32xbf16>, vector<128x32xf32> -> vector<128x32xf32>
    %31 = vector.extract_strided_slice %9 {offsets = [0, 32], sizes = [128, 32], strides = [1, 1]} : vector<128x128xbf16> to vector<128x32xbf16>
    %32 = vector.extract_strided_slice %13 {offsets = [0, 32], sizes = [128, 32], strides = [1, 1]} : vector<128x128xbf16> to vector<128x32xbf16>
    %33 = vector.extract_strided_slice %14 {offsets = [0, 32], sizes = [128, 32], strides = [1, 1]} : vector<128x128xbf16> to vector<128x32xbf16>
    %cst_13 = arith.constant dense<0.000000e+00> : vector<128x128xf32>
    %34 = tpu.matmul %31, %32, %cst_13 {dimension_numbers = #tpu.dot_dimension_numbers<[1], [1], [0], [0], [0, 0, 1, 0], [], []>} : vector<128x32xbf16>, vector<128x32xbf16>, vector<128x128xf32> -> vector<128x128xf32>
    %cst_14 = arith.constant dense<0xFF800000> : vector<128xf32>
    %35 = vector.multi_reduction <maximumf>, %34, %cst_14 [1] : vector<128x128xf32> to vector<128xf32>
    %36 = vector.shape_cast %35 : vector<128xf32> to vector<128x1xf32>
    %37 = vector.broadcast %36 : vector<128x1xf32> to vector<128x128xf32>
    %38 = arith.subf %34, %37 : vector<128x128xf32>
    %39 = math.exp %38 : vector<128x128xf32>
    %cst_15 = arith.constant dense<0.000000e+00> : vector<128xf32>
    %40 = vector.multi_reduction <add>, %39, %cst_15 [1] : vector<128x128xf32> to vector<128xf32>
    %41 = vector.shape_cast %40 : vector<128xf32> to vector<128x1xf32>
    %42 = tpu.reciprocal %41 {approx = true} : vector<128x1xf32> -> vector<128x1xf32>
    %43 = vector.broadcast %42 : vector<128x1xf32> to vector<128x128xf32>
    %44 = arith.mulf %39, %43 : vector<128x128xf32>
    %45 = arith.truncf %44 : vector<128x128xf32> to vector<128x128xbf16>
    %cst_16 = arith.constant dense<0.000000e+00> : vector<128x32xf32>
    %46 = tpu.matmul %45, %33, %cst_16 {dimension_numbers = #tpu.dot_dimension_numbers<[1], [0], [0], [1], [0, 0, 1, 1], [], []>} : vector<128x128xbf16>, vector<128x32xbf16>, vector<128x32xf32> -> vector<128x32xf32>
    %47 = vector.extract_strided_slice %9 {offsets = [0, 64], sizes = [128, 32], strides = [1, 1]} : vector<128x128xbf16> to vector<128x32xbf16>
    %48 = vector.extract_strided_slice %13 {offsets = [0, 64], sizes = [128, 32], strides = [1, 1]} : vector<128x128xbf16> to vector<128x32xbf16>
    %49 = vector.extract_strided_slice %14 {offsets = [0, 64], sizes = [128, 32], strides = [1, 1]} : vector<128x128xbf16> to vector<128x32xbf16>
    %cst_17 = arith.constant dense<0.000000e+00> : vector<128x128xf32>
    %50 = tpu.matmul %47, %48, %cst_17 {dimension_numbers = #tpu.dot_dimension_numbers<[1], [1], [0], [0], [0, 0, 1, 0], [], []>} : vector<128x32xbf16>, vector<128x32xbf16>, vector<128x128xf32> -> vector<128x128xf32>
    %cst_18 = arith.constant dense<0xFF800000> : vector<128xf32>
    %51 = vector.multi_reduction <maximumf>, %50, %cst_18 [1] : vector<128x128xf32> to vector<128xf32>
    %52 = vector.shape_cast %51 : vector<128xf32> to vector<128x1xf32>
    %53 = vector.broadcast %52 : vector<128x1xf32> to vector<128x128xf32>
    %54 = arith.subf %50, %53 : vector<128x128xf32>
    %55 = math.exp %54 : vector<128x128xf32>
    %cst_19 = arith.constant dense<0.000000e+00> : vector<128xf32>
    %56 = vector.multi_reduction <add>, %55, %cst_19 [1] : vector<128x128xf32> to vector<128xf32>
    %57 = vector.shape_cast %56 : vector<128xf32> to vector<128x1xf32>
    %58 = tpu.reciprocal %57 {approx = true} : vector<128x1xf32> -> vector<128x1xf32>
    %59 = vector.broadcast %58 : vector<128x1xf32> to vector<128x128xf32>
    %60 = arith.mulf %55, %59 : vector<128x128xf32>
    %61 = arith.truncf %60 : vector<128x128xf32> to vector<128x128xbf16>
    %cst_20 = arith.constant dense<0.000000e+00> : vector<128x32xf32>
    %62 = tpu.matmul %61, %49, %cst_20 {dimension_numbers = #tpu.dot_dimension_numbers<[1], [0], [0], [1], [0, 0, 1, 1], [], []>} : vector<128x128xbf16>, vector<128x32xbf16>, vector<128x32xf32> -> vector<128x32xf32>
    %63 = vector.extract_strided_slice %9 {offsets = [0, 96], sizes = [128, 32], strides = [1, 1]} : vector<128x128xbf16> to vector<128x32xbf16>
    %64 = vector.extract_strided_slice %13 {offsets = [0, 96], sizes = [128, 32], strides = [1, 1]} : vector<128x128xbf16> to vector<128x32xbf16>
    %65 = vector.extract_strided_slice %14 {offsets = [0, 96], sizes = [128, 32], strides = [1, 1]} : vector<128x128xbf16> to vector<128x32xbf16>
    %cst_21 = arith.constant dense<0.000000e+00> : vector<128x128xf32>
    %66 = tpu.matmul %63, %64, %cst_21 {dimension_numbers = #tpu.dot_dimension_numbers<[1], [1], [0], [0], [0, 0, 1, 0], [], []>} : vector<128x32xbf16>, vector<128x32xbf16>, vector<128x128xf32> -> vector<128x128xf32>
    %cst_22 = arith.constant dense<0xFF800000> : vector<128xf32>
    %67 = vector.multi_reduction <maximumf>, %66, %cst_22 [1] : vector<128x128xf32> to vector<128xf32>
    %68 = vector.shape_cast %67 : vector<128xf32> to vector<128x1xf32>
    %69 = vector.broadcast %68 : vector<128x1xf32> to vector<128x128xf32>
    %70 = arith.subf %66, %69 : vector<128x128xf32>
    %71 = math.exp %70 : vector<128x128xf32>
    %cst_23 = arith.constant dense<0.000000e+00> : vector<128xf32>
    %72 = vector.multi_reduction <add>, %71, %cst_23 [1] : vector<128x128xf32> to vector<128xf32>
    %73 = vector.shape_cast %72 : vector<128xf32> to vector<128x1xf32>
    %74 = tpu.reciprocal %73 {approx = true} : vector<128x1xf32> -> vector<128x1xf32>
    %75 = vector.broadcast %74 : vector<128x1xf32> to vector<128x128xf32>
    %76 = arith.mulf %71, %75 : vector<128x128xf32>
    %77 = arith.truncf %76 : vector<128x128xf32> to vector<128x128xbf16>
    %cst_24 = arith.constant dense<0.000000e+00> : vector<128x32xf32>
    %78 = tpu.matmul %77, %65, %cst_24 {dimension_numbers = #tpu.dot_dimension_numbers<[1], [0], [0], [1], [0, 0, 1, 1], [], []>} : vector<128x128xbf16>, vector<128x32xbf16>, vector<128x32xf32> -> vector<128x32xf32>
    %79 = tpu.concatenate %30, %46, %62, %78 in 1 : vector<128x32xf32>, vector<128x32xf32>, vector<128x32xf32>, vector<128x32xf32> -> vector<128x128xf32>
    %80 = arith.truncf %79 : vector<128x128xf32> to vector<128x128xbf16>
    %c0_25 = arith.constant 0 : index
    %c0_26 = arith.constant 0 : index
    %81 = vector.load %arg5[%c0_25, %c0_26] : memref<128x128xbf16, #tpu.memory_space<vmem>>, vector<128x128xbf16>
    %cst_27 = arith.constant dense<0.000000e+00> : vector<128x128xf32>
    %82 = tpu.matmul %80, %81, %cst_27 {dimension_numbers = #tpu.dot_dimension_numbers<[1], [0], [0], [1], [0, 0, 1, 1], [], []>} : vector<128x128xbf16>, vector<128x128xbf16>, vector<128x128xf32> -> vector<128x128xf32>
    %c0_28 = arith.constant 0 : index
    %c0_29 = arith.constant 0 : index
    %c0_30 = arith.constant 0 : index
    %83 = vector.load %arg6[%c0_28, %c0_29, %c0_30] : memref<1x128x128xf32, #tpu.memory_space<vmem>>, vector<1x128x128xf32>
    %84 = vector.shape_cast %83 : vector<1x128x128xf32> to vector<128x128xf32>
    %85 = vector.shape_cast %82 : vector<128x128xf32> to vector<1x128x128xf32>
    tpu.vector_store %arg6[%c0_28, %c0_29, %c0_30], %85 {strides = array<i32>} : memref<1x128x128xf32, #tpu.memory_space<vmem>>, vector<1x128x128xf32>,
    return
  }
  func.func @transform_0(%arg0: i32, %arg1: i32) -> (i32, i32, i32) {
    %c0_i32 = arith.constant 0 : i32
    %c0_i32_0 = arith.constant 0 : i32
    %c0_i32_1 = arith.constant 0 : i32
    return %arg0, %c0_i32, %c0_i32_0 : i32, i32, i32
  }
  func.func @transform_1(%arg0: i32, %arg1: i32) -> (i32, i32) {
    %c0_i32 = arith.constant 0 : i32
    %c0_i32_0 = arith.constant 0 : i32
    %c0_i32_1 = arith.constant 0 : i32
    return %c0_i32, %c0_i32_0 : i32, i32
  }
  func.func @transform_2(%arg0: i32, %arg1: i32) -> (i32, i32) {
    %c0_i32 = arith.constant 0 : i32
    %c0_i32_0 = arith.constant 0 : i32
    %c0_i32_1 = arith.constant 0 : i32
    return %c0_i32, %c0_i32_0 : i32, i32
  }
  func.func @transform_3(%arg0: i32, %arg1: i32) -> (i32, i32) {
    %c0_i32 = arith.constant 0 : i32
    %c0_i32_0 = arith.constant 0 : i32
    %c0_i32_1 = arith.constant 0 : i32
    return %c0_i32, %c0_i32_0 : i32, i32
  }
  func.func @transform_4(%arg0: i32, %arg1: i32) -> (i32, i32, i32) {
    %c0_i32 = arith.constant 0 : i32
    %c0_i32_0 = arith.constant 0 : i32
    return %arg0, %arg1, %c0_i32 : i32, i32, i32
  }
}

</mosaic_0001>

<bundles_post_ra>
// kernel: tpu_custom_call.1
= control target key start
LH: loop header
LB: loop body
LE: loop exit
PB: predicated region body
PF: predicated region fallthrough
CT: control target
= control target key end

     0   :  { %s5978_s0 = inlined_call_operand.hbm [shape: bf16[2,128,128], index: 0, kind: input, shape index: {}]   ;;  %s5979_s1 = inlined_call_operand.hbm [shape: bf16[128,128], index: 1, kind: input, shape index: {}]   ;;  %s5980_s2 = inlined_call_operand.hbm [shape: bf16[128,256], index: 2, kind: input, shape index: {}]   ;;  %s5981_s3 = inlined_call_operand.hbm [shape: bf16[128,128], index: 3, kind: input, shape index: {}]   ;;  %s5982_s4 = inlined_call_operand.hbm [shape: f32[2,128,128], index: 4, kind: output, shape index: {}]  }
   0x1   :  { %6031 = sst [smem:[#allocation41_spill]] %s5979_s1 }
   0x2   :  { %9 = vsyncpa [#allocation3], 0 }
   0x3   :  { %11 = vsyncpa [#allocation3 + $0x1], 0 }
   0x4   :  { %12 = vsyncpa [#allocation6], 0 }
   0x5   :  { %13 = vsyncpa [#allocation9], 0 }
   0x6   :  { %14 = vsyncpa [#allocation4], 0 }
   0x7   :  { %16 = vsyncpa [#allocation4 + $0x1], 0  ;;  %s4526_s15 = smov 0   ;;  %s4528_s16 = smov 0  }
   0x8   :  { %s4530_s17 = smov 0   ;;  %s4532_s18 = smov 0  }
   0x9   :  { %s4534_s19 = smov 0   ;;  %s4536_s20 = smov 0  }
   0xa LB: > { %s3130_s21 = sadd.s32 4294967295, %s4484_s20   ;;  %s3131_s22 = sadd.s32 4294967294, %s4484_s20   ;;  %s4484_s20 = sphi %s4536_s20, %s22_s20   ;;  %s4480_s19 = sphi %s4534_s19, %s6155_s19   ;;  %s4476_s18 = sphi %s4532_s18, %s6154_s18   ;;  %s4472_s17 = sphi %s4530_s17, %s6153_s17   ;;  %s4468_s16 = sphi %s4528_s16, %s6152_s16   ;;  %s4464_s15 = sphi %s4526_s15, %s6151_s15  }
   0xb   : > { %p54_p0 = scmp.ne.s32.totalorder %s4468_s16, %s4464_s15  ;;  %p4560_p1 = scmp.eq.s32.totalorder %s3130_s21, 0 }
   0xc   : > { %p4564_p2 = scmp.eq.s32.totalorder %s3130_s21, 1  ;;  %p149_p3 = scmp.eq.s32.totalorder %s3131_s22, 1 }
   0xd   : > { %s6032_s23 = scalar_select %p4560_p1, 1, 0 }
   0xe   : > { %s6033_s24 = scalar_select %p4564_p2, 1, 0 }
   0xf   : > { %p4570_p4 = por %p4560_p1, %p54_p0  ;;  %p3132_p5 = scmp.ge.s32.totalorder %s4484_s20, 1 }
  0x10   : > { %p4575_p6 = por %p149_p3, %p54_p0  ;;  %p156_p7 = scmp.lt.s32.totalorder %s4484_s20, 3 }
  0x11   : > { %s6034_s25 = scalar_select %p4570_p4, 1, 0 }
  0x12   : > { %s6035_s26 = scalar_select %p4575_p6, 1, 0 }
  0x13   : > { %p4580_p8 = pnand %p3132_p5, %p156_p7  ;;  %s4486_s28 = smov [#allocation5]  }
  0x14   : > { %s168_s29 = sshll.u32 %s4486_s28, 4  ;;  %s4487_s5 = smov [#allocation7]   ;;  %s4584_s29 = int_to_ptr.vmem [resolvable:$true] %s168_s29 }
  0x15   : > { %s6036_s27 = scalar_select %p4580_p8, 1, 0 }
  0x16   : > { %p3761_p9 = pneg %p4580_p8  ;;  %s181_s6 = sshll.u32 %s4487_s5, 4  ;;  %s4595_s6 = int_to_ptr.vmem [resolvable:$true] %s181_s6 }
  0x17   : > { %s6038_s1 = sld [smem:[#allocation41_spill]] }
  0x18   : > { %p4591_p11 = pnand %p3761_p9, %p4560_p1 }
  0x1a   : > { %p4605_p13 = pneg %p4591_p11 }
  0x1d   : > { %s4280_s9 = scalar_lea.hbm %s6038_s1, 1024 }
  0x1e   : > { %p4281_p12 = scmp.ne.s32.totalorder %s6038_s1, %s4280_s9  ;;  %p4287_p5 = scmp.lt.u32.totalorder %s4280_s9, %s6038_s1 }
  0x20   : > { %p4283_p0 = pnand %p4605_p13, %p4281_p12 }
  0x22   : > { %p4284_p3 = pneg %p4283_p0 }
  0x24   : > { %p4289_p7 = pnand %p4287_p5, %p4284_p3 }
  0x26   : > { %4292 = shalt.err (!%p4289_p7)
}
  0x27   : > { %s4293_s21 = scalar_lea.vmem %s4584_s29, 1024  ;;  %p4301_p1 = scmp.lt.s32.totalorder %s4584_s29, %s4584_s29 }
  0x28   : > { %p4294_p9 = scmp.ne.s32.totalorder %s4584_s29, %s4293_s21  ;;  %p4302_p4 = scmp.lt.s32.totalorder %s4293_s21, %s4293_s21 }
  0x2a   : > { %p4296_p10 = pnand %p4294_p9, %p4605_p13  ;;  %p4303_p12 = por %p4302_p4, %p4301_p1 }
  0x2c   : > { %p4297_p6 = pneg %p4296_p10 }
  0x2e   : > { %p4304_p0 = pnand %p4303_p12, %p4297_p6 }
  0x30   : > { %4307 = shalt.err (!%p4304_p0)
}
  0x31   : > { %s5986_s22 = smov 64   ;;  %s5988_s28 = smov 4  }
  0x32   : > { %3764 = dma.hbm_to_vmem [thread:$0]  (!%p4591_p11), %s6038_s1, 1024, %s4584_s29, [#allocation6], %s5986_s22, %s5986_s22, %s5988_s28  }
  0x33   : > { %s4308_s10 = scalar_lea.hbm %s5980_s2, 2048 }
  0x34   : > { %p4309_p1 = scmp.ne.s32.totalorder %s5980_s2, %s4308_s10  ;;  %p4315_p10 = scmp.lt.u32.totalorder %s4308_s10, %s5980_s2 }
  0x36   : > { %p4311_p4 = pnand %p4309_p1, %p4605_p13 }
  0x38   : > { %p4312_p6 = pneg %p4311_p4 }
  0x3a   : > { %p4317_p3 = pnand %p4315_p10, %p4312_p6 }
  0x3c   : > { %4320 = shalt.err (!%p4317_p3)
}
  0x3d   : > { %s4321_s29 = scalar_lea.vmem %s4595_s6, 2048  ;;  %p4329_p12 = scmp.lt.s32.totalorder %s4595_s6, %s4595_s6 }
  0x3e   : > { %p4322_p5 = scmp.ne.s32.totalorder %s4595_s6, %s4321_s29  ;;  %p4330_p0 = scmp.lt.s32.totalorder %s4321_s29, %s4321_s29 }
  0x40   : > { %p4324_p7 = pnand %p4322_p5, %p4605_p13  ;;  %p4331_p1 = por %p4330_p0, %p4329_p12 }
  0x42   : > { %p4325_p9 = pneg %p4324_p7 }
  0x44   : > { %p4332_p4 = pnand %p4331_p1, %p4325_p9 }
  0x46   : > { %4335 = shalt.err (!%p4332_p4)
}
  0x47   : > { %s4490_s5 = smov 128   ;;  %s4491_s7 = smov 8  }
  0x48   : > { %3767 = dma.hbm_to_vmem [thread:$0]  (!%p4591_p11), %s5980_s2, 2048, %s4595_s6, [#allocation6], %s4490_s5, %s4490_s5, %s4491_s7  }
  0x49   : > { %s4492_s10 = smov [#allocation8]   ;;  %s4336_s21 = scalar_lea.hbm %s5981_s3, 1024 }
  0x4a   : > { %s194_s11 = sshll.u32 %s4492_s10, 4  ;;  %p4337_p6 = scmp.ne.s32.totalorder %s5981_s3, %s4336_s21  ;;  %s195_s11 = int_to_ptr.vmem [resolvable:$true] %s194_s11 }
  0x4b   : > { %p4343_p5 = scmp.lt.u32.totalorder %s4336_s21, %s5981_s3 }
  0x4c   : > { %p4339_p10 = pnand %p4337_p6, %p4605_p13 }
  0x4e   : > { %p4340_p3 = pneg %p4339_p10 }
  0x50   : > { %p4345_p7 = pnand %p4343_p5, %p4340_p3 }
  0x52   : > { %4348 = shalt.err (!%p4345_p7)
}
  0x53   : > { %s4349_s6 = scalar_lea.vmem %s195_s11, 1024  ;;  %p4357_p1 = scmp.lt.s32.totalorder %s195_s11, %s195_s11 }
  0x54   : > { %p4350_p9 = scmp.ne.s32.totalorder %s195_s11, %s4349_s6  ;;  %p4358_p4 = scmp.lt.s32.totalorder %s4349_s6, %s4349_s6 }
  0x56   : > { %p4352_p12 = pnand %p4350_p9, %p4605_p13  ;;  %p4359_p8 = por %p4358_p4, %p4357_p1 }
  0x58   : > { %p4353_p0 = pneg %p4352_p12 }
  0x5a   : > { %p4360_p2 = pnand %p4359_p8, %p4353_p0 }
  0x5c   : > { %4363 = shalt.err (!%p4360_p2)
}
  0x5d   : > { %s6040_s22 = smov 4   ;;  %s6041_s5 = smov 64  }
  0x5e   : > { %3770 = dma.hbm_to_vmem [thread:$0]  (!%p4591_p11), %s5981_s3, 1024, %s195_s11, [#allocation9], %s6041_s5, %s6041_s5, %s6040_s22  }
  0x5f   : > { %s34_s12 = sadd.s32 1, %s4480_s19  ;;  %s41_s30 = sadd.s32 1, %s4472_s17 }
  0x60   : > { %p36_p2 = scmp.ge.s32.totalorder %s34_s12, 2  ;;  %p48_p8 = scmp.ne.s32.totalorder %s4472_s17, %s4468_s16 }
  0x61   : > { %p49_p13 = scmp.eq.s32.totalorder %s4484_s20, 0  ;;  %p6043_p10 = scmp.ne.s32.totalorder %s6033_s24, 0 }
  0x62   : > { %s6157_s12 = smov (%p36_p2, %s34_s12), 0  ;;  %p3782_p11 = scmp.lt.s32.totalorder %s4484_s20, 2 }
  0x63   : > { %p4680_p6 = por %p49_p13, %p48_p8  ;;  %p4686_p3 = por %p6043_p10, %p48_p8 }
  0x64   : > { %s38_s9 = ssub.s32 %s4480_s19, %s6157_s12  ;;  %s208_s10 = sand.u32 1, %s4472_s17  }
  0x65   : > { %p39_p5 = scmp.eq.s32.totalorder %s38_s9, 0  ;;  %s3137_s11 = sshll.u32 %s208_s10, 6 }
  0x66   : > { %s3231_s14 = sshll.u32 %s4480_s19, 10  ;;  %s212_s24 = scalar_lea.vmem [#allocation2], %s3137_s11 }
  0x67   : > { %s4695_s13 = scalar_select %p39_p5, %s4472_s17, %s41_s30  }
  0x68   : > { %s4701_s6 = scalar_lea.hbm %s5978_s0, %s3231_s14  ;;  %s219_s1 = sshll.u32 %s212_s24, 4  ;;  %s4703_s1 = int_to_ptr.vmem [resolvable:$true] %s219_s1 }
  0x69   : > { %p4707_p7 = pnand %p3782_p11, %p4680_p6  ;;  %s4711_s30 = scalar_lea.sflag [#allocation3], %s208_s10 }
  0x6a   : > { %s4364_s9 = scalar_lea.hbm %s4701_s6, 1024  ;;  %s4369_s7 = scalar_lea.hbm %s5978_s0, 2048 }
  0x6b   : > { %p4365_p9 = scmp.ne.s32.totalorder %s4701_s6, %s4364_s9  ;;  %p4366_p12 = pneg %p4707_p7 }
  0x6c   : > { %p4370_p4 = scmp.lt.u32.totalorder %s4701_s6, %s5978_s0  ;;  %p4371_p2 = scmp.lt.u32.totalorder %s4369_s7, %s4364_s9 }
  0x6d   : > { %p4367_p0 = pnand %p4366_p12, %p4365_p9  ;;  %p4373_p13 = scmp.lt.u32.totalorder %s4364_s9, %s4701_s6 }
  0x6e   : > { %p4372_p8 = por %p4371_p2, %p4370_p4 }
  0x6f   : > { %p4368_p1 = pneg %p4367_p0 }
  0x70   : > { %p4374_p6 = por %p4373_p13, %p4372_p8 }
  0x72   : > { %p4375_p10 = pnand %p4374_p6, %p4368_p1 }
  0x74   : > { %4378 = shalt.err (!%p4375_p10)
}
  0x75   : > { %s4379_s10 = scalar_lea.vmem %s4703_s1, 1024  ;;  %s4493_s24 = smov [#allocation2]  }
  0x76   : > { %p4380_p11 = scmp.ne.s32.totalorder %s4703_s1, %s4379_s10  ;;  %s4384_s11 = sshll.u32 %s4493_s24, 4  ;;  %s4385_s11 = int_to_ptr.vmem [resolvable:$false] %s4384_s11 }
  0x77   : > { %s4386_s14 = scalar_lea.vmem %s4385_s11, 2048  ;;  %p4387_p0 = scmp.lt.s32.totalorder %s4703_s1, %s4385_s11 }
  0x78   : > { %p4382_p5 = pnand %p4380_p11, %p4366_p12  ;;  %p4388_p4 = scmp.lt.s32.totalorder %s4386_s14, %s4379_s10 }
  0x7a   : > { %p4383_p9 = pneg %p4382_p5  ;;  %p4389_p2 = por %p4388_p4, %p4387_p0 }
  0x7c   : > { %p4390_p8 = pnand %p4389_p2, %p4383_p9 }
  0x7e   : > { %4393 = shalt.err (!%p4390_p8)
}
  0x7f   : > { %3774 = dma.hbm_to_vmem [thread:$0]  (!%p4707_p7), %s4701_s6, 1024, %s4703_s1, %s4711_s30, %s6041_s5, %s6041_s5, %s6040_s22  }
  0x80   : > { %p6046_p12 = scmp.ne.s32.totalorder %s6036_s27, 0 }
  0x82   : > { %231 = sbr.rel (%p6046_p12) target bundleno = 3047 (0xbe7), region = 36 }
  0x89   : > { %s4745_s9 = sand.u32 1, %s4468_s16   ;;  %p6047_p1 = scmp.ne.s32.totalorder %s6034_s25, 0 }
  0x8a   : > { %s3141_s7 = sshll.u32 %s4745_s9, 6  ;;  %s234_s21 = scalar_lea.sflag [#allocation3], %s4745_s9 }
  0x8b   : > { %s4749_s29 = scalar_lea.vmem [#allocation2], %s3141_s7 }
  0x8c   : > { %4447 = dma.done.wait (%p6047_p1), %s234_s21, 1024  }
  0x8d   : > { %4449 = vsyncadd (%p6047_p1), %s234_s21, 4294966272  ;;  %p6048_p7 = scmp.ne.s32.totalorder %s6032_s23, 0 }
  0x8f   : > { %4451 = dma.done.wait (%p6048_p7), [#allocation6], 3072  }
  0x90   : > { %4453 = vsyncadd (%p6048_p7), [#allocation6], 4294964224 }
  0x91   : > { %4455 = dma.done.wait (%p6048_p7), [#allocation9], 1024  }
  0x92   : > { %4457 = vsyncadd (%p6048_p7), [#allocation9], 4294966272  ;;  %v4494_v0 = vmov 0   ;;  %v3968_v1 = vld [vmem:[#allocation7 + $0x4] ss:$8 sps:$4 sm:$0xff]   ;;  %v3996_v14 = vld [vmem:[#allocation5 + $0x10] sm:$0xff]  }
  0x93   : > { %706 = vmatprep.mubr.bf16.mxu1 %v4494_v0  ;;  %v3970_v2 = vld [vmem:[#allocation7] ss:$8 sps:$4 sm:$0xff]   ;;  %674 = vmatprep.subr.bf16.mxu1 %v3968_v1  ;;  %v3971_v3 = vld [vmem:[#allocation7 + $0x14] ss:$8 sps:$4 sm:$0xff]   ;;  %v3973_v4 = vld [vmem:[#allocation7 + $0x10] ss:$8 sps:$4 sm:$0xff]  }
  0x94   : > { %675 = vmatpush1.bf16.msra.mxu1 %v3970_v2  ;;  %v3974_v5 = vld [vmem:[#allocation7 + $0x24] ss:$8 sps:$4 sm:$0xff]   ;;  %v3976_v6 = vld [vmem:[#allocation7 + $0x20] ss:$8 sps:$4 sm:$0xff]   ;;  %v3977_v7 = vld [vmem:[#allocation7 + $0x34] ss:$8 sps:$4 sm:$0xff]  }
  0x95   : > { %676 = vmatprep.subr.bf16.mxu1 %v3971_v3  ;;  %v3979_v8 = vld [vmem:[#allocation7 + $0x30] ss:$8 sps:$4 sm:$0xff]   ;;  %v3980_v9 = vld [vmem:[#allocation7 + $0x44] ss:$8 sps:$4 sm:$0xff]   ;;  %v3982_v11 = vld [vmem:[#allocation7 + $0x40] ss:$8 sps:$4 sm:$0xff]  }
  0x96   : > { %v3993_v10 = vld [vmem:[#allocation5] sm:$0xff]   ;;  %v3995_v12 = vld [vmem:[#allocation5 + $0x8] sm:$0xff]   ;;  %v3983_v13 = vld [vmem:[#allocation7 + $0x54] ss:$8 sps:$4 sm:$0xff]   ;;  %vm803_vm0 = vcmask 261120   ;;  %s4495_s23 = smov 96  }
  0x97   : > { %3393 = vmatprep.subr.bf16.mxu0 %v3993_v10  ;;  %v3985_v15 = vld [vmem:[#allocation7 + $0x50] ss:$8 sps:$4 sm:$0xff]   ;;  %v3986_v16 = vld [vmem:[#allocation7 + $0x64] ss:$8 sps:$4 sm:$0xff]   ;;  %v3988_v18 = vld [vmem:[#allocation7 + $0x60] ss:$8 sps:$4 sm:$0xff]  }
  0x98   : > { %677 = vmatpush1.bf16.msra.mxu1 %v3973_v4  ;;  %3394 = vmatpush3.bf16.msra.mxu0 %v3993_v10  ;;  %v3998_v17 = vld [vmem:[#allocation5 + $0x18] sm:$0xff]   ;;  %v3999_v20 = vld [vmem:[#allocation5 + $0x20] sm:$0xff]   ;;  %v4001_v23 = vld [vmem:[#allocation5 + $0x28] sm:$0xff]   ;;  %s4496_s25 = smov 64   ;;  %s4497_s27 = smov 32   ;;  %vm2780_vm1 = vcmask 523264  }
  0x99   : > { %678 = vmatprep.subr.bf16.mxu1 %v3974_v5  ;;  %3395 = vmatprep.subr.bf16.mxu0 %v3995_v12  ;;  %v3989_v19 = vld [vmem:[#allocation7 + $0x74] ss:$8 sps:$4 sm:$0xff]   ;;  %v4005_v21 = vld [vmem:[%s4749_s29] sm:$0xff]   ;;  %v3991_v22 = vld [vmem:[#allocation7 + $0x70] ss:$8 sps:$4 sm:$0xff]   ;;  %vm2797_vm2 = vcmask 785408  }
  0x9a   : > { %3409 = vmatprep.mubr.bf16.mxu0 %v4005_v21  ;;  %v3992_v24 = vld [vmem:[%s4749_s29] sm:$0xff]   ;;  %v4002_v25 = vld [vmem:[#allocation5 + $0x30] sm:$0xff]   ;;  %v4004_v26 = vld [vmem:[#allocation5 + $0x38] sm:$0xff]   ;;  %s3145_s22 = sshll.u32 %s4745_s9, 7  ;;  %s3232_s6 = sshll.u32 %s4476_s18, 11 }
  0x9b   : > { %v3994_v27 = vld [vmem:[%s4749_s29 + $0x8] sm:$0xff]   ;;  %v4008_v29 = vld [vmem:[%s4749_s29 + $0x10] sm:$0xff]   ;;  %v4009_v31 = vld [vmem:[%s4749_s29 + $0x18] sm:$0xff]   ;;  %s5904_s5 = scalar_lea.vmem [#allocation10], %s3145_s22  ;;  %s5924_s10 = scalar_lea.hbm %s5982_s4, %s3232_s6 }
  0x9c   : > { %679 = vmatpush1.bf16.msra.mxu1 %v3976_v6  ;;  %3396 = vmatpush3.bf16.msra.mxu0 %v3995_v12  ;;  %v4006_v28 = vld [vmem:[%s4749_s29 + $0x8] sm:$0xff]   ;;  %v3997_v30 = vld [vmem:[%s4749_s29 + $0x10] sm:$0xff]   ;;  %v4011_v32 = vld [vmem:[%s4749_s29 + $0x20] sm:$0xff]   ;;  %s3015_s1 = sshll.u32 %s5904_s5, 4  ;;  %s3000_s18 = scalar_lea.sflag [#allocation4], %s4745_s9  ;;  %s5926_s1 = int_to_ptr.vmem [resolvable:$true] %s3015_s1 }
  0x9d   : > { %680 = vmatprep.subr.bf16.mxu1 %v3977_v7  ;;  %3397 = vmatprep.subr.bf16.mxu0 %v3996_v14  ;;  %v4000_v33 = vld [vmem:[%s4749_s29 + $0x18] sm:$0xff]   ;;  %v4012_v34 = vld [vmem:[%s4749_s29 + $0x28] sm:$0xff]   ;;  %v4014_v35 = vld [vmem:[%s4749_s29 + $0x30] sm:$0xff]   ;;  %s4394_s24 = scalar_lea.vmem %s5926_s1, 2048  ;;  %s4498_s11 = smov [#allocation10]  }
  0x9e   : > { %v4003_v36 = vld [vmem:[%s4749_s29 + $0x20] sm:$0xff]   ;;  %v4015_v37 = vld [vmem:[%s4749_s29 + $0x38] sm:$0xff]   ;;  %v4007_v38 = vld [vmem:[%s4749_s29 + $0x28] sm:$0xff]   ;;  %p4395_p13 = scmp.ne.s32.totalorder %s5926_s1, %s4394_s24  ;;  %s4398_s14 = sshll.u32 %s4498_s11, 4  ;;  %s4399_s14 = int_to_ptr.vmem [resolvable:$false] %s4398_s14 }
  0x9f   : > { %v4010_v39 = vld [vmem:[%s4749_s29 + $0x30] sm:$0xff]   ;;  %v4013_v40 = vld [vmem:[%s4749_s29 + $0x38] sm:$0xff]   ;;  %s4400_s7 = scalar_lea.vmem %s4399_s14, 4096  ;;  %p4401_p11 = scmp.lt.s32.totalorder %s5926_s1, %s4399_s14 }
  0xa0   : > { %681 = vmatpush1.bf16.msra.mxu1 %v3979_v8  ;;  %3398 = vmatpush3.bf16.msra.mxu0 %v3996_v14  ;;  %p4396_p6 = pnand %p4395_p13, %p4686_p3  ;;  %p4402_p5 = scmp.lt.s32.totalorder %s4400_s7, %s4394_s24 }
  0xa1   : > { %682 = vmatprep.subr.bf16.mxu1 %v3980_v9  ;;  %3399 = vmatprep.subr.bf16.mxu0 %v3998_v17 }
  0xa2   : > { %p4397_p10 = pneg %p4396_p6  ;;  %p4403_p9 = por %p4402_p5, %p4401_p11 }
  0xa4   : > { %683 = vmatpush1.bf16.msra.mxu1 %v3982_v11  ;;  %3400 = vmatpush3.bf16.msra.mxu0 %v3998_v17  ;;  %p4404_p0 = pnand %p4403_p9, %p4397_p10 }
  0xa5   : > { %684 = vmatprep.subr.bf16.mxu1 %v3983_v13  ;;  %3401 = vmatprep.subr.bf16.mxu0 %v3999_v20 }
  0xa8   : > { %685 = vmatpush1.bf16.msra.mxu1 %v3985_v15  ;;  %3402 = vmatpush3.bf16.msra.mxu0 %v3999_v20 }
  0xa9   : > { %686 = vmatprep.subr.bf16.mxu1 %v3986_v16  ;;  %3403 = vmatprep.subr.bf16.mxu0 %v4001_v23 }
  0xac   : > { %687 = vmatpush1.bf16.msra.mxu1 %v3988_v18  ;;  %3404 = vmatpush3.bf16.msra.mxu0 %v4001_v23 }
  0xad   : > { %688 = vmatprep.subr.bf16.mxu1 %v3989_v19  ;;  %3405 = vmatprep.subr.bf16.mxu0 %v4002_v25 }
  0xb0   : > { %689 = vmatpush1.bf16.msra.mxu1 %v3991_v22  ;;  %3406 = vmatpush3.bf16.msra.mxu0 %v4002_v25 }
  0xb1   : > { %3407 = vmatprep.subr.bf16.mxu0 %v4004_v26 }
  0xb3   : > { %707 = vmatmul.mubr.bf16.vlgmr.msra.gmra.mrb[0].mxu1 %v3992_v24 }
  0xb4   : > { %716 = vmatprep.mubr.bf16.mxu1 %v4494_v0  ;;  %3408 = vmatpush3.bf16.msra.mxu0 %v4004_v26 }
  0xb7   : > { %3410 = vmatmul.mubr.bf16.vlgmr.msra.gmra.mrb[0].mxu0 %v4006_v28 }
  0xb8   : > { %3413 = vmatprep.mubr.bf16.mxu0 %v4008_v29 }
  0xbb   : > { %717 = vmatmul.mubr.bf16.gmra.mrb[4].mxu1 %v3994_v27 }
  0xbc   : > { %726 = vmatprep.mubr.bf16.mxu1 %v4494_v0 }
  0xbf   : > { %3414 = vmatmul.mubr.bf16.gmra.mrb[4].mxu0 %v4009_v31 }
  0xc0   : > { %3417 = vmatprep.mubr.bf16.mxu0 %v4011_v32 }
  0xc3   : > { %727 = vmatmul.mubr.bf16.gmra.mrb[8].mxu1 %v3997_v30 }
  0xc4   : > { %736 = vmatprep.mubr.bf16.mxu1 %v4494_v0 }
  0xc7   : > { %3418 = vmatmul.mubr.bf16.gmra.mrb[8].mxu0 %v4012_v34 }
  0xc8   : > { %3421 = vmatprep.mubr.bf16.mxu0 %v4014_v35 }
  0xcb   : > { %737 = vmatmul.mubr.bf16.gmra.mrb[12].mxu1 %v4000_v33 }
  0xcc   : > { %746 = vmatprep.mubr.bf16.mxu1 %v4494_v0 }
  0xcf   : > { %3422 = vmatmul.mubr.bf16.gmra.mrb[12].mxu0 %v4015_v37 }
  0xd3   : > { %747 = vmatmul.mubr.bf16.gmra.mrb[16].mxu1 %v4003_v36 }
  0xd4   : > { %756 = vmatprep.mubr.bf16.mxu1 %v4494_v0 }
  0xdb   : > { %757 = vmatmul.mubr.bf16.gmra.mrb[20].mxu1 %v4007_v38 }
  0xdc   : > { %766 = vmatprep.mubr.bf16.mxu1 %v4494_v0 }
  0xe3   : > { %767 = vmatmul.mubr.bf16.gmra.mrb[24].mxu1 %v4010_v39 }
  0xe4   : > { %776 = vmatprep.mubr.bf16.mxu1 %v4494_v0 }
  0xeb   : > { %777 = vmatmul.mubr.bf16.gmra.mrb[28].mxu1 %v4013_v40 }
 0x186   : > { %v708_v41 = vpop.f32.mrb[0].mxu1 }
 0x187   : > { %v710_v42 = vpop.f32.mrb[1].mxu1 }
 0x188   : > { %v712_v43 = vpop.f32.mrb[2].mxu1 }
 0x189   : > { %v4787_v44 = vpack.c.bf16 %v712_v43, %v708_v41  ;;  %v714_v45 = vpop.f32.mrb[3].mxu1 }
 0x18a   : > { %v4789_v46 = vpack.c.bf16 %v714_v45, %v710_v42  ;;  %v3411_v54 = vpop.f32.mrb[0].mxu0 }
 0x18b   : > { %6049 = vst [vmem:[#allocation15_spill] sm:$0xff] %v4787_v44  ;;  %1230 = vrot.lane.b32.xlu0 %v4787_v44, %s4495_s23  ;;  %3713 = vmatprep.subr.msk.bf16.mxu0 %vm803_vm0, %v4787_v44  ;;  %v829_v47 = vsel %vm803_vm0, %v4787_v44, 0  ;;  %v459_v56 = vpop.f32.mrb[1].mxu0 }
 0x18c   : > { %6050 = vst [vmem:[#allocation16_spill] sm:$0xff] %v4789_v46  ;;  %3426 = vmatpush3.bf16.xpose.msra.mxu0 %v829_v47  ;;  %3457 = vmatprep.subr.bf16.mxu1 %v4789_v46  ;;  %v3412_v57 = vpop.f32.mrb[2].mxu0 }
 0x18d   : > { %3458 = vmatpush3.bf16.msra.mxu1 %v4789_v46  ;;  %v4811_v58 = vpack.c.bf16 %v3412_v57, %v3411_v54  ;;  %v462_v59 = vpop.f32.mrb[3].mxu0 }
 0x18e   : > { %v718_v48 = vpop.f32.mrb[4].mxu1  ;;  %v4813_v61 = vpack.c.bf16 %v462_v59, %v459_v56 }
 0x18f   : > { %v720_v49 = vpop.f32.mrb[5].mxu1  ;;  %6052 = vst [vmem:[#allocation18_spill] sm:$0xff] %v4811_v58 }
 0x190   : > { %v722_v50 = vpop.f32.mrb[6].mxu1  ;;  %6053 = vst [vmem:[#allocation19_spill] sm:$0xff] %v4813_v61  ;;  %3441 = vmatprep.mubr.msk.bf16.mxu0 %vm803_vm0, %v4813_v61 }
 0x191   : > { %v4799_v51 = vpack.c.bf16 %v722_v50, %v718_v48  ;;  %v724_v52 = vpop.f32.mrb[7].mxu1 }
 0x192   : > { %v4801_v53 = vpack.c.bf16 %v724_v52, %v720_v49  ;;  %v3415_v3 = vpop.f32.mrb[4].mxu0 }
 0x193   : > { %6051 = vst [vmem:[#allocation17_spill] sm:$0xff] %v4799_v51  ;;  %1232 = vrot.lane.b32.xlu0 %v4799_v51, %s4495_s23  ;;  %3714 = vmatprep.subr.msk.bf16.mxu0 %vm803_vm0, %v4799_v51  ;;  %v832_v55 = vsel %vm803_vm0, %v4799_v51, 0  ;;  %v475_v5 = vpop.f32.mrb[5].mxu0 }
 0x194   : > { %3428 = vmatpush3.bf16.xpose.msra.mxu0 %v832_v55  ;;  %3459 = vmatprep.subr.bf16.mxu1 %v4801_v53  ;;  %v3416_v6 = vpop.f32.mrb[6].mxu0 }
 0x195   : > { %3460 = vmatpush3.bf16.msra.mxu1 %v4801_v53  ;;  %v4829_v7 = vpack.c.bf16 %v3416_v6, %v3415_v3  ;;  %v478_v8 = vpop.f32.mrb[7].mxu0 }
 0x196   : > { %v728_v60 = vpop.f32.mrb[8].mxu1  ;;  %v4831_v10 = vpack.c.bf16 %v478_v8, %v475_v5 }
 0x197   : > { %v730_v62 = vpop.f32.mrb[9].mxu1  ;;  %6056 = vst [vmem:[#allocation22_spill] sm:$0xff] %v4829_v7 }
 0x198   : > { %v732_v63 = vpop.f32.mrb[10].mxu1  ;;  %6057 = vst [vmem:[#allocation23_spill] sm:$0xff] %v4831_v10 }
 0x199   : > { %v4817_v0 = vpack.c.bf16 %v732_v63, %v728_v60  ;;  %v734_v1 = vpop.f32.mrb[11].mxu1 }
 0x19a   : > { %v4819_v2 = vpack.c.bf16 %v734_v1, %v730_v62  ;;  %v3419_v16 = vpop.f32.mrb[8].mxu0 }
 0x19b   : > { %6054 = vst [vmem:[#allocation20_spill] sm:$0xff] %v4817_v0  ;;  %1234 = vrot.lane.b32.xlu1 %v4817_v0, %s4495_s23  ;;  %3715 = vmatprep.subr.msk.bf16.mxu0 %vm803_vm0, %v4817_v0  ;;  %v835_v4 = vsel %vm803_vm0, %v4817_v0, 0  ;;  %v491_v18 = vpop.f32.mrb[9].mxu0 }
 0x19c   : > { %6055 = vst [vmem:[#allocation21_spill] sm:$0xff] %v4819_v2  ;;  %3430 = vmatpush3.bf16.xpose.msra.mxu0 %v835_v4  ;;  %3461 = vmatprep.subr.bf16.mxu1 %v4819_v2  ;;  %v3420_v19 = vpop.f32.mrb[10].mxu0 }
 0x19d   : > { %3462 = vmatpush3.bf16.msra.mxu1 %v4819_v2  ;;  %v4845_v20 = vpack.c.bf16 %v3420_v19, %v3419_v16  ;;  %v494_v21 = vpop.f32.mrb[11].mxu0 }
 0x19e   : > { %v738_v9 = vpop.f32.mrb[12].mxu1  ;;  %v4847_v23 = vpack.c.bf16 %v494_v21, %v491_v18 }
 0x19f   : > { %v740_v11 = vpop.f32.mrb[13].mxu1  ;;  %6059 = vst [vmem:[#allocation25_spill] sm:$0xff] %v4845_v20 }
 0x1a0   : > { %v742_v12 = vpop.f32.mrb[14].mxu1 }
 0x1a1   : > { %v4833_v13 = vpack.c.bf16 %v742_v12, %v738_v9  ;;  %v744_v14 = vpop.f32.mrb[15].mxu1 }
 0x1a2   : > { %v4835_v15 = vpack.c.bf16 %v744_v14, %v740_v11  ;;  %v3423_v29 = vpop.f32.mrb[12].mxu0 }
 0x1a3   : > { %6058 = vst [vmem:[#allocation24_spill] sm:$0xff] %v4833_v13  ;;  %1236 = vrot.lane.b32.xlu1 %v4833_v13, %s4495_s23  ;;  %3716 = vmatprep.subr.msk.bf16.mxu0 %vm803_vm0, %v4833_v13  ;;  %v838_v17 = vsel %vm803_vm0, %v4833_v13, 0  ;;  %v507_v31 = vpop.f32.mrb[13].mxu0 }
 0x1a4   : > { %3432 = vmatpush3.bf16.xpose.msra.mxu0 %v838_v17  ;;  %3463 = vmatprep.subr.bf16.mxu1 %v4835_v15  ;;  %v3424_v32 = vpop.f32.mrb[14].mxu0 }
 0x1a5   : > { %3464 = vmatpush3.bf16.msra.mxu1 %v4835_v15  ;;  %v4861_v33 = vpack.c.bf16 %v3424_v32, %v3423_v29  ;;  %v510_v34 = vpop.f32.mrb[15].mxu0 }
 0x1a6   : > { %v748_v22 = vpop.f32.mrb[16].mxu1  ;;  %v4863_v36 = vpack.c.bf16 %v510_v34, %v507_v31 }
 0x1a7   : > { %v750_v24 = vpop.f32.mrb[17].mxu1  ;;  %6062 = vst [vmem:[#allocation28_spill] sm:$0xff] %v4861_v33 }
 0x1a8   : > { %v752_v25 = vpop.f32.mrb[18].mxu1 }
 0x1a9   : > { %v4849_v26 = vpack.c.bf16 %v752_v25, %v748_v22  ;;  %v754_v27 = vpop.f32.mrb[19].mxu1 }
 0x1aa   : > { %v4851_v28 = vpack.c.bf16 %v754_v27, %v750_v24 }
 0x1ab   : > { %6060 = vst [vmem:[#allocation26_spill] sm:$0xff] %v4849_v26  ;;  %1238 = vrot.lane.b32.xlu0 %v4849_v26, %s4495_s23  ;;  %3717 = vmatprep.subr.msk.bf16.mxu0 %vm803_vm0, %v4849_v26  ;;  %v841_v30 = vsel %vm803_vm0, %v4849_v26, 0 }
 0x1ac   : > { %6061 = vst [vmem:[#allocation27_spill] sm:$0xff] %v4851_v28  ;;  %3434 = vmatpush3.bf16.xpose.msra.mxu0 %v841_v30  ;;  %3465 = vmatprep.subr.bf16.mxu1 %v4851_v28 }
 0x1ad   : > { %3466 = vmatpush3.bf16.msra.mxu1 %v4851_v28 }
 0x1ae   : > { %v758_v35 = vpop.f32.mrb[20].mxu1 }
 0x1af   : > { %v760_v37 = vpop.f32.mrb[21].mxu1 }
 0x1b0   : > { %v762_v38 = vpop.f32.mrb[22].mxu1 }
 0x1b1   : > { %v4865_v39 = vpack.c.bf16 %v762_v38, %v758_v35  ;;  %v764_v40 = vpop.f32.mrb[23].mxu1 }
 0x1b2   : > { %v4867_v41 = vpack.c.bf16 %v764_v40, %v760_v37 }
 0x1b3   : > { %1240 = vrot.lane.b32.xlu1 %v4865_v39, %s4495_s23  ;;  %3718 = vmatprep.subr.msk.bf16.mxu0 %vm803_vm0, %v4865_v39  ;;  %v844_v42 = vsel %vm803_vm0, %v4865_v39, 0 }
 0x1b4   : > { %6063 = vst [vmem:[#allocation29_spill] sm:$0xff] %v4867_v41  ;;  %3436 = vmatpush3.bf16.xpose.msra.mxu0 %v844_v42  ;;  %3467 = vmatprep.subr.bf16.mxu1 %v4867_v41 }
 0x1b5   : > { %3468 = vmatpush3.bf16.msra.mxu1 %v4867_v41 }
 0x1b6   : > { %v768_v43 = vpop.f32.mrb[24].mxu1 }
 0x1b7   : > { %v770_v45 = vpop.f32.mrb[25].mxu1 }
 0x1b8   : > { %v772_v47 = vpop.f32.mrb[26].mxu1 }
 0x1b9   : > { %v4877_v48 = vpack.c.bf16 %v772_v47, %v768_v43  ;;  %v774_v49 = vpop.f32.mrb[27].mxu1 }
 0x1ba   : > { %v4879_v50 = vpack.c.bf16 %v774_v49, %v770_v45 }
 0x1bb   : > { %6064 = vst [vmem:[#allocation30_spill] sm:$0xff] %v4877_v48  ;;  %1242 = vrot.lane.b32.xlu0 %v4877_v48, %s4495_s23  ;;  %3719 = vmatprep.subr.msk.bf16.mxu0 %vm803_vm0, %v4877_v48  ;;  %v847_v52 = vsel %vm803_vm0, %v4877_v48, 0 }
 0x1bc   : > { %6065 = vst [vmem:[#allocation31_spill] sm:$0xff] %v4879_v50  ;;  %3438 = vmatpush3.bf16.xpose.msra.mxu0 %v847_v52  ;;  %3469 = vmatprep.subr.bf16.mxu1 %v4879_v50 }
 0x1bd   : > { %3470 = vmatpush3.bf16.msra.mxu1 %v4879_v50 }
 0x1be   : > { %v778_v54 = vpop.f32.mrb[28].mxu1 }
 0x1bf   : > { %1206 = vrot.lane.b32.xlu0 %v4813_v61, %s4495_s23  ;;  %v780_v55 = vpop.f32.mrb[29].mxu1 }
 0x1c0   : > { %v782_v56 = vpop.f32.mrb[30].mxu1 }
 0x1c1   : > { %v4891_v57 = vpack.c.bf16 %v782_v56, %v778_v54  ;;  %v784_v59 = vpop.f32.mrb[31].mxu1 }
 0x1c2   : > { %v4893_v60 = vpack.c.bf16 %v784_v59, %v780_v55 }
 0x1c3   : > { %1210 = vrot.lane.b32.xlu0 %v4831_v10, %s4495_s23  ;;  %1244 = vrot.lane.b32.xlu1 %v4891_v57, %s4495_s23  ;;  %v850_v62 = vsel %vm803_vm0, %v4891_v57, 0 }
 0x1c4   : > { %6066 = vst [vmem:[#allocation32_spill] sm:$0xff] %v4893_v60  ;;  %3720 = vmatprep.subr.msk.bf16.mxu0 %vm803_vm0, %v4891_v57  ;;  %3471 = vmatprep.subr.bf16.mxu1 %v4893_v60 }
 0x1c5   : > { %3440 = vmatpush3.bf16.xpose.msra.mxu0 %v850_v62  ;;  %3472 = vmatpush3.bf16.msra.mxu1 %v4893_v60 }
 0x1c7   : > { %1214 = vrot.lane.b32.xlu0 %v4847_v23, %s4495_s23  ;;  %1208 = vrot.lane.b32.xlu1 %v4811_v58, %s4495_s23 }
 0x1cb   : > { %1218 = vrot.lane.b32.xlu0 %v4863_v36, %s4495_s23  ;;  %1212 = vrot.lane.b32.xlu1 %v4829_v7, %s4495_s23 }
 0x1cc   : > { %3442 = vmatmul.mubr.msk.bf16.vlgmr.msra.gmra.mrb[16].mxu0 %vm803_vm0, %v4811_v58 }
 0x1cd   : > { %3445 = vmatprep.mubr.msk.bf16.mxu0 %vm803_vm0, %v4831_v10 }
 0x1cf   : > { %1553 = vrot.lane.b32.xlu0 %v4801_v53, %s4495_s23  ;;  %1216 = vrot.lane.b32.xlu1 %v4845_v20, %s4495_s23 }
 0x1d3   : > { %1559 = vrot.lane.b32.xlu0 %v4851_v28, %s4495_s23  ;;  %1220 = vrot.lane.b32.xlu1 %v4861_v33, %s4495_s23 }
 0x1d4   : > { %3446 = vmatmul.mubr.msk.bf16.gmra.mrb[20].mxu0 %vm803_vm0, %v4829_v7 }
 0x1d5   : > { %3449 = vmatprep.mubr.msk.bf16.mxu0 %vm803_vm0, %v4847_v23 }
 0x1d7   : > { %1551 = vrot.lane.b32.xlu1 %v4789_v46, %s4495_s23 }
 0x1db   : > { %1555 = vrot.lane.b32.xlu1 %v4819_v2, %s4495_s23 }
 0x1dc   : > { %3450 = vmatmul.mubr.msk.bf16.gmra.mrb[24].mxu0 %vm803_vm0, %v4845_v20 }
 0x1dd   : > { %3453 = vmatprep.mubr.msk.bf16.mxu0 %vm803_vm0, %v4863_v36 }
 0x1df   : > { %1557 = vrot.lane.b32.xlu1 %v4835_v15, %s4495_s23 }
 0x1e3   : > { %1561 = vrot.lane.b32.xlu1 %v4867_v41, %s4495_s23 }
 0x1e4   : > { %3454 = vmatmul.mubr.msk.bf16.gmra.mrb[28].mxu0 %vm803_vm0, %v4861_v33 }
 0x1e7   : > { %1563 = vrot.lane.b32.xlu1 %v4879_v50, %s4495_s23 }
 0x1eb   : > { %1688 = vrot.lane.b32.xlu1 %v4787_v44, %s4496_s25 }
 0x1ef   : > { %1690 = vrot.lane.b32.xlu1 %v4799_v51, %s4496_s25 }
 0x1f3   : > { %1565 = vrot.lane.b32.xlu1 %v4893_v60, %s4495_s23 }
 0x1fd   : > { %v1231_v63 = vpop.permute.xlu0 %1230 }
 0x1fe   : > { %3721 = vmatprep.subr.msk.bf16.mxu0 %vm803_vm0, %v1231_v63  ;;  %v1271_v1 = vsel %vm803_vm0, %v1231_v63, 0 }
 0x1ff   : > { %3490 = vmatpush3.bf16.xpose.msra.mxu0 %v1271_v1 }
 0x205   : > { %v1233_v3 = vpop.permute.xlu0 %1232 }
 0x206   : > { %3722 = vmatprep.subr.msk.bf16.mxu0 %vm803_vm0, %v1233_v3  ;;  %v1274_v4 = vsel %vm803_vm0, %v1233_v3, 0 }
 0x207   : > { %3492 = vmatpush3.bf16.xpose.msra.mxu0 %v1274_v4 }
 0x20d   : > { %v1235_v5 = vpop.permute.xlu1 %1234 }
 0x20e   : > { %3723 = vmatprep.subr.msk.bf16.mxu0 %vm803_vm0, %v1235_v5  ;;  %v1277_v6 = vsel %vm803_vm0, %v1235_v5, 0 }
 0x20f   : > { %3494 = vmatpush3.bf16.xpose.msra.mxu0 %v1277_v6 }
 0x215   : > { %v1237_v8 = vpop.permute.xlu1 %1236 }
 0x216   : > { %3724 = vmatprep.subr.msk.bf16.mxu0 %vm803_vm0, %v1237_v8  ;;  %v1280_v9 = vsel %vm803_vm0, %v1237_v8, 0 }
 0x217   : > { %3496 = vmatpush3.bf16.xpose.msra.mxu0 %v1280_v9 }
 0x21d   : > { %v1239_v11 = vpop.permute.xlu0 %1238 }
 0x21e   : > { %3725 = vmatprep.subr.msk.bf16.mxu0 %vm803_vm0, %v1239_v11  ;;  %v1283_v12 = vsel %vm803_vm0, %v1239_v11, 0 }
 0x21f   : > { %3498 = vmatpush3.bf16.xpose.msra.mxu0 %v1283_v12 }
 0x225   : > { %v1241_v14 = vpop.permute.xlu1 %1240 }
 0x226   : > { %3726 = vmatprep.subr.msk.bf16.mxu0 %vm803_vm0, %v1241_v14  ;;  %v1286_v16 = vsel %vm803_vm0, %v1241_v14, 0 }
 0x227   : > { %3500 = vmatpush3.bf16.xpose.msra.mxu0 %v1286_v16 }
 0x22d   : > { %v1243_v17 = vpop.permute.xlu0 %1242 }
 0x22e   : > { %3727 = vmatprep.subr.msk.bf16.mxu0 %vm803_vm0, %v1243_v17  ;;  %v1289_v18 = vsel %vm803_vm0, %v1243_v17, 0 }
 0x22f   : > { %3502 = vmatpush3.bf16.xpose.msra.mxu0 %v1289_v18 }
 0x231   : > { %v1207_v19 = vpop.permute.xlu0 %1206 }
 0x232   : > { %3505 = vmatprep.mubr.msk.bf16.mxu0 %vm803_vm0, %v1207_v19 }
 0x235   : > { %v1245_v21 = vpop.permute.xlu1 %1244  ;;  %v1211_v27 = vpop.permute.xlu0 %1210 }
 0x236   : > { %3728 = vmatprep.subr.msk.bf16.mxu0 %vm803_vm0, %v1245_v21  ;;  %v1292_v22 = vsel %vm803_vm0, %v1245_v21, 0 }
 0x237   : > { %3504 = vmatpush3.bf16.xpose.msra.mxu0 %v1292_v22 }
 0x239   : > { %v1209_v24 = vpop.permute.xlu1 %1208  ;;  %v1215_v31 = vpop.permute.xlu0 %1214 }
 0x23d   : > { %v1213_v25 = vpop.permute.xlu1 %1212  ;;  %v1219_v34 = vpop.permute.xlu0 %1218 }
 0x23e   : > { %3506 = vmatmul.mubr.msk.bf16.vlgmr.msra.gmra.mrb[32].mxu0 %vm803_vm0, %v1209_v24 }
 0x23f   : > { %3509 = vmatprep.mubr.msk.bf16.mxu0 %vm803_vm0, %v1211_v27 }
 0x241   : > { %v1217_v29 = vpop.permute.xlu1 %1216  ;;  %v5065_v22 = vpop.permute.xlu0 %1553 }
 0x245   : > { %v1221_v30 = vpop.permute.xlu1 %1220 }
 0x246   : > { %3510 = vmatmul.mubr.msk.bf16.gmra.mrb[36].mxu0 %vm803_vm0, %v1213_v25 }
 0x247   : > { %3513 = vmatprep.mubr.msk.bf16.mxu0 %vm803_vm0, %v1215_v31 }
 0x249   : > { %v4972_v32 = vpop.permute.xlu1 %1551 }
 0x24a   : > { %3521 = vmatprep.subr.bf16.mxu1 %v4972_v32 }
 0x24d   : > { %v5026_v1 = vpop.permute.xlu1 %1555 }
 0x24e   : > { %3514 = vmatmul.mubr.msk.bf16.gmra.mrb[40].mxu0 %vm803_vm0, %v1217_v29  ;;  %v5076_v29 = vpop.permute.xlu0 %1559 }
 0x24f   : > { %3517 = vmatprep.mubr.msk.bf16.mxu0 %vm803_vm0, %v1219_v34 }
 0x251   : > { %v5028_v3 = vpop.permute.xlu1 %1557 }
 0x255   : > { %v5037_v8 = vpop.permute.xlu1 %1561 }
 0x256   : > { %3518 = vmatmul.mubr.msk.bf16.gmra.mrb[44].mxu0 %vm803_vm0, %v1221_v30 }
 0x259   : > { %v5046_v12 = vpop.permute.xlu1 %1563 }
 0x25d   : > { %v5057_v18 = vpop.permute.xlu1 %1688 }
 0x261   : > { %v5072_v27 = vpop.permute.xlu1 %1690 }
 0x262   : > { %6067 = vst [vmem:[#allocation33_spill] sm:$0xff] %v5072_v27 }
 0x265   : > { %v5085_v44 = vpop.permute.xlu1 %1565 }
 0x29f   : > { %v4978_v35 = vpop.f32.mrb[16].mxu0 }
 0x2a0   : > { %953 = vmax.xlane.f32.xlu0 %v4978_v35  ;;  %v4981_v37 = vpop.f32.mrb[17].mxu0 }
 0x2a1   : > { %v4983_v38 = vpop.f32.mrb[18].mxu0 }
 0x2a2   : > { %v4985_v40 = vpop.f32.mrb[19].mxu0 }
 0x2a3   : > { %951 = vmax.xlane.f32.xlu1 %v4985_v40 }
 0x2a4   : > { %949 = vmax.xlane.f32.xlu0 %v4981_v37 }
 0x2a7   : > { %v4989_v42 = vpop.f32.mrb[20].mxu0 }
 0x2a8   : > { %955 = vmax.xlane.f32.xlu0 %v4983_v38  ;;  %v4992_v43 = vpop.f32.mrb[21].mxu0  ;;  %961 = vmax.xlane.f32.xlu1 %v4989_v42 }
 0x2a9   : > { %v4995_v45 = vpop.f32.mrb[22].mxu0 }
 0x2aa   : > { %v4997_v47 = vpop.f32.mrb[23].mxu0 }
 0x2ac   : > { %963 = vmax.xlane.f32.xlu0 %v4995_v45  ;;  %957 = vmax.xlane.f32.xlu1 %v4992_v43 }
 0x2af   : > { %v5001_v49 = vpop.f32.mrb[24].mxu0 }
 0x2b0   : > { %959 = vmax.xlane.f32.xlu0 %v4997_v47  ;;  %969 = vmax.xlane.f32.xlu1 %v5001_v49  ;;  %v5005_v52 = vpop.f32.mrb[25].mxu0 }
 0x2b1   : > { %v5007_v54 = vpop.f32.mrb[26].mxu0 }
 0x2b2   : > { %v5009_v55 = vpop.f32.mrb[27].mxu0 }
 0x2b4   : > { %971 = vmax.xlane.f32.xlu0 %v5007_v54  ;;  %965 = vmax.xlane.f32.xlu1 %v5005_v52 }
 0x2b7   : > { %v5013_v56 = vpop.f32.mrb[28].mxu0 }
 0x2b8   : > { %967 = vmax.xlane.f32.xlu0 %v5009_v55  ;;  %977 = vmax.xlane.f32.xlu1 %v5013_v56  ;;  %v5017_v59 = vpop.f32.mrb[29].mxu0 }
 0x2b9   : > { %v5019_v62 = vpop.f32.mrb[30].mxu0 }
 0x2ba   : > { %v5021_v63 = vpop.f32.mrb[31].mxu0 }
 0x2bc   : > { %979 = vmax.xlane.f32.xlu0 %v5019_v62  ;;  %973 = vmax.xlane.f32.xlu1 %v5017_v59 }
 0x2c0   : > { %975 = vmax.xlane.f32.xlu0 %v5021_v63 }
 0x311   : > { %v5030_v4 = vpop.f32.mrb[32].mxu0 }
 0x312   : > { %v5032_v5 = vpop.f32.mrb[33].mxu0  ;;  %1395 = vmax.xlane.f32.xlu1 %v5030_v4 }
 0x313   : > { %v5035_v6 = vpop.f32.mrb[34].mxu0 }
 0x314   : > { %1397 = vmax.xlane.f32.xlu0 %v5035_v6  ;;  %v5040_v9 = vpop.f32.mrb[35].mxu0 }
 0x316   : > { %1391 = vmax.xlane.f32.xlu1 %v5032_v5 }
 0x318   : > { %1393 = vmax.xlane.f32.xlu0 %v5040_v9 }
 0x319   : > { %v5044_v11 = vpop.f32.mrb[36].mxu0 }
 0x31a   : > { %v5048_v14 = vpop.f32.mrb[37].mxu0  ;;  %1403 = vmax.xlane.f32.xlu1 %v5044_v11 }
 0x31b   : > { %v5051_v16 = vpop.f32.mrb[38].mxu0 }
 0x31c   : > { %1405 = vmax.xlane.f32.xlu0 %v5051_v16  ;;  %v5054_v17 = vpop.f32.mrb[39].mxu0 }
 0x31e   : > { %1399 = vmax.xlane.f32.xlu1 %v5048_v14 }
 0x320   : > { %1401 = vmax.xlane.f32.xlu0 %v5054_v17 }
 0x321   : > { %v5060_v19 = vpop.f32.mrb[40].mxu0 }
 0x322   : > { %v5062_v21 = vpop.f32.mrb[41].mxu0  ;;  %1411 = vmax.xlane.f32.xlu1 %v5060_v19 }
 0x323   : > { %v5067_v24 = vpop.f32.mrb[42].mxu0 }
 0x324   : > { %1413 = vmax.xlane.f32.xlu0 %v5067_v24  ;;  %v5070_v25 = vpop.f32.mrb[43].mxu0 }
 0x326   : > { %1407 = vmax.xlane.f32.xlu1 %v5062_v21 }
 0x328   : > { %1409 = vmax.xlane.f32.xlu0 %v5070_v25 }
 0x329   : > { %v5078_v30 = vpop.f32.mrb[44].mxu0 }
 0x32a   : > { %v5080_v31 = vpop.f32.mrb[45].mxu0  ;;  %1419 = vmax.xlane.f32.xlu1 %v5078_v30 }
 0x32b   : > { %v5083_v34 = vpop.f32.mrb[46].mxu0 }
 0x32c   : > { %1421 = vmax.xlane.f32.xlu0 %v5083_v34  ;;  %v5088_v51 = vpop.f32.mrb[47].mxu0 }
 0x32d   : > { %v954_v27 = vpop.xlane.xlu0 %953 }
 0x32e   : > { %v983_v60 = vsub.f32 %v4978_v35, %v954_v27  ;;  %1415 = vmax.xlane.f32.xlu1 %v5080_v31 }
 0x330   : > { %v1001_v41 = vmul.f32 1.442695, %v983_v60  ;;  %v952_v28 = vpop.xlane.xlu1 %951  ;;  %1417 = vmax.xlane.f32.xlu0 %v5088_v51 }
 0x331   : > { %v950_v2 = vpop.xlane.xlu0 %949  ;;  %v982_v10 = vsub.f32 %v4985_v40, %v952_v28 }
 0x332   : > { %4024 = vpow2.f32 %v1001_v41  ;;  %v981_v46 = vsub.f32 %v4981_v37, %v950_v2 }
 0x333   : > { %v999_v60 = vmul.f32 1.442695, %v982_v10 }
 0x334   : > { %v997_v33 = vmul.f32 1.442695, %v981_v46 }
 0x335   : > { %v956_v20 = vpop.xlane.xlu0 %955  ;;  %v5094_v7 = vpop.xlane.xlu1 %961 }
 0x336   : > { %4026 = vpow2.f32 %v997_v33  ;;  %v984_v58 = vsub.f32 %v4983_v38, %v956_v20 }
 0x338   : > { %v1003_v35 = vmul.f32 1.442695, %v984_v58 }
 0x339   : > { %v964_v27 = vpop.xlane.xlu0 %963  ;;  %v958_v61 = vpop.xlane.xlu1 %957 }
 0x33a   : > { %4028 = vpow2.f32 %v1003_v35  ;;  %v988_v48 = vsub.f32 %v4995_v45, %v964_v27 }
 0x33b   : > { %4030 = vpow2.f32 %v999_v60 }
 0x33c   : > { %v5099_v50 = vpop.eup %4024  ;;  %v1011_v2 = vmul.f32 1.442695, %v988_v48 }
 0x33d   : > { %v960_v41 = vpop.xlane.xlu0 %959  ;;  %1033 = vadd.xlane.f32.xlu1 %v5099_v50  ;;  %v970_v46 = vpop.xlane.xlu1 %969 }
 0x33e   : > { %v986_v28 = vsub.f32 %v4997_v47, %v960_v41  ;;  %4032 = vpow2.f32 %v1011_v2 }
 0x340   : > { %v5103_v33 = vpop.eup %4026  ;;  %v1007_v10 = vmul.f32 1.442695, %v986_v28 }
 0x341   : > { %v972_v20 = vpop.xlane.xlu0 %971  ;;  %1029 = vadd.xlane.f32.xlu1 %v5103_v33  ;;  %v966_v58 = vpop.xlane.xlu1 %965 }
 0x342   : > { %v992_v37 = vsub.f32 %v5007_v54, %v972_v20  ;;  %4034 = vpow2.f32 %v1007_v10 }
 0x344   : > { %v5107_v38 = vpop.eup %4028  ;;  %v1019_v45 = vmul.f32 1.442695, %v992_v37 }
 0x345   : > { %v968_v40 = vpop.xlane.xlu0 %967  ;;  %1035 = vadd.xlane.f32.xlu0 %v5107_v38  ;;  %v978_v47 = vpop.xlane.xlu1 %977 }
 0x346   : > { %v990_v48 = vsub.f32 %v5009_v55, %v968_v40  ;;  %v5111_v35 = vpop.eup %4030  ;;  %4036 = vpow2.f32 %v1019_v45  ;;  %v995_v41 = vsub.f32 %v5013_v56, %v978_v47 }
 0x348   : > { %v1015_v60 = vmul.f32 1.442695, %v990_v48  ;;  %v5115_v54 = vpop.eup %4032  ;;  %v1025_v2 = vmul.f32 1.442695, %v995_v41 }
 0x349   : > { %v980_v27 = vpop.xlane.xlu0 %979  ;;  %1031 = vadd.xlane.f32.xlu0 %v5111_v35 }
 0x34a   : > { %4038 = vpow2.f32 %v1015_v60  ;;  %v996_v28 = vsub.f32 %v5019_v62, %v980_v27  ;;  %v985_v60 = vsub.f32 %v4992_v43, %v958_v61 }
 0x34b   : > { %4040 = vpow2.f32 %v1025_v2  ;;  %v991_v2 = vsub.f32 %v5001_v49, %v970_v46 }
 0x34c   : > { %v5119_v55 = vpop.eup %4034  ;;  %v1027_v10 = vmul.f32 1.442695, %v996_v28  ;;  %v1005_v41 = vmul.f32 1.442695, %v985_v60 }
 0x34d   : > { %1043 = vadd.xlane.f32.xlu0 %v5115_v54  ;;  %v976_v20 = vpop.xlane.xlu0 %975  ;;  %v1017_v28 = vmul.f32 1.442695, %v991_v2 }
 0x34e   : > { %v994_v37 = vsub.f32 %v5021_v63, %v976_v20  ;;  %4042 = vpow2.f32 %v1027_v10  ;;  %v987_v63 = vsub.f32 %v4989_v42, %v5094_v7  ;;  %v989_v20 = vsub.f32 %v5005_v52, %v966_v58  ;;  %v974_v10 = vpop.xlane.xlu1 %973 }
 0x34f   : > { %v993_v7 = vsub.f32 %v5017_v59, %v974_v10 }
 0x350   : > { %v5125_v56 = vpop.eup %4036  ;;  %v1023_v40 = vmul.f32 1.442695, %v994_v37  ;;  %v1009_v27 = vmul.f32 1.442695, %v987_v63  ;;  %v1013_v37 = vmul.f32 1.442695, %v989_v20 }
 0x351   : > { %1039 = vadd.xlane.f32.xlu0 %v5119_v55 }
 0x352   : > { %1692 = vrot.lane.b32.xlu1 %v4817_v0, %s4496_s25  ;;  %4044 = vpow2.f32 %v1023_v40  ;;  %v1021_v40 = vmul.f32 1.442695, %v993_v7 }
 0x353   : > { %4046 = vpow2.f32 %v1009_v27 }
 0x354   : > { %v5128_v45 = vpop.eup %4038  ;;  %4048 = vpow2.f32 %v1005_v41 }
 0x355   : > { %1051 = vadd.xlane.f32.xlu0 %v5125_v56  ;;  %v5131_v62 = vpop.eup %4040  ;;  %4050 = vpow2.f32 %v1017_v28 }
 0x356   : > { %4052 = vpow2.f32 %v1013_v37 }
 0x357   : > { %4054 = vpow2.f32 %v1021_v40 }
 0x358   : > { %v5134_v48 = vpop.eup %4042 }
 0x359   : > { %1047 = vadd.xlane.f32.xlu0 %v5128_v45 }
 0x35c   : > { %v5139_v47 = vpop.eup %4044 }
 0x35d   : > { %1057 = vadd.xlane.f32.xlu0 %v5131_v62  ;;  %v5146_v42 = vpop.eup %4046 }
 0x35e   : > { %v5149_v61 = vpop.eup %4048 }
 0x35f   : > { %v5152_v43 = vpop.eup %4050 }
 0x360   : > { %v5155_v49 = vpop.eup %4052 }
 0x361   : > { %1059 = vadd.xlane.f32.xlu0 %v5134_v48  ;;  %v5158_v52 = vpop.eup %4054 }
 0x365   : > { %1055 = vadd.xlane.f32.xlu0 %v5139_v47 }
 0x376   : > { %1041 = vadd.xlane.f32.xlu1 %v5146_v42 }
 0x37a   : > { %1037 = vadd.xlane.f32.xlu1 %v5149_v61 }
 0x37e   : > { %1049 = vadd.xlane.f32.xlu1 %v5152_v43 }
 0x382   : > { %1045 = vadd.xlane.f32.xlu1 %v5155_v49 }
 0x386   : > { %1053 = vadd.xlane.f32.xlu1 %v5158_v52 }
 0x39f   : > { %v1396_v59 = vpop.xlane.xlu1 %1395 }
 0x3a0   : > { %v1425_v46 = vsub.f32 %v5030_v4, %v1396_v59 }
 0x3a1   : > { %v1398_v58 = vpop.xlane.xlu0 %1397 }
 0x3a2   : > { %v1443_v63 = vmul.f32 1.442695, %v1425_v46  ;;  %v1426_v27 = vsub.f32 %v5035_v6, %v1398_v58 }
 0x3a3   : > { %v1392_v60 = vpop.xlane.xlu1 %1391 }
 0x3a4   : > { %4056 = vpow2.f32 %v1443_v63  ;;  %v1445_v41 = vmul.f32 1.442695, %v1426_v27  ;;  %v1423_v2 = vsub.f32 %v5032_v5, %v1392_v60 }
 0x3a5   : > { %v1394_v28 = vpop.xlane.xlu0 %1393 }
 0x3a6   : > { %v1439_v20 = vmul.f32 1.442695, %v1423_v2  ;;  %v1424_v10 = vsub.f32 %v5040_v9, %v1394_v28  ;;  %4058 = vpow2.f32 %v1445_v41 }
 0x3a7   : > { %v1404_v37 = vpop.xlane.xlu1 %1403 }
 0x3a8   : > { %4060 = vpow2.f32 %v1439_v20  ;;  %v1441_v7 = vmul.f32 1.442695, %v1424_v10  ;;  %v1429_v40 = vsub.f32 %v5044_v11, %v1404_v37 }
 0x3a9   : > { %v1406_v4 = vpop.xlane.xlu0 %1405 }
 0x3aa   : > { %4062 = vpow2.f32 %v1441_v7  ;;  %v1451_v46 = vmul.f32 1.442695, %v1429_v40  ;;  %v1430_v9 = vsub.f32 %v5051_v16, %v1406_v4 }
 0x3ab   : > { %v1400_v59 = vpop.xlane.xlu1 %1399 }
 0x3ac   : > { %v1427_v6 = vsub.f32 %v5048_v14, %v1400_v59  ;;  %4064 = vpow2.f32 %v1451_v46  ;;  %v1453_v14 = vmul.f32 1.442695, %v1430_v9 }
 0x3ad   : > { %v1402_v58 = vpop.xlane.xlu0 %1401 }
 0x3ae   : > { %v5167_v63 = vpop.eup %4056  ;;  %v1428_v5 = vsub.f32 %v5054_v17, %v1402_v58  ;;  %v1447_v27 = vmul.f32 1.442695, %v1427_v6 }
 0x3af   : > { %1475 = vadd.xlane.f32.xlu0 %v5167_v63  ;;  %v1412_v17 = vpop.xlane.xlu1 %1411 }
 0x3b0   : > { %v1449_v60 = vmul.f32 1.442695, %v1428_v5  ;;  %v5172_v41 = vpop.eup %4058 }
 0x3b1   : > { %v1414_v20 = vpop.xlane.xlu0 %1413 }
 0x3b2   : > { %v5174_v11 = vpop.eup %4060  ;;  %4066 = vpow2.f32 %v1449_v60 }
 0x3b3   : > { %1477 = vadd.xlane.f32.xlu0 %v5172_v41  ;;  %1471 = vadd.xlane.f32.xlu1 %v5174_v11  ;;  %4068 = vpow2.f32 %v1447_v27  ;;  %v1408_v10 = vpop.xlane.xlu1 %1407 }
 0x3b4   : > { %v5178_v2 = vpop.eup %4062  ;;  %4070 = vpow2.f32 %v1453_v14 }
 0x3b5   : > { %v1410_v40 = vpop.xlane.xlu0 %1409 }
 0x3b6   : > { %v5181_v16 = vpop.eup %4064 }
 0x3b7   : > { %1473 = vadd.xlane.f32.xlu0 %v5178_v2  ;;  %6068 = vst [vmem:[#allocation34_spill] sm:$0xff] %v5181_v16  ;;  %v5192_v4 = vpop.xlane.xlu1 %1419 }
 0x3b9   : > { %v5195_v59 = vpop.xlane.xlu0 %1421 }
 0x3bb   : > { %1483 = vadd.xlane.f32.xlu0 %v5181_v16  ;;  %v5197_v46 = vpop.xlane.xlu1 %1415 }
 0x3bc   : > { %v5184_v28 = vpop.eup %4066 }
 0x3bd   : > { %6069 = vst [vmem:[#allocation35_spill] sm:$0xff] %v5184_v28  ;;  %1481 = vadd.xlane.f32.xlu1 %v5184_v28  ;;  %v5187_v37 = vpop.eup %4068  ;;  %v1418_v58 = vpop.xlane.xlu0 %1417 }
 0x3be   : > { %v5190_v7 = vpop.eup %4070  ;;  %v1436_v0 = vsub.f32 %v5088_v51, %v1418_v58  ;;  %v1433_v51 = vsub.f32 %v5060_v19, %v1412_v17  ;;  %v1432_v19 = vsub.f32 %v5070_v25, %v1410_v40 }
 0x3bf   : > { %1479 = vadd.xlane.f32.xlu0 %v5187_v37  ;;  %6070 = vst [vmem:[#allocation36_spill] sm:$0xff] %v5190_v7 }
 0x3c3   : > { %1485 = vadd.xlane.f32.xlu0 %v5190_v7 }
 0x3ca   : > { %v1034_v6 = vpop.xlane.xlu1 %1033 }
 0x3ce   : > { %1694 = vrot.lane.b32.xlu1 %v4833_v13, %s4496_s25  ;;  %v1030_v5 = vpop.xlane.xlu1 %1029 }
 0x3d2   : > { %v1036_v9 = vpop.xlane.xlu0 %1035  ;;  %v5238_v17 = vpop.permute.xlu1 %1692 }
 0x3d3   : > { %4072 = vrcp.f32 %v1036_v9 }
 0x3d4   : > { %4074 = vrcp.f32 %v1030_v5  ;;  %v1465_v5 = vmul.f32 1.442695, %v1436_v0 }
 0x3d5   : > { %4076 = vrcp.f32 %v1034_v6 }
 0x3d6   : > { %v1032_v27 = vpop.xlane.xlu0 %1031 }
 0x3d7   : > { %4078 = vrcp.f32 %v1032_v27 }
 0x3d8   : > { %4080 = vpow2.f32 %v1465_v5 }
 0x3d9   : > { %1696 = vrot.lane.b32.xlu0 %v4849_v26, %s4496_s25 }
 0x3da   : > { %v1044_v58 = vpop.xlane.xlu0 %1043 }
 0x3dd   : > { %1698 = vrot.lane.b32.xlu0 %v4865_v39, %s4496_s25  ;;  %v4073_v60 = vpop.eup %4072 }
 0x3de   : > { %v4075_v14 = vpop.eup %4074  ;;  %v1080_v13 = vmul.f32 %v4073_v60, %v5107_v38  ;;  %v1431_v38 = vsub.f32 %v5062_v21, %v1408_v10  ;;  %v1457_v21 = vmul.f32 1.442695, %v1432_v19 }
 0x3df   : > { %v4077_v7 = vpop.eup %4076  ;;  %v1077_v9 = vmul.f32 %v4075_v14, %v5103_v33  ;;  %v1459_v33 = vmul.f32 1.442695, %v1433_v51 }
 0x3e0   : > { %v1079_v27 = vmul.f32 %v4077_v7, %v5099_v50  ;;  %v1040_v50 = vpop.xlane.xlu0 %1039 }
 0x3e1   : > { %v4079_v16 = vpop.eup %4078  ;;  %4082 = vpow2.f32 %v1459_v33 }
 0x3e2   : > { %v1078_v6 = vmul.f32 %v4079_v16, %v5111_v35  ;;  %v1094_v26 = vpack.c.bf16 %v1080_v13, %v1079_v27  ;;  %v5217_v0 = vpop.eup %4080  ;;  %v1434_v13 = vsub.f32 %v5067_v24, %v1414_v20 }
 0x3e4   : > { %v1093_v28 = vpack.c.bf16 %v1078_v6, %v1077_v9 }
 0x3e6   : > { %3473 = vmatprep.mubr.bf16.mxu1 %v1093_v28 }
 0x3e7   : > { %3474 = vmatmul.mubr.bf16.vlgmr.msra.gmra.mrb[32].mxu1 %v1094_v26  ;;  %v1455_v26 = vmul.f32 1.442695, %v1431_v38 }
 0x3e8   : > { %3522 = vmatpush3.bf16.msra.mxu1 %v4972_v32  ;;  %v1461_v32 = vmul.f32 1.442695, %v1434_v13 }
 0x3e9   : > { %3523 = vmatprep.subr.bf16.mxu1 %v5065_v22  ;;  %4084 = vpow2.f32 %v1455_v26 }
 0x3ea   : > { %4086 = vpow2.f32 %v1461_v32 }
 0x3eb   : > { %v5229_v24 = vpop.eup %4082  ;;  %4088 = vpow2.f32 %v1457_v21 }
 0x3ec   : > { %3524 = vmatpush3.bf16.msra.mxu1 %v5065_v22  ;;  %v1437_v22 = vsub.f32 %v5078_v30, %v5192_v4 }
 0x3ed   : > { %3525 = vmatprep.subr.bf16.mxu1 %v5026_v1 }
 0x3ee   : > { %v1467_v25 = vmul.f32 1.442695, %v1437_v22 }
 0x3f0   : > { %3526 = vmatpush3.bf16.msra.mxu1 %v5026_v1  ;;  %v1052_v1 = vpop.xlane.xlu0 %1051  ;;  %4090 = vpow2.f32 %v1467_v25 }
 0x3f1   : > { %3527 = vmatprep.subr.bf16.mxu1 %v5028_v3 }
 0x3f2   : > { %1497 = vadd.xlane.f32.xlu1 %v5217_v0 }
 0x3f4   : > { %3528 = vmatpush3.bf16.msra.mxu1 %v5028_v3  ;;  %v1435_v3 = vsub.f32 %v5080_v31, %v5197_v46  ;;  %v1048_v35 = vpop.xlane.xlu0 %1047 }
 0x3f5   : > { %3529 = vmatprep.subr.bf16.mxu1 %v5076_v29 }
 0x3f6   : > { %v1463_v30 = vmul.f32 1.442695, %v1435_v3 }
 0x3f8   : > { %3530 = vmatpush3.bf16.msra.mxu1 %v5076_v29  ;;  %v5236_v29 = vpop.eup %4084  ;;  %v1058_v16 = vpop.xlane.xlu0 %1057  ;;  %4092 = vpow2.f32 %v1463_v30 }
 0x3f9   : > { %3531 = vmatprep.subr.bf16.mxu1 %v5037_v8  ;;  %v5245_v31 = vpop.eup %4086 }
 0x3fc   : > { %3532 = vmatpush3.bf16.msra.mxu1 %v5037_v8  ;;  %1491 = vadd.xlane.f32.xlu0 %v5229_v24  ;;  %v1438_v8 = vsub.f32 %v5083_v34, %v5195_v59  ;;  %v5253_v34 = vpop.eup %4088 }
 0x3fd   : > { %3533 = vmatprep.subr.bf16.mxu1 %v5046_v12  ;;  %v5258_v10 = vpop.eup %4090 }
 0x400   : > { %3534 = vmatpush3.bf16.msra.mxu1 %v5046_v12  ;;  %1487 = vadd.xlane.f32.xlu0 %v5236_v29  ;;  %v1469_v12 = vmul.f32 1.442695, %v1438_v8 }
 0x401   : > { %3535 = vmatprep.subr.bf16.mxu1 %v5085_v44 }
 0x402   : > { %v5263_v40 = vpop.eup %4092 }
 0x403   : > { %v1042_v28 = vpop.xlane.xlu1 %1041  ;;  %1702 = vrot.lane.b32.xlu1 %v4891_v57, %s4496_s25 }
 0x404   : > { %3536 = vmatpush3.bf16.msra.mxu1 %v5085_v44  ;;  %1493 = vadd.xlane.f32.xlu0 %v5245_v31  ;;  %4094 = vrcp.f32 %v1042_v28  ;;  %v1060_v44 = vpop.xlane.xlu0 %1059 }
 0x405   : > { %3729 = vmatprep.subr.msk.bf16.mxu1 %vm803_vm0, %v5057_v18  ;;  %4096 = vrcp.f32 %v1040_v50 }
 0x406   : > { %4098 = vrcp.f32 %v1044_v58 }
 0x407   : > { %v1038_v20 = vpop.xlane.xlu1 %1037  ;;  %1680 = vrot.lane.b32.xlu1 %v4847_v23, %s4496_s25 }
 0x408   : > { %4100 = vrcp.f32 %v1038_v20  ;;  %1489 = vadd.xlane.f32.xlu0 %v5253_v34  ;;  %v1056_v59 = vpop.xlane.xlu0 %1055  ;;  %v6076_v20 = vld [vmem:[#allocation22_spill] sm:$0xff] }
 0x409   : > { %4102 = vpow2.f32 %v1469_v12  ;;  %v6073_v12 = vld [vmem:[#allocation19_spill] sm:$0xff] }
 0x40b   : > { %v1050_v7 = vpop.xlane.xlu1 %1049  ;;  %1684 = vrot.lane.b32.xlu1 %v4863_v36, %s4496_s25 }
 0x40c   : > { %1499 = vadd.xlane.f32.xlu0 %v5258_v10  ;;  %4104 = vrcp.f32 %v1050_v7 }
 0x40d   : > { %4106 = vrcp.f32 %v1048_v35 }
 0x40e   : > { %v4095_v4 = vpop.eup %4094  ;;  %4108 = vrcp.f32 %v1052_v1 }
 0x40f   : > { %v1046_v46 = vpop.xlane.xlu1 %1045  ;;  %2003 = vrot.lane.b32.xlu1 %v4801_v53, %s4496_s25  ;;  %v4097_v60 = vpop.eup %4096  ;;  %v1083_v6 = vmul.f32 %v4095_v4, %v5146_v42  ;;  %v6071_v42 = vld [vmem:[#allocation31_spill] sm:$0xff]  ;;  %v6078_v4 = vld [vmem:[#allocation28_spill] sm:$0xff] }
 0x410   : > { %4110 = vrcp.f32 %v1046_v46  ;;  %1495 = vadd.xlane.f32.xlu0 %v5263_v40  ;;  %v4099_v14 = vpop.eup %4098  ;;  %v1082_v58 = vmul.f32 %v4097_v60, %v5119_v55  ;;  %v6079_v46 = vld [vmem:[#allocation16_spill] sm:$0xff] }
 0x411   : > { %4112 = vrcp.f32 %v1056_v59  ;;  %v1084_v33 = vmul.f32 %v4099_v14, %v5115_v54  ;;  %v6080_v14 = vld [vmem:[#allocation21_spill] sm:$0xff] }
 0x412   : > { %v4101_v9 = vpop.eup %4100 }
 0x413   : > { %v5269_v5 = vpop.eup %4102  ;;  %v1054_v27 = vpop.xlane.xlu1 %1053  ;;  %2007 = vrot.lane.b32.xlu1 %v4835_v15, %s4496_s25  ;;  %v1081_v51 = vmul.f32 %v4101_v9, %v5149_v61  ;;  %v1096_v13 = vpack.c.bf16 %v1084_v33, %v1083_v6  ;;  %v6081_v33 = vld [vmem:[#allocation27_spill] sm:$0xff] }
 0x414   : > { %4114 = vrcp.f32 %v1054_v27  ;;  %1501 = vadd.xlane.f32.xlu0 %v5269_v5 }
 0x415   : > { %4116 = vrcp.f32 %v1060_v44  ;;  %v1095_v38 = vpack.c.bf16 %v1082_v58, %v1081_v51 }
 0x416   : > { %v4105_v26 = vpop.eup %4104  ;;  %4118 = vrcp.f32 %v1058_v16 }
 0x417   : > { %3477 = vmatprep.mubr.bf16.mxu1 %v1095_v38  ;;  %2013 = vrot.lane.b32.xlu1 %v6071_v42, %s4496_s25  ;;  %v4107_v50 = vpop.eup %4106  ;;  %v1087_v55 = vmul.f32 %v4105_v26, %v5152_v43 }
 0x418   : > { %3478 = vmatmul.mubr.bf16.gmra.mrb[36].mxu1 %v1096_v13  ;;  %v4109_v32 = vpop.eup %4108  ;;  %v1086_v1 = vmul.f32 %v4107_v50, %v5128_v45 }
 0x419   : > { %v1088_v21 = vmul.f32 %v4109_v32, %v5125_v56  ;;  %v6072_v56 = vld [vmem:[#allocation30_spill] sm:$0xff] }
 0x41a   : > { %v4111_v61 = vpop.eup %4110 }
 0x41b   : > { %v1085_v19 = vmul.f32 %v4111_v61, %v5155_v49  ;;  %v4113_v54 = vpop.eup %4112  ;;  %v1098_v25 = vpack.c.bf16 %v1088_v21, %v1087_v55  ;;  %v6082_v55 = vld [vmem:[#allocation29_spill] sm:$0xff]  ;;  %v6083_v21 = vld [vmem:[#allocation32_spill] sm:$0xff] }
 0x41c   : > { %v1090_v8 = vmul.f32 %v4113_v54, %v5139_v47  ;;  %v6075_v47 = vld [vmem:[#allocation23_spill] sm:$0xff] }
 0x41d   : > { %v1097_v22 = vpack.c.bf16 %v1086_v1, %v1085_v19 }
 0x41e   : > { %v4115_v3 = vpop.eup %4114 }
 0x41f   : > { %v4117_v35 = vpop.eup %4116  ;;  %3481 = vmatprep.mubr.bf16.mxu1 %v1097_v22  ;;  %v1089_v30 = vmul.f32 %v4115_v3, %v5158_v52  ;;  %v6074_v52 = vld [vmem:[#allocation18_spill] sm:$0xff]  ;;  %v6085_v22 = vld [vmem:[#allocation35_spill] sm:$0xff] }
 0x420   : > { %3482 = vmatmul.mubr.bf16.gmra.mrb[40].mxu1 %v1098_v25  ;;  %v4119_v16 = vpop.eup %4118  ;;  %v1092_v43 = vmul.f32 %v4117_v35, %v5134_v48 }
 0x421   : > { %v1099_v28 = vpack.c.bf16 %v1090_v8, %v1089_v30  ;;  %v1091_v45 = vmul.f32 %v4119_v16, %v5131_v62  ;;  %v6077_v62 = vld [vmem:[#allocation25_spill] sm:$0xff]  ;;  %v6086_v8 = vld [vmem:[#allocation34_spill] sm:$0xff] }
 0x423   : > { %3485 = vmatprep.mubr.bf16.mxu1 %v1099_v28  ;;  %v1100_v49 = vpack.c.bf16 %v1092_v43, %v1091_v45  ;;  %v6087_v28 = vld [vmem:[#allocation36_spill] sm:$0xff] }
 0x428   : > { %3486 = vmatmul.mubr.bf16.gmra.mrb[44].mxu1 %v1100_v49 }
 0x42a   : > { %1700 = vrot.lane.b32.xlu0 %v6072_v56, %s4496_s25 }
 0x42e   : > { %1672 = vrot.lane.b32.xlu0 %v6073_v12, %s4496_s25 }
 0x432   : > { %1674 = vrot.lane.b32.xlu0 %v6074_v52, %s4496_s25 }
 0x436   : > { %1676 = vrot.lane.b32.xlu0 %v6075_v47, %s4496_s25 }
 0x43a   : > { %1678 = vrot.lane.b32.xlu0 %v6076_v20, %s4496_s25 }
 0x43c   : > { %v1476_v48 = vpop.xlane.xlu0 %1475 }
 0x43e   : > { %1682 = vrot.lane.b32.xlu0 %v6077_v62, %s4496_s25 }
 0x440   : > { %v1478_v44 = vpop.xlane.xlu0 %1477  ;;  %v1472_v7 = vpop.xlane.xlu1 %1471 }
 0x441   : > { %4120 = vrcp.f32 %v1478_v44 }
 0x442   : > { %1686 = vrot.lane.b32.xlu0 %v6078_v4, %s4496_s25  ;;  %4122 = vrcp.f32 %v1472_v7 }
 0x443   : > { %4124 = vrcp.f32 %v1476_v48 }
 0x444   : > { %v1474_v59 = vpop.xlane.xlu0 %1473 }
 0x445   : > { %4126 = vrcp.f32 %v1474_v59 }
 0x446   : > { %2001 = vrot.lane.b32.xlu0 %v6079_v46, %s4496_s25 }
 0x448   : > { %v1484_v60 = vpop.xlane.xlu0 %1483 }
 0x44a   : > { %2005 = vrot.lane.b32.xlu0 %v6080_v14, %s4496_s25  ;;  %v1482_v9 = vpop.xlane.xlu1 %1481 }
 0x44b   : > { %4128 = vrcp.f32 %v1482_v9  ;;  %v4121_v6 = vpop.eup %4120 }
 0x44c   : > { %v1480_v27 = vpop.xlane.xlu0 %1479  ;;  %v4123_v51 = vpop.eup %4122  ;;  %v1522_v13 = vmul.f32 %v4121_v6, %v5172_v41  ;;  %v1729_v41 = vsel %vm803_vm0, %v5057_v18, 0 }
 0x44d   : > { %4130 = vrcp.f32 %v1480_v27  ;;  %v4125_v58 = vpop.eup %4124  ;;  %v1519_v50 = vmul.f32 %v4123_v51, %v5174_v11 }
 0x44e   : > { %2009 = vrot.lane.b32.xlu0 %v6081_v33, %s4496_s25  ;;  %4132 = vrcp.f32 %v1484_v60  ;;  %v1521_v61 = vmul.f32 %v4125_v58, %v5167_v63  ;;  %v1695_v49 = vpop.permute.xlu1 %1694 }
 0x44f   : > { %v4127_v38 = vpop.eup %4126  ;;  %v1738_v48 = vsel %vm803_vm0, %v1695_v49, 0 }
 0x450   : > { %v1486_v26 = vpop.xlane.xlu0 %1485  ;;  %v1520_v32 = vmul.f32 %v4127_v38, %v5178_v2  ;;  %v1536_v1 = vpack.c.bf16 %v1522_v13, %v1521_v61  ;;  %v6084_v2 = vld [vmem:[#allocation33_spill] sm:$0xff] }
 0x451   : > { %4134 = vrcp.f32 %v1486_v26  ;;  %v1732_v43 = vsel %vm803_vm0, %v6084_v2, 0 }
 0x452   : > { %2011 = vrot.lane.b32.xlu0 %v6082_v55, %s4496_s25  ;;  %v1535_v19 = vpack.c.bf16 %v1520_v32, %v1519_v50 }
 0x454   : > { %3537 = vmatprep.mubr.bf16.mxu1 %v1535_v19  ;;  %v1697_v44 = vpop.permute.xlu0 %1696 }
 0x455   : > { %v4129_v54 = vpop.eup %4128  ;;  %3538 = vmatmul.mubr.bf16.vlgmr.msra.gmra.mrb[48].mxu1 %v1536_v1  ;;  %v1741_v7 = vsel %vm803_vm0, %v1697_v44, 0 }
 0x456   : > { %3554 = vmatpush3.bf16.xpose.msra.mxu1 %v1729_v41  ;;  %2015 = vrot.lane.b32.xlu0 %v6083_v21, %s4496_s25  ;;  %v1524_v3 = vmul.f32 %v4129_v54, %v6085_v22 }
 0x457   : > { %v4131_v11 = vpop.eup %4130  ;;  %3730 = vmatprep.subr.msk.bf16.mxu1 %vm803_vm0, %v6084_v2 }
 0x458   : > { %v1523_v63 = vmul.f32 %v4131_v11, %v5187_v37  ;;  %v4133_v25 = vpop.eup %4132  ;;  %v1735_v37 = vsel %vm803_vm0, %v5238_v17, 0  ;;  %v1699_v59 = vpop.permute.xlu0 %1698 }
 0x459   : > { %v1525_v16 = vmul.f32 %v4133_v25, %v6086_v8  ;;  %v1744_v60 = vsel %vm803_vm0, %v1699_v59, 0 }
 0x45a   : > { %v1537_v35 = vpack.c.bf16 %v1524_v3, %v1523_v63 }
 0x45b   : > { %v4135_v30 = vpop.eup %4134 }
 0x45c   : > { %3541 = vmatprep.mubr.bf16.mxu1 %v1537_v35  ;;  %v1526_v18 = vmul.f32 %v4135_v30, %v6087_v28 }
 0x45e   : > { %3556 = vmatpush3.bf16.xpose.msra.mxu1 %v1732_v43  ;;  %v1538_v45 = vpack.c.bf16 %v1526_v18, %v1525_v16 }
 0x45f   : > { %3731 = vmatprep.subr.msk.bf16.mxu1 %vm803_vm0, %v5238_v17 }
 0x460   : > { %3542 = vmatmul.mubr.bf16.gmra.mrb[52].mxu1 %v1538_v45 }
 0x466   : > { %3558 = vmatpush3.bf16.xpose.msra.mxu1 %v1735_v37 }
 0x467   : > { %3732 = vmatprep.subr.msk.bf16.mxu1 %vm803_vm0, %v1695_v49 }
 0x46e   : > { %3560 = vmatpush3.bf16.xpose.msra.mxu1 %v1738_v48 }
 0x46f   : > { %3733 = vmatprep.subr.msk.bf16.mxu1 %vm803_vm0, %v1697_v44 }
 0x476   : > { %3562 = vmatpush3.bf16.xpose.msra.mxu1 %v1741_v7 }
 0x477   : > { %3734 = vmatprep.subr.msk.bf16.mxu1 %vm803_vm0, %v1699_v59 }
 0x47e   : > { %3564 = vmatpush3.bf16.xpose.msra.mxu1 %v1744_v60 }
 0x47f   : > { %v1498_v51 = vpop.xlane.xlu1 %1497 }
 0x483   : > { %v1703_v25 = vpop.permute.xlu1 %1702 }
 0x484   : > { %v1750_v43 = vsel %vm803_vm0, %v1703_v25, 0 }
 0x487   : > { %v1681_v49 = vpop.permute.xlu1 %1680 }
 0x489   : > { %v1492_v17 = vpop.xlane.xlu0 %1491 }
 0x48d   : > { %v1488_v9 = vpop.xlane.xlu0 %1487 }
 0x491   : > { %v1494_v6 = vpop.xlane.xlu0 %1493 }
 0x492   : > { %4136 = vrcp.f32 %v1494_v6 }
 0x493   : > { %4138 = vrcp.f32 %v1488_v9 }
 0x494   : > { %4140 = vrcp.f32 %v1492_v17 }
 0x495   : > { %v1490_v27 = vpop.xlane.xlu0 %1489 }
 0x496   : > { %4142 = vrcp.f32 %v1490_v27 }
 0x497   : > { %4144 = vrcp.f32 %v1498_v51 }
 0x499   : > { %v1500_v58 = vpop.xlane.xlu0 %1499 }
 0x49c   : > { %v4137_v38 = vpop.eup %4136 }
 0x49d   : > { %v1496_v13 = vpop.xlane.xlu0 %1495  ;;  %v4139_v26 = vpop.eup %4138  ;;  %v1530_v61 = vmul.f32 %v4137_v38, %v5245_v31 }
 0x49e   : > { %4146 = vrcp.f32 %v1496_v13  ;;  %v4141_v50 = vpop.eup %4140  ;;  %v1527_v1 = vmul.f32 %v4139_v26, %v5236_v29 }
 0x49f   : > { %4148 = vrcp.f32 %v1500_v58  ;;  %v1529_v41 = vmul.f32 %v4141_v50, %v5229_v24 }
 0x4a0   : > { %v4143_v32 = vpop.eup %4142 }
 0x4a1   : > { %v1502_v19 = vpop.xlane.xlu0 %1501  ;;  %v1528_v54 = vmul.f32 %v4143_v32, %v5253_v34  ;;  %v1540_v2 = vpack.c.bf16 %v1530_v61, %v1529_v41  ;;  %v4145_v22 = vpop.eup %4144 }
 0x4a2   : > { %4150 = vrcp.f32 %v1502_v19  ;;  %v1532_v24 = vmul.f32 %v4145_v22, %v5217_v0 }
 0x4a3   : > { %v1539_v11 = vpack.c.bf16 %v1528_v54, %v1527_v1 }
 0x4a5   : > { %v1701_v63 = vpop.permute.xlu0 %1700  ;;  %3545 = vmatprep.mubr.bf16.mxu1 %v1539_v11 }
 0x4a6   : > { %3546 = vmatmul.mubr.bf16.gmra.mrb[56].mxu1 %v1540_v2  ;;  %3735 = vmatprep.subr.msk.bf16.mxu1 %vm803_vm0, %v1701_v63  ;;  %v1747_v3 = vsel %vm803_vm0, %v1701_v63, 0 }
 0x4a7   : > { %3566 = vmatpush3.bf16.xpose.msra.mxu1 %v1747_v3 }
 0x4a8   : > { %v4147_v31 = vpop.eup %4146  ;;  %3736 = vmatprep.subr.msk.bf16.mxu1 %vm803_vm0, %v1703_v25 }
 0x4a9   : > { %v1673_v29 = vpop.permute.xlu0 %1672  ;;  %v1531_v34 = vmul.f32 %v4147_v31, %v5263_v40  ;;  %v4149_v35 = vpop.eup %4148  ;;  %v6109_v31 = vld [vmem:[#allocation17_spill] sm:$0xff] }
 0x4aa   : > { %v1533_v28 = vmul.f32 %v4149_v35, %v5258_v10 }
 0x4ab   : > { %v1541_v30 = vpack.c.bf16 %v1532_v24, %v1531_v34 }
 0x4ac   : > { %v4151_v8 = vpop.eup %4150 }
 0x4ad   : > { %v1675_v16 = vpop.permute.xlu0 %1674  ;;  %3549 = vmatprep.mubr.bf16.mxu1 %v1541_v30  ;;  %v1534_v18 = vmul.f32 %v4151_v8, %v5269_v5  ;;  %v1685_v5 = vpop.permute.xlu1 %1684 }
 0x4af   : > { %3568 = vmatpush3.bf16.xpose.msra.mxu1 %v1750_v43  ;;  %v1542_v45 = vpack.c.bf16 %v1534_v18, %v1533_v28 }
 0x4b1   : > { %v1677_v37 = vpop.permute.xlu0 %1676  ;;  %3550 = vmatmul.mubr.bf16.gmra.mrb[60].mxu1 %v1542_v45  ;;  %v2004_v17 = vpop.permute.xlu1 %2003 }
 0x4b2   : > { %3569 = vmatprep.mubr.msk.bf16.mxu1 %vm803_vm0, %v1673_v29 }
 0x4b5   : > { %v1679_v40 = vpop.permute.xlu0 %1678  ;;  %v2008_v6 = vpop.permute.xlu1 %2007 }
 0x4b9   : > { %v1683_v0 = vpop.permute.xlu0 %1682  ;;  %3570 = vmatmul.mubr.msk.bf16.vlgmr.msra.gmra.mrb[64].mxu1 %vm803_vm0, %v1675_v16  ;;  %v2014_v58 = vpop.permute.xlu1 %2013 }
 0x4ba   : > { %v5349_v48 = vpop.f32.mrb[32].mxu1  ;;  %3573 = vmatprep.mubr.msk.bf16.mxu1 %vm803_vm0, %v1677_v37 }
 0x4bb   : > { %6088 = vst [vmem:[#allocation31_spill] sm:$0xff] %v5349_v48  ;;  %v5352_v10 = vpop.f32.mrb[33].mxu1 }
 0x4bc   : > { %6089 = vst [vmem:[#allocation30_spill] sm:$0xff] %v5352_v10  ;;  %v5354_v44 = vpop.f32.mrb[34].mxu1 }
 0x4bd   : > { %6090 = vst [vmem:[#allocation19_spill] sm:$0xff] %v5354_v44  ;;  %v5356_v7 = vpop.f32.mrb[35].mxu1  ;;  %v1687_v59 = vpop.permute.xlu0 %1686 }
 0x4be   : > { %6091 = vst [vmem:[#allocation18_spill] sm:$0xff] %v5356_v7 }
 0x4c1   : > { %v2002_v60 = vpop.permute.xlu0 %2001  ;;  %3574 = vmatmul.mubr.msk.bf16.gmra.mrb[68].mxu1 %vm803_vm0, %v1679_v40 }
 0x4c2   : > { %3577 = vmatprep.mubr.msk.bf16.mxu1 %vm803_vm0, %v1681_v49  ;;  %3585 = vmatprep.subr.bf16.mxu0 %v2002_v60 }
 0x4c3   : > { %3586 = vmatpush3.bf16.msra.mxu0 %v2002_v60 }
 0x4c4   : > { %3587 = vmatprep.subr.bf16.mxu0 %v2004_v17 }
 0x4c5   : > { %v2006_v9 = vpop.permute.xlu0 %2005 }
 0x4c7   : > { %3588 = vmatpush3.bf16.msra.mxu0 %v2004_v17 }
 0x4c8   : > { %3589 = vmatprep.subr.bf16.mxu0 %v2006_v9 }
 0x4c9   : > { %3578 = vmatmul.mubr.msk.bf16.gmra.mrb[72].mxu1 %vm803_vm0, %v1683_v0  ;;  %v2010_v27 = vpop.permute.xlu0 %2009 }
 0x4ca   : > { %3581 = vmatprep.mubr.msk.bf16.mxu1 %vm803_vm0, %v1685_v5 }
 0x4cb   : > { %3590 = vmatpush3.bf16.msra.mxu0 %v2006_v9 }
 0x4cc   : > { %3591 = vmatprep.subr.bf16.mxu0 %v2008_v6 }
 0x4cd   : > { %v2012_v51 = vpop.permute.xlu0 %2011 }
 0x4cf   : > { %3592 = vmatpush3.bf16.msra.mxu0 %v2008_v6 }
 0x4d0   : > { %3593 = vmatprep.subr.bf16.mxu0 %v2010_v27 }
 0x4d1   : > { %3582 = vmatmul.mubr.msk.bf16.gmra.mrb[76].mxu1 %vm803_vm0, %v1687_v59  ;;  %v2016_v38 = vpop.permute.xlu0 %2015 }
 0x4d3   : > { %3594 = vmatpush3.bf16.msra.mxu0 %v2010_v27 }
 0x4d4   : > { %3595 = vmatprep.subr.bf16.mxu0 %v2012_v51 }
 0x4d7   : > { %3596 = vmatpush3.bf16.msra.mxu0 %v2012_v51 }
 0x4d8   : > { %3597 = vmatprep.subr.bf16.mxu0 %v2014_v58 }
 0x4db   : > { %3598 = vmatpush3.bf16.msra.mxu0 %v2014_v58 }
 0x4dc   : > { %3599 = vmatprep.subr.bf16.mxu0 %v2016_v38 }
 0x4df   : > { %3600 = vmatpush3.bf16.msra.mxu0 %v2016_v38 }
 0x4eb   : > { %v5363_v13 = vpop.f32.mrb[36].mxu1 }
 0x4ec   : > { %6092 = vst [vmem:[#allocation23_spill] sm:$0xff] %v5363_v13  ;;  %v5365_v26 = vpop.f32.mrb[37].mxu1 }
 0x4ed   : > { %6093 = vst [vmem:[#allocation22_spill] sm:$0xff] %v5365_v26  ;;  %v5367_v50 = vpop.f32.mrb[38].mxu1 }
 0x4ee   : > { %6094 = vst [vmem:[#allocation25_spill] sm:$0xff] %v5367_v50  ;;  %v5369_v32 = vpop.f32.mrb[39].mxu1 }
 0x4ef   : > { %6095 = vst [vmem:[#allocation28_spill] sm:$0xff] %v5369_v32 }
 0x4f3   : > { %v5371_v61 = vpop.f32.mrb[40].mxu1 }
 0x4f4   : > { %6096 = vst [vmem:[#allocation16_spill] sm:$0xff] %v5371_v61  ;;  %v5373_v19 = vpop.f32.mrb[41].mxu1 }
 0x4f5   : > { %6097 = vst [vmem:[#allocation21_spill] sm:$0xff] %v5373_v19  ;;  %v5375_v1 = vpop.f32.mrb[42].mxu1 }
 0x4f6   : > { %6098 = vst [vmem:[#allocation27_spill] sm:$0xff] %v5375_v1  ;;  %v5377_v54 = vpop.f32.mrb[43].mxu1 }
 0x4f7   : > { %6099 = vst [vmem:[#allocation29_spill] sm:$0xff] %v5377_v54 }
 0x4fb   : > { %v5379_v41 = vpop.f32.mrb[44].mxu1 }
 0x4fc   : > { %6100 = vst [vmem:[#allocation32_spill] sm:$0xff] %v5379_v41  ;;  %v5381_v11 = vpop.f32.mrb[45].mxu1 }
 0x4fd   : > { %6101 = vst [vmem:[#allocation33_spill] sm:$0xff] %v5381_v11  ;;  %v5383_v2 = vpop.f32.mrb[46].mxu1  ;;  %v6110_v11 = vld [vmem:[#allocation15_spill] sm:$0xff] }
 0x4fe   : > { %6102 = vst [vmem:[#allocation35_spill] sm:$0xff] %v5383_v2  ;;  %v5385_v63 = vpop.f32.mrb[47].mxu1 }
 0x4ff   : > { %6103 = vst [vmem:[#allocation34_spill] sm:$0xff] %v5385_v63 }
 0x528   : > { %v5387_v22 = vpop.f32.mrb[48].mxu1 }
 0x529   : > { %v5389_v3 = vpop.f32.mrb[49].mxu1 }
 0x52a   : > { %v5391_v25 = vpop.f32.mrb[50].mxu1 }
 0x52b   : > { %v5395_v29 = vpop.f32.mrb[51].mxu1 }
 0x533   : > { %v5399_v24 = vpop.f32.mrb[52].mxu1 }
 0x534   : > { %v5401_v35 = vpop.f32.mrb[53].mxu1 }
 0x535   : > { %v5403_v30 = vpop.f32.mrb[54].mxu1 }
 0x536   : > { %v5407_v16 = vpop.f32.mrb[55].mxu1 }
 0x579   : > { %v5411_v18 = vpop.f32.mrb[56].mxu1 }
 0x57a   : > { %6104 = vst [vmem:[#allocation36_spill] sm:$0xff] %v5411_v18  ;;  %v5413_v43 = vpop.f32.mrb[57].mxu1 }
 0x57b   : > { %v5415_v45 = vpop.f32.mrb[58].mxu1 }
 0x57c   : > { %v5419_v40 = vpop.f32.mrb[59].mxu1 }
 0x584   : > { %v5423_v0 = vpop.f32.mrb[60].mxu1 }
 0x585   : > { %6105 = vst [vmem:[#allocation37_spill] sm:$0xff] %v5423_v0  ;;  %v5425_v5 = vpop.f32.mrb[61].mxu1 }
 0x586   : > { %6106 = vst [vmem:[#allocation38_spill] sm:$0xff] %v5425_v5  ;;  %v5427_v59 = vpop.f32.mrb[62].mxu1 }
 0x587   : > { %6107 = vst [vmem:[#allocation39_spill] sm:$0xff] %v5427_v59  ;;  %v5431_v17 = vpop.f32.mrb[63].mxu1 }
 0x588   : > { %6108 = vst [vmem:[#allocation40_spill] sm:$0xff] %v5431_v17 }
 0x58c   : > { %v3571_v6 = vpop.f32.mrb[64].mxu1 }
 0x58d   : > { %1853 = vmax.xlane.f32.xlu0 %v3571_v6  ;;  %v1786_v27 = vpop.f32.mrb[65].mxu1 }
 0x58e   : > { %1849 = vmax.xlane.f32.xlu1 %v1786_v27  ;;  %v3572_v51 = vpop.f32.mrb[66].mxu1 }
 0x58f   : > { %v1789_v58 = vpop.f32.mrb[67].mxu1 }
 0x592   : > { %1855 = vmax.xlane.f32.xlu1 %v3572_v51 }
 0x594   : > { %v5435_v38 = vpop.f32.mrb[68].mxu1 }
 0x595   : > { %v1802_v37 = vpop.f32.mrb[69].mxu1 }
 0x596   : > { %v3576_v8 = vpop.f32.mrb[70].mxu1 }
 0x597   : > { %v5437_v34 = vpop.f32.mrb[71].mxu1 }
 0x59c   : > { %v5439_v49 = vpop.f32.mrb[72].mxu1 }
 0x59d   : > { %v5441_v60 = vpop.f32.mrb[73].mxu1 }
 0x59e   : > { %v5443_v28 = vpop.f32.mrb[74].mxu1 }
 0x59f   : > { %v5445_v9 = vpop.f32.mrb[75].mxu1 }
 0x5a3   : > { %2140 = vrot.lane.b32.xlu0 %v6109_v31, %s4497_s27  ;;  %2138 = vrot.lane.b32.xlu1 %v6110_v11, %s4497_s27  ;;  %v6111_v11 = vld [vmem:[#allocation20_spill] sm:$0xff] }
 0x5a4   : > { %v5451_v63 = vpop.f32.mrb[76].mxu1 }
 0x5a5   : > { %v5453_v41 = vpop.f32.mrb[77].mxu1 }
 0x5a6   : > { %v5455_v2 = vpop.f32.mrb[78].mxu1 }
 0x5a7   : > { %v5457_v61 = vpop.f32.mrb[79].mxu1 }
 0x5c2   : > { %1851 = vmax.xlane.f32.xlu0 %v1789_v58 }
 0x5c6   : > { %1861 = vmax.xlane.f32.xlu0 %v5435_v38 }
 0x5c7   : > { %1863 = vmax.xlane.f32.xlu1 %v3576_v8 }
 0x5ca   : > { %1857 = vmax.xlane.f32.xlu0 %v1802_v37 }
 0x5cb   : > { %1859 = vmax.xlane.f32.xlu1 %v5437_v34 }
 0x5ce   : > { %1869 = vmax.xlane.f32.xlu0 %v5439_v49 }
 0x5cf   : > { %1871 = vmax.xlane.f32.xlu1 %v5443_v28 }
 0x5d2   : > { %1865 = vmax.xlane.f32.xlu0 %v5441_v60 }
 0x5d3   : > { %1867 = vmax.xlane.f32.xlu1 %v5445_v9 }
 0x5d6   : > { %1877 = vmax.xlane.f32.xlu0 %v5451_v63 }
 0x5d7   : > { %1879 = vmax.xlane.f32.xlu1 %v5455_v2 }
 0x5da   : > { %1873 = vmax.xlane.f32.xlu0 %v5453_v41 }
 0x5db   : > { %1875 = vmax.xlane.f32.xlu1 %v5457_v61 }
 0x5f0   : > { %2142 = vrot.lane.b32.xlu0 %v6111_v11, %s4497_s27 }
 0x61a   : > { %v1854_v31 = vpop.xlane.xlu0 %1853 }
 0x61b   : > { %v1883_v1 = vsub.f32 %v3571_v6, %v1854_v31  ;;  %v1850_v19 = vpop.xlane.xlu1 %1849 }
 0x61c   : > { %v1881_v54 = vsub.f32 %v1786_v27, %v1850_v19 }
 0x61d   : > { %v1901_v13 = vmul.f32 1.442695, %v1883_v1 }
 0x61e   : > { %v1897_v50 = vmul.f32 1.442695, %v1881_v54 }
 0x61f   : > { %4152 = vpow2.f32 %v1901_v13  ;;  %v1856_v32 = vpop.xlane.xlu1 %1855 }
 0x620   : > { %v1884_v26 = vsub.f32 %v3572_v51, %v1856_v32  ;;  %4154 = vpow2.f32 %v1897_v50  ;;  %v5486_v50 = vpop.permute.xlu0 %2140 }
 0x622   : > { %v1903_v10 = vmul.f32 1.442695, %v1884_v26  ;;  %v6112_v26 = vld [vmem:[#allocation24_spill] sm:$0xff] }
 0x623   : > { %v5471_v7 = vpop.permute.xlu1 %2138 }
 0x624   : > { %3737 = vmatprep.subr.msk.bf16.mxu0 %vm803_vm0, %v5471_v7  ;;  %4156 = vpow2.f32 %v1903_v10 }
 0x629   : > { %v5475_v48 = vpop.eup %4152 }
 0x62a   : > { %1933 = vadd.xlane.f32.xlu1 %v5475_v48  ;;  %v5478_v6 = vpop.eup %4154 }
 0x62e   : > { %1929 = vadd.xlane.f32.xlu1 %v5478_v6  ;;  %v5481_v13 = vpop.eup %4156 }
 0x632   : > { %1935 = vadd.xlane.f32.xlu1 %v5481_v13 }
 0x643   : > { %2144 = vrot.lane.b32.xlu1 %v6112_v26, %s4497_s27 }
 0x64f   : > { %v1852_v32 = vpop.xlane.xlu0 %1851 }
 0x650   : > { %v1882_v19 = vsub.f32 %v1789_v58, %v1852_v32 }
 0x652   : > { %v1899_v10 = vmul.f32 1.442695, %v1882_v19 }
 0x653   : > { %v1862_v1 = vpop.xlane.xlu0 %1861 }
 0x654   : > { %4158 = vpow2.f32 %v1899_v10  ;;  %v1864_v54 = vpop.xlane.xlu1 %1863 }
 0x655   : > { %v1888_v51 = vsub.f32 %v3576_v8, %v1864_v54 }
 0x657   : > { %v1858_v27 = vpop.xlane.xlu0 %1857  ;;  %v1911_v17 = vmul.f32 1.442695, %v1888_v51 }
 0x658   : > { %v1885_v11 = vsub.f32 %v1802_v37, %v1858_v27  ;;  %v1860_v31 = vpop.xlane.xlu1 %1859 }
 0x65a   : > { %v1905_v44 = vmul.f32 1.442695, %v1885_v11  ;;  %v1887_v11 = vsub.f32 %v5435_v38, %v1862_v1 }
 0x65b   : > { %v1870_v5 = vpop.xlane.xlu0 %1869 }
 0x65c   : > { %4160 = vpow2.f32 %v1905_v44  ;;  %v1891_v0 = vsub.f32 %v5439_v49, %v1870_v5  ;;  %v1872_v59 = vpop.xlane.xlu1 %1871 }
 0x65d   : > { %4162 = vpow2.f32 %v1911_v17  ;;  %v1892_v8 = vsub.f32 %v5443_v28, %v1872_v59  ;;  %v6113_v17 = vld [vmem:[#allocation26_spill] sm:$0xff] }
 0x65e   : > { %v5489_v26 = vpop.eup %4158  ;;  %v1917_v58 = vmul.f32 1.442695, %v1891_v0 }
 0x65f   : > { %v1866_v18 = vpop.xlane.xlu0 %1865  ;;  %1931 = vadd.xlane.f32.xlu0 %v5489_v26  ;;  %v1919_v44 = vmul.f32 1.442695, %v1892_v8 }
 0x660   : > { %v1889_v32 = vsub.f32 %v5441_v60, %v1866_v18  ;;  %v1868_v19 = vpop.xlane.xlu1 %1867  ;;  %4164 = vpow2.f32 %v1917_v58 }
 0x661   : > { %v1890_v49 = vsub.f32 %v5445_v9, %v1868_v19  ;;  %v1886_v19 = vsub.f32 %v5437_v34, %v1860_v31 }
 0x662   : > { %v1913_v37 = vmul.f32 1.442695, %v1889_v32  ;;  %v1909_v32 = vmul.f32 1.442695, %v1887_v11 }
 0x663   : > { %v1915_v18 = vmul.f32 1.442695, %v1890_v49  ;;  %v1878_v58 = vpop.xlane.xlu0 %1877  ;;  %v1907_v8 = vmul.f32 1.442695, %v1886_v19 }
 0x664   : > { %v1880_v10 = vpop.xlane.xlu1 %1879  ;;  %4166 = vpow2.f32 %v1913_v37  ;;  %v1895_v37 = vsub.f32 %v5451_v63, %v1878_v58  ;;  %v2179_v58 = vsel %vm803_vm0, %v5471_v7, 0 }
 0x665   : > { %4168 = vpow2.f32 %v1919_v44 }
 0x666   : > { %v5494_v54 = vpop.eup %4160  ;;  %4170 = vpow2.f32 %v1915_v18  ;;  %v1925_v49 = vmul.f32 1.442695, %v1895_v37  ;;  %v1896_v18 = vsub.f32 %v5455_v2, %v1880_v10 }
 0x667   : > { %1937 = vadd.xlane.f32.xlu1 %v5494_v54  ;;  %v5498_v27 = vpop.eup %4162  ;;  %v1874_v44 = vpop.xlane.xlu0 %1873 }
 0x668   : > { %v1876_v5 = vpop.xlane.xlu1 %1875  ;;  %v1927_v63 = vmul.f32 1.442695, %v1896_v18 }
 0x669   : > { %v1894_v0 = vsub.f32 %v5457_v61, %v1876_v5  ;;  %v1893_v5 = vsub.f32 %v5453_v41, %v1874_v44 }
 0x66a   : > { %v5502_v28 = vpop.eup %4164 }
 0x66b   : > { %1943 = vadd.xlane.f32.xlu1 %v5498_v27  ;;  %v1923_v59 = vmul.f32 1.442695, %v1894_v0  ;;  %v1921_v38 = vmul.f32 1.442695, %v1893_v5 }
 0x66d   : > { %4172 = vpow2.f32 %v1923_v59 }
 0x66e   : > { %v5505_v60 = vpop.eup %4166  ;;  %4174 = vpow2.f32 %v1909_v32 }
 0x66f   : > { %1949 = vadd.xlane.f32.xlu1 %v5502_v28  ;;  %v5510_v9 = vpop.eup %4168  ;;  %4176 = vpow2.f32 %v1907_v8 }
 0x670   : > { %v5513_v51 = vpop.eup %4170  ;;  %4178 = vpow2.f32 %v1925_v49 }
 0x671   : > { %4180 = vpow2.f32 %v1921_v38 }
 0x672   : > { %4182 = vpow2.f32 %v1927_v63 }
 0x673   : > { %1945 = vadd.xlane.f32.xlu1 %v5505_v60 }
 0x675   : > { %2146 = vrot.lane.b32.xlu0 %v6113_v17, %s4497_s27 }
 0x677   : > { %1951 = vadd.xlane.f32.xlu1 %v5510_v9  ;;  %v5516_v61 = vpop.eup %4172 }
 0x678   : > { %v5526_v1 = vpop.eup %4174 }
 0x679   : > { %v5531_v34 = vpop.eup %4176 }
 0x67b   : > { %1947 = vadd.xlane.f32.xlu1 %v5513_v51 }
 0x67f   : > { %1955 = vadd.xlane.f32.xlu1 %v5516_v61 }
 0x690   : > { %2148 = vrot.lane.b32.xlu1 %v4865_v39, %s4497_s27  ;;  %v5536_v39 = vpop.eup %4178 }
 0x691   : > { %v5541_v41 = vpop.eup %4180 }
 0x694   : > { %1941 = vadd.xlane.f32.xlu0 %v5526_v1  ;;  %2122 = vrot.lane.b32.xlu1 %v6073_v12, %s4497_s27  ;;  %v5546_v12 = vpop.eup %4182 }
 0x698   : > { %1939 = vadd.xlane.f32.xlu0 %v5531_v34  ;;  %2126 = vrot.lane.b32.xlu1 %v6075_v47, %s4497_s27 }
 0x69c   : > { %1957 = vadd.xlane.f32.xlu0 %v5536_v39  ;;  %2130 = vrot.lane.b32.xlu1 %v4847_v23, %s4497_s27 }
 0x6a0   : > { %1953 = vadd.xlane.f32.xlu0 %v5541_v41  ;;  %2134 = vrot.lane.b32.xlu1 %v4863_v36, %s4497_s27 }
 0x6a4   : > { %1959 = vadd.xlane.f32.xlu0 %v5546_v12  ;;  %2453 = vrot.lane.b32.xlu1 %v4801_v53, %s4497_s27 }
 0x6b7   : > { %v1934_v53 = vpop.xlane.xlu1 %1933 }
 0x6ba   : > { %2150 = vrot.lane.b32.xlu0 %v6072_v56, %s4497_s27  ;;  %v2143_v56 = vpop.permute.xlu0 %2142 }
 0x6bb   : > { %v1930_v23 = vpop.xlane.xlu1 %1929 }
 0x6be   : > { %2152 = vrot.lane.b32.xlu0 %v4891_v57, %s4497_s27 }
 0x6bf   : > { %v1936_v36 = vpop.xlane.xlu1 %1935 }
 0x6c0   : > { %4184 = vrcp.f32 %v1936_v36 }
 0x6c1   : > { %4186 = vrcp.f32 %v1930_v23 }
 0x6c2   : > { %2124 = vrot.lane.b32.xlu0 %v6074_v52, %s4497_s27  ;;  %4188 = vrcp.f32 %v1934_v53 }
 0x6c3   : > { %v2145_v52 = vpop.permute.xlu1 %2144 }
 0x6c4   : > { %v2188_v7 = vsel %vm803_vm0, %v2145_v52, 0 }
 0x6c6   : > { %2128 = vrot.lane.b32.xlu0 %v6076_v20, %s4497_s27 }
 0x6ca   : > { %2132 = vrot.lane.b32.xlu0 %v6077_v62, %s4497_s27  ;;  %v4185_v47 = vpop.eup %4184 }
 0x6cb   : > { %v4187_v2 = vpop.eup %4186 }
 0x6cc   : > { %v4189_v62 = vpop.eup %4188  ;;  %v1977_v10 = vmul.f32 %v4187_v2, %v5478_v6  ;;  %v2182_v6 = vsel %vm803_vm0, %v5486_v50, 0 }
 0x6cd   : > { %v1979_v0 = vmul.f32 %v4189_v62, %v5475_v48 }
 0x6ce   : > { %2136 = vrot.lane.b32.xlu0 %v6078_v4, %s4497_s27  ;;  %v1980_v4 = vmul.f32 %v4185_v47, %v5481_v13 }
 0x6d0   : > { %v1994_v11 = vpack.c.bf16 %v1980_v4, %v1979_v0 }
 0x6d2   : > { %2451 = vrot.lane.b32.xlu0 %v6079_v46, %s4497_s27 }
 0x6ec   : > { %v1932_v57 = vpop.xlane.xlu0 %1931 }
 0x6ed   : > { %4190 = vrcp.f32 %v1932_v57 }
 0x6f0   : > { %v2147_v8 = vpop.permute.xlu0 %2146 }
 0x6f4   : > { %v1938_v20 = vpop.xlane.xlu1 %1937 }
 0x6f5   : > { %4192 = vrcp.f32 %v1938_v20 }
 0x6f7   : > { %v4191_v31 = vpop.eup %4190 }
 0x6f8   : > { %v1978_v46 = vmul.f32 %v4191_v31, %v5489_v26  ;;  %v1944_v59 = vpop.xlane.xlu1 %1943  ;;  %v2185_v26 = vsel %vm803_vm0, %v2143_v56, 0 }
 0x6f9   : > { %4194 = vrcp.f32 %v1944_v59 }
 0x6fa   : > { %v1993_v17 = vpack.c.bf16 %v1978_v46, %v1977_v10 }
 0x6fc   : > { %3601 = vmatprep.mubr.bf16.mxu0 %v1993_v17  ;;  %v1950_v32 = vpop.xlane.xlu1 %1949 }
 0x6fd   : > { %3602 = vmatmul.mubr.bf16.vlgmr.msra.gmra.mrb[48].mxu0 %v1994_v11 }
 0x6fe   : > { %3618 = vmatpush3.bf16.xpose.msra.mxu0 %v2179_v58 }
 0x6ff   : > { %3738 = vmatprep.subr.msk.bf16.mxu0 %vm803_vm0, %v5486_v50  ;;  %v2191_v50 = vsel %vm803_vm0, %v2147_v8, 0  ;;  %v4193_v63 = vpop.eup %4192 }
 0x700   : > { %v1946_v13 = vpop.xlane.xlu1 %1945  ;;  %v1981_v2 = vmul.f32 %v4193_v63, %v5494_v54 }
 0x703   : > { %v4195_v53 = vpop.eup %4194 }
 0x704   : > { %v1952_v48 = vpop.xlane.xlu1 %1951  ;;  %v1984_v4 = vmul.f32 %v4195_v53, %v5498_v27 }
 0x706   : > { %3620 = vmatpush3.bf16.xpose.msra.mxu0 %v2182_v6 }
 0x707   : > { %3739 = vmatprep.subr.msk.bf16.mxu0 %vm803_vm0, %v2143_v56 }
 0x708   : > { %v1948_v19 = vpop.xlane.xlu1 %1947 }
 0x70c   : > { %v1956_v37 = vpop.xlane.xlu1 %1955 }
 0x70e   : > { %3622 = vmatpush3.bf16.xpose.msra.mxu0 %v2185_v26 }
 0x70f   : > { %3740 = vmatprep.subr.msk.bf16.mxu0 %vm803_vm0, %v2145_v52 }
 0x710   : > { %v2149_v44 = vpop.permute.xlu1 %2148 }
 0x711   : > { %v2194_v5 = vsel %vm803_vm0, %v2149_v44, 0 }
 0x716   : > { %3624 = vmatpush3.bf16.xpose.msra.mxu0 %v2188_v7 }
 0x717   : > { %3741 = vmatprep.subr.msk.bf16.mxu0 %vm803_vm0, %v2147_v8 }
 0x71e   : > { %3626 = vmatpush3.bf16.xpose.msra.mxu0 %v2191_v50 }
 0x71f   : > { %3742 = vmatprep.subr.msk.bf16.mxu0 %vm803_vm0, %v2149_v44 }
 0x721   : > { %v1942_v49 = vpop.xlane.xlu0 %1941 }
 0x722   : > { %4196 = vrcp.f32 %v1942_v49 }
 0x723   : > { %4198 = vrcp.f32 %v1948_v19 }
 0x724   : > { %4200 = vrcp.f32 %v1946_v13 }
 0x725   : > { %v1940_v18 = vpop.xlane.xlu0 %1939 }
 0x726   : > { %4202 = vrcp.f32 %v1940_v18  ;;  %3628 = vmatpush3.bf16.xpose.msra.mxu0 %v2194_v5 }
 0x727   : > { %4204 = vrcp.f32 %v1952_v48 }
 0x728   : > { %4206 = vrcp.f32 %v1950_v32 }
 0x729   : > { %v1958_v38 = vpop.xlane.xlu0 %1957  ;;  %4208 = vrcp.f32 %v1956_v37 }
 0x72c   : > { %v4197_v23 = vpop.eup %4196 }
 0x72d   : > { %v1954_v36 = vpop.xlane.xlu0 %1953  ;;  %v4199_v56 = vpop.eup %4198  ;;  %v1983_v47 = vmul.f32 %v4197_v23, %v5526_v1 }
 0x72e   : > { %4210 = vrcp.f32 %v1954_v36  ;;  %v4201_v57 = vpop.eup %4200  ;;  %v1986_v31 = vmul.f32 %v4199_v56, %v5513_v51  ;;  %v2123_v51 = vpop.permute.xlu1 %2122 }
 0x72f   : > { %v1985_v46 = vmul.f32 %v4201_v57, %v5505_v60  ;;  %v1996_v0 = vpack.c.bf16 %v1984_v4, %v1983_v47 }
 0x730   : > { %v4203_v52 = vpop.eup %4202 }
 0x731   : > { %v1960_v20 = vpop.xlane.xlu0 %1959  ;;  %v1982_v62 = vmul.f32 %v4203_v52, %v5531_v34  ;;  %v4205_v59 = vpop.eup %4204  ;;  %v1997_v11 = vpack.c.bf16 %v1986_v31, %v1985_v46 }
 0x732   : > { %4212 = vrcp.f32 %v1960_v20  ;;  %v4207_v1 = vpop.eup %4206  ;;  %v1988_v34 = vmul.f32 %v4205_v59, %v5510_v9  ;;  %v2127_v19 = vpop.permute.xlu1 %2126 }
 0x733   : > { %v1995_v10 = vpack.c.bf16 %v1982_v62, %v1981_v2  ;;  %4214 = vrcp.f32 %v1958_v38  ;;  %v4209_v54 = vpop.eup %4208  ;;  %v1987_v6 = vmul.f32 %v4207_v1, %v5502_v28 }
 0x734   : > { %v1990_v13 = vmul.f32 %v4209_v54, %v5516_v61 }
 0x735   : > { %v2151_v17 = vpop.permute.xlu0 %2150  ;;  %3605 = vmatprep.mubr.bf16.mxu0 %v1995_v10  ;;  %v1998_v48 = vpack.c.bf16 %v1988_v34, %v1987_v6 }
 0x736   : > { %v2197_v58 = vsel %vm803_vm0, %v2151_v17, 0  ;;  %3606 = vmatmul.mubr.bf16.gmra.mrb[52].mxu0 %v1996_v0  ;;  %3743 = vmatprep.subr.msk.bf16.mxu0 %vm803_vm0, %v2151_v17  ;;  %v2131_v49 = vpop.permute.xlu1 %2130 }
 0x737   : > { %3609 = vmatprep.mubr.bf16.mxu0 %v1997_v11  ;;  %3630 = vmatpush3.bf16.xpose.msra.mxu0 %v2197_v58 }
 0x738   : > { %v4211_v27 = vpop.eup %4210 }
 0x739   : > { %v2153_v60 = vpop.permute.xlu0 %2152  ;;  %v1989_v32 = vmul.f32 %v4211_v27, %v5541_v41 }
 0x73a   : > { %3744 = vmatprep.subr.msk.bf16.mxu0 %vm803_vm0, %v2153_v60  ;;  %v2200_v37 = vsel %vm803_vm0, %v2153_v60, 0  ;;  %v2135_v61 = vpop.permute.xlu1 %2134 }
 0x73b   : > { %v1999_v8 = vpack.c.bf16 %v1990_v13, %v1989_v32 }
 0x73c   : > { %v4213_v26 = vpop.eup %4212 }
 0x73d   : > { %v2125_v7 = vpop.permute.xlu0 %2124  ;;  %v4215_v50 = vpop.eup %4214  ;;  %v1992_v9 = vmul.f32 %v4213_v26, %v5546_v12 }
 0x73e   : > { %3610 = vmatmul.mubr.bf16.gmra.mrb[56].mxu0 %v1998_v48  ;;  %v1991_v44 = vmul.f32 %v4215_v50, %v5536_v39  ;;  %v2454_v63 = vpop.permute.xlu1 %2453 }
 0x73f   : > { %3613 = vmatprep.mubr.bf16.mxu0 %v1999_v8  ;;  %3632 = vmatpush3.bf16.xpose.msra.mxu0 %v2200_v37 }
 0x740   : > { %v2000_v28 = vpack.c.bf16 %v1992_v9, %v1991_v44 }
 0x741   : > { %v2129_v41 = vpop.permute.xlu0 %2128 }
 0x745   : > { %v2133_v5 = vpop.permute.xlu0 %2132 }
 0x746   : > { %3614 = vmatmul.mubr.bf16.gmra.mrb[60].mxu0 %v2000_v28 }
 0x747   : > { %3633 = vmatprep.mubr.msk.bf16.mxu0 %vm803_vm0, %v2123_v51 }
 0x749   : > { %v2137_v18 = vpop.permute.xlu0 %2136 }
 0x74d   : > { %v2452_v38 = vpop.permute.xlu0 %2451 }
 0x74e   : > { %3634 = vmatmul.mubr.msk.bf16.vlgmr.msra.gmra.mrb[64].mxu0 %vm803_vm0, %v2125_v7  ;;  %3649 = vmatprep.subr.bf16.mxu1 %v2452_v38 }
 0x74f   : > { %3637 = vmatprep.mubr.msk.bf16.mxu0 %vm803_vm0, %v2127_v19  ;;  %3650 = vmatpush3.bf16.msra.mxu1 %v2452_v38 }
 0x750   : > { %3651 = vmatprep.subr.bf16.mxu1 %v2454_v63 }
 0x753   : > { %3652 = vmatpush3.bf16.msra.mxu1 %v2454_v63 }
 0x756   : > { %3638 = vmatmul.mubr.msk.bf16.gmra.mrb[68].mxu0 %vm803_vm0, %v2129_v41 }
 0x757   : > { %3641 = vmatprep.mubr.msk.bf16.mxu0 %vm803_vm0, %v2131_v49 }
 0x75e   : > { %3642 = vmatmul.mubr.msk.bf16.gmra.mrb[72].mxu0 %vm803_vm0, %v2133_v5 }
 0x75f   : > { %3645 = vmatprep.mubr.msk.bf16.mxu0 %vm803_vm0, %v2135_v61 }
 0x766   : > { %3646 = vmatmul.mubr.msk.bf16.gmra.mrb[76].mxu0 %vm803_vm0, %v2137_v18 }
 0x7d0   : > { %v5607_v39 = vpop.f32.mrb[48].mxu0 }
 0x7d1   : > { %v5609_v12 = vpop.f32.mrb[49].mxu0 }
 0x7d2   : > { %v5611_v53 = vpop.f32.mrb[50].mxu0 }
 0x7d3   : > { %v5615_v36 = vpop.f32.mrb[51].mxu0 }
 0x7d4   : > { %v3858_v56 = vpack.i.bf16 %v5615_v36, %v5609_v12  ;;  %v6116_v12 = vpack.i.bf16 %v5419_v40, %v5413_v43  ;;  %v6117_v43 = vpack.i.bf16 %v5395_v29, %v5389_v3  ;;  %v6118_v40 = vpack.i.bf16 %v5611_v53, %v5607_v39 }
 0x809   : > { %v5619_v57 = vpop.f32.mrb[52].mxu0 }
 0x80a   : > { %v5621_v52 = vpop.f32.mrb[53].mxu0 }
 0x80b   : > { %v5623_v47 = vpop.f32.mrb[54].mxu0 }
 0x80c   : > { %v5627_v2 = vpop.f32.mrb[55].mxu0 }
 0x80d   : > { %v3878_v62 = vpack.i.bf16 %v5627_v2, %v5621_v52  ;;  %v6119_v2 = vpack.i.bf16 %v5403_v30, %v5399_v24 }
 0x811   : > { %v5631_v31 = vpop.f32.mrb[56].mxu0 }
 0x812   : > { %v5633_v4 = vpop.f32.mrb[57].mxu0 }
 0x813   : > { %v5635_v10 = vpop.f32.mrb[58].mxu0 }
 0x814   : > { %v5639_v0 = vpop.f32.mrb[59].mxu0 }
 0x819   : > { %v5643_v17 = vpop.f32.mrb[60].mxu0 }
 0x81a   : > { %v5645_v11 = vpop.f32.mrb[61].mxu0 }
 0x81b   : > { %v5647_v1 = vpop.f32.mrb[62].mxu0 }
 0x81c   : > { %v5651_v54 = vpop.f32.mrb[63].mxu0 }
 0x821   : > { %v3635_v27 = vpop.f32.mrb[64].mxu0 }
 0x822   : > { %2303 = vmax.xlane.f32.xlu0 %v3635_v27  ;;  %v2236_v34 = vpop.f32.mrb[65].mxu0 }
 0x823   : > { %2299 = vmax.xlane.f32.xlu1 %v2236_v34  ;;  %v3636_v60 = vpop.f32.mrb[66].mxu0 }
 0x824   : > { %v2239_v32 = vpop.f32.mrb[67].mxu0 }
 0x826   : > { %2301 = vmax.xlane.f32.xlu0 %v2239_v32 }
 0x827   : > { %2305 = vmax.xlane.f32.xlu1 %v3636_v60 }
 0x829   : > { %v3639_v6 = vpop.f32.mrb[68].mxu0 }
 0x82a   : > { %2311 = vmax.xlane.f32.xlu0 %v3639_v6  ;;  %v2252_v13 = vpop.f32.mrb[69].mxu0 }
 0x82b   : > { %v3640_v48 = vpop.f32.mrb[70].mxu0 }
 0x82c   : > { %2313 = vmax.xlane.f32.xlu1 %v3640_v48  ;;  %v2255_v26 = vpop.f32.mrb[71].mxu0 }
 0x82e   : > { %2307 = vmax.xlane.f32.xlu0 %v2252_v13 }
 0x830   : > { %2309 = vmax.xlane.f32.xlu1 %v2255_v26 }
 0x831   : > { %v3643_v19 = vpop.f32.mrb[72].mxu0 }
 0x832   : > { %2319 = vmax.xlane.f32.xlu0 %v3643_v19  ;;  %v5655_v7 = vpop.f32.mrb[73].mxu0 }
 0x833   : > { %v5657_v8 = vpop.f32.mrb[74].mxu0 }
 0x834   : > { %2321 = vmax.xlane.f32.xlu1 %v5657_v8  ;;  %v5660_v37 = vpop.f32.mrb[75].mxu0 }
 0x836   : > { %2315 = vmax.xlane.f32.xlu0 %v5655_v7 }
 0x838   : > { %2317 = vmax.xlane.f32.xlu1 %v5660_v37 }
 0x839   : > { %v5664_v50 = vpop.f32.mrb[76].mxu0 }
 0x83a   : > { %2327 = vmax.xlane.f32.xlu0 %v5664_v50  ;;  %v5667_v9 = vpop.f32.mrb[77].mxu0 }
 0x83b   : > { %v5669_v41 = vpop.f32.mrb[78].mxu0 }
 0x83c   : > { %v5671_v44 = vpop.f32.mrb[79].mxu0 }
 0x83e   : > { %2323 = vmax.xlane.f32.xlu0 %v5667_v9 }
 0x849   : > { %2459 = vrot.lane.b32.xlu1 %v6081_v33, %s4497_s27 }
 0x854   : > { %2455 = vrot.lane.b32.xlu0 %v6080_v14, %s4497_s27 }
 0x858   : > { %2457 = vrot.lane.b32.xlu0 %v4835_v15, %s4497_s27 }
 0x85c   : > { %2463 = vrot.lane.b32.xlu0 %v6071_v42, %s4497_s27 }
 0x86d   : > { %2329 = vmax.xlane.f32.xlu1 %v5669_v41 }
 0x871   : > { %2325 = vmax.xlane.f32.xlu1 %v5671_v44 }
 0x882   : > { %2461 = vrot.lane.b32.xlu1 %v6082_v55, %s4497_s27 }
 0x8af   : > { %v2304_v49 = vpop.xlane.xlu0 %2303 }
 0x8b0   : > { %v2333_v28 = vsub.f32 %v3635_v27, %v2304_v49  ;;  %v2300_v5 = vpop.xlane.xlu1 %2299 }
 0x8b1   : > { %v2331_v33 = vsub.f32 %v2236_v34, %v2300_v5 }
 0x8b2   : > { %v2351_v61 = vmul.f32 1.442695, %v2333_v28 }
 0x8b3   : > { %v2302_v18 = vpop.xlane.xlu0 %2301  ;;  %v2347_v14 = vmul.f32 1.442695, %v2331_v33 }
 0x8b4   : > { %4216 = vpow2.f32 %v2351_v61  ;;  %v2306_v38 = vpop.xlane.xlu1 %2305  ;;  %v2332_v63 = vsub.f32 %v2239_v32, %v2302_v18 }
 0x8b5   : > { %v2334_v15 = vsub.f32 %v3636_v60, %v2306_v38  ;;  %4218 = vpow2.f32 %v2347_v14 }
 0x8b6   : > { %v2349_v20 = vmul.f32 1.442695, %v2332_v63 }
 0x8b7   : > { %v2353_v51 = vmul.f32 1.442695, %v2334_v15  ;;  %v2312_v42 = vpop.xlane.xlu0 %2311 }
 0x8b8   : > { %v2337_v58 = vsub.f32 %v3639_v6, %v2312_v42 }
 0x8b9   : > { %v2314_v59 = vpop.xlane.xlu1 %2313  ;;  %4220 = vpow2.f32 %v2353_v51 }
 0x8ba   : > { %v2359_v46 = vmul.f32 1.442695, %v2337_v58  ;;  %v2338_v55 = vsub.f32 %v3640_v48, %v2314_v59 }
 0x8bb   : > { %v2308_v23 = vpop.xlane.xlu0 %2307 }
 0x8bc   : > { %4222 = vpow2.f32 %v2359_v46  ;;  %v2335_v27 = vsub.f32 %v2252_v13, %v2308_v23  ;;  %v2361_v60 = vmul.f32 1.442695, %v2338_v55 }
 0x8bd   : > { %v2310_v34 = vpop.xlane.xlu1 %2309  ;;  %4224 = vpow2.f32 %v2349_v20 }
 0x8be   : > { %v5686_v49 = vpop.eup %4216  ;;  %v2355_v28 = vmul.f32 1.442695, %v2335_v27  ;;  %v2336_v5 = vsub.f32 %v2255_v26, %v2310_v34 }
 0x8bf   : > { %v2320_v32 = vpop.xlane.xlu0 %2319  ;;  %2383 = vadd.xlane.f32.xlu1 %v5686_v49  ;;  %v5689_v61 = vpop.eup %4218 }
 0x8c0   : > { %4226 = vpow2.f32 %v2355_v28  ;;  %v2357_v6 = vmul.f32 1.442695, %v2336_v5  ;;  %v2341_v33 = vsub.f32 %v3643_v19, %v2320_v32 }
 0x8c1   : > { %v2322_v58 = vpop.xlane.xlu1 %2321  ;;  %4228 = vpow2.f32 %v2361_v60 }
 0x8c2   : > { %4230 = vpow2.f32 %v2357_v6  ;;  %v2367_v23 = vmul.f32 1.442695, %v2341_v33  ;;  %v2342_v26 = vsub.f32 %v5657_v8, %v2322_v58 }
 0x8c3   : > { %v2316_v59 = vpop.xlane.xlu0 %2315  ;;  %2379 = vadd.xlane.f32.xlu1 %v5689_v61  ;;  %v5693_v51 = vpop.eup %4220 }
 0x8c4   : > { %v2339_v46 = vsub.f32 %v5655_v7, %v2316_v59  ;;  %4232 = vpow2.f32 %v2367_v23  ;;  %v2369_v8 = vmul.f32 1.442695, %v2342_v26  ;;  %v6114_v59 = vpack.i.bf16 %v5391_v25, %v5387_v22 }
 0x8c5   : > { %v2318_v20 = vpop.xlane.xlu1 %2317  ;;  %v6115_v23 = vpack.i.bf16 %v5407_v16, %v5401_v35 }
 0x8c6   : > { %v5695_v13 = vpop.eup %4222  ;;  %v2340_v48 = vsub.f32 %v5660_v37, %v2318_v20  ;;  %v2363_v18 = vmul.f32 1.442695, %v2339_v46 }
 0x8c7   : > { %v2328_v19 = vpop.xlane.xlu0 %2327  ;;  %2391 = vadd.xlane.f32.xlu0 %v5695_v13  ;;  %2385 = vadd.xlane.f32.xlu1 %v5693_v51  ;;  %v5702_v7 = vpop.eup %4224 }
 0x8c8   : > { %v2365_v14 = vmul.f32 1.442695, %v2340_v48  ;;  %v2345_v38 = vsub.f32 %v5664_v50, %v2328_v19 }
 0x8c9   : > { %v2460_v60 = vpop.permute.xlu1 %2459 }
 0x8ca   : > { %v5704_v15 = vpop.eup %4226  ;;  %4234 = vpow2.f32 %v2365_v14  ;;  %v2375_v63 = vmul.f32 1.442695, %v2345_v38 }
 0x8cb   : > { %2387 = vadd.xlane.f32.xlu0 %v5704_v15  ;;  %v2324_v37 = vpop.xlane.xlu0 %2323  ;;  %2381 = vadd.xlane.f32.xlu1 %v5702_v7  ;;  %4236 = vpow2.f32 %v2363_v18  ;;  %v5709_v55 = vpop.eup %4228 }
 0x8cc   : > { %v2343_v42 = vsub.f32 %v5667_v9, %v2324_v37  ;;  %v5711_v27 = vpop.eup %4230  ;;  %4238 = vpow2.f32 %v2375_v63 }
 0x8cd   : > { %4240 = vpow2.f32 %v2369_v8 }
 0x8ce   : > { %v2371_v50 = vmul.f32 1.442695, %v2343_v42  ;;  %v5715_v28 = vpop.eup %4232 }
 0x8cf   : > { %v2456_v34 = vpop.permute.xlu0 %2455  ;;  %2393 = vadd.xlane.f32.xlu0 %v5709_v55  ;;  %2389 = vadd.xlane.f32.xlu1 %v5711_v27 }
 0x8d0   : > { %3653 = vmatprep.subr.bf16.mxu1 %v2456_v34  ;;  %4242 = vpow2.f32 %v2371_v50 }
 0x8d1   : > { %3654 = vmatpush3.bf16.msra.mxu1 %v2456_v34 }
 0x8d3   : > { %v2458_v5 = vpop.permute.xlu0 %2457  ;;  %2399 = vadd.xlane.f32.xlu0 %v5715_v28 }
 0x8d4   : > { %v5718_v9 = vpop.eup %4234  ;;  %3655 = vmatprep.subr.bf16.mxu1 %v2458_v5 }
 0x8d5   : > { %3656 = vmatpush3.bf16.msra.mxu1 %v2458_v5  ;;  %2397 = vadd.xlane.f32.xlu1 %v5718_v9  ;;  %v5721_v32 = vpop.eup %4236 }
 0x8d6   : > { %3657 = vmatprep.subr.bf16.mxu1 %v2460_v60  ;;  %v5724_v6 = vpop.eup %4238 }
 0x8d7   : > { %2395 = vadd.xlane.f32.xlu0 %v5721_v32  ;;  %v5727_v33 = vpop.eup %4240  ;;  %v2464_v16 = vpop.permute.xlu0 %2463 }
 0x8d9   : > { %2407 = vadd.xlane.f32.xlu1 %v5724_v6  ;;  %3658 = vmatpush3.bf16.msra.mxu1 %v2460_v60 }
 0x8da   : > { %v5730_v58 = vpop.eup %4242 }
 0x8db   : > { %2401 = vadd.xlane.f32.xlu0 %v5727_v33 }
 0x8dd   : > { %2403 = vadd.xlane.f32.xlu1 %v5730_v58 }
 0x8ee   : > { %2465 = vrot.lane.b32.xlu1 %v6083_v21, %s4497_s27 }
 0x8f2   : > { %3854 = vrot.lane.b32.xlu1 %v6114_v59, %s4497_s27 }
 0x8f6   : > { %3859 = vrot.lane.b32.xlu1 %v3858_v56, %s4496_s25 }
 0x8fa   : > { %3869 = vrot.lane.b32.xlu1 %v6115_v23, %s4497_s27  ;;  %v2330_v46 = vpop.xlane.xlu1 %2329 }
 0x8fb   : > { %v2346_v22 = vsub.f32 %v5669_v41, %v2330_v46  ;;  %v6121_v41 = vld [vmem:[#allocation36_spill] sm:$0xff] }
 0x8fc   : > { %v6122_v3 = vpack.i.bf16 %v5415_v45, %v6121_v41 }
 0x8fd   : > { %v2377_v35 = vmul.f32 1.442695, %v2346_v22 }
 0x8fe   : > { %3879 = vrot.lane.b32.xlu1 %v3878_v62, %s4496_s25  ;;  %v2326_v21 = vpop.xlane.xlu1 %2325  ;;  %v6120_v62 = vpack.i.bf16 %v5623_v47, %v5619_v57 }
 0x8ff   : > { %v2344_v25 = vsub.f32 %v5671_v44, %v2326_v21 }
 0x901   : > { %v2373_v20 = vmul.f32 1.442695, %v2344_v25 }
 0x902   : > { %3889 = vrot.lane.b32.xlu1 %v6116_v12, %s4497_s27  ;;  %v2462_v36 = vpop.permute.xlu1 %2461 }
 0x903   : > { %4244 = vpow2.f32 %v2373_v20  ;;  %3659 = vmatprep.subr.bf16.mxu1 %v2462_v36 }
 0x904   : > { %3660 = vmatpush3.bf16.msra.mxu1 %v2462_v36  ;;  %4246 = vpow2.f32 %v2377_v35 }
 0x905   : > { %3661 = vmatprep.subr.bf16.mxu1 %v2464_v16 }
 0x908   : > { %3662 = vmatpush3.bf16.msra.mxu1 %v2464_v16 }
 0x90d   : > { %v5757_v56 = vpop.eup %4244 }
 0x90e   : > { %2405 = vadd.xlane.f32.xlu0 %v5757_v56  ;;  %v5760_v52 = vpop.eup %4246 }
 0x912   : > { %2409 = vadd.xlane.f32.xlu0 %v5760_v52 }
 0x928   : > { %3849 = vrot.lane.b32.xlu0 %v6117_v43, %s4497_s27 }
 0x92c   : > { %3864 = vrot.lane.b32.xlu0 %v6118_v40, %s4496_s25 }
 0x930   : > { %3874 = vrot.lane.b32.xlu0 %v6119_v2, %s4497_s27 }
 0x934   : > { %3884 = vrot.lane.b32.xlu0 %v6120_v62, %s4496_s25 }
 0x938   : > { %3894 = vrot.lane.b32.xlu0 %v6122_v3, %s4497_s27 }
 0x94c   : > { %v2384_v29 = vpop.xlane.xlu1 %2383 }
 0x950   : > { %v2380_v44 = vpop.xlane.xlu1 %2379 }
 0x951   : > { %4248 = vrcp.f32 %v2380_v44 }
 0x954   : > { %v2392_v48 = vpop.xlane.xlu0 %2391  ;;  %v2386_v39 = vpop.xlane.xlu1 %2385 }
 0x958   : > { %v2388_v53 = vpop.xlane.xlu0 %2387  ;;  %v2382_v26 = vpop.xlane.xlu1 %2381 }
 0x959   : > { %4250 = vrcp.f32 %v2382_v26  ;;  %v4016_v26 = vld [vmem:[#allocation8] sm:$0xff]  }
 0x95a   : > { %4252 = vrcp.f32 %v2386_v39 }
 0x95b   : > { %v4249_v57 = vpop.eup %4248 }
 0x95c   : > { %v2394_v24 = vpop.xlane.xlu0 %2393  ;;  %v2390_v30 = vpop.xlane.xlu1 %2389  ;;  %v2427_v45 = vmul.f32 %v4249_v57, %v5689_v61 }
 0x95d   : > { %4254 = vrcp.f32 %v2390_v30  ;;  %v4018_v30 = vld [vmem:[#allocation8 + $0x10] sm:$0xff]  }
 0x95e   : > { %4256 = vrcp.f32 %v2384_v29 }
 0x95f   : > { %4258 = vrcp.f32 %v2388_v53 }
 0x960   : > { %v2400_v19 = vpop.xlane.xlu0 %2399  ;;  %4260 = vrcp.f32 %v2394_v24  ;;  %v4017_v24 = vld [vmem:[#allocation8 + $0x8] sm:$0xff]  }
 0x962   : > { %v2398_v47 = vpop.xlane.xlu1 %2397 }
 0x963   : > { %v4251_v18 = vpop.eup %4250 }
 0x964   : > { %v2428_v14 = vmul.f32 %v4251_v18, %v5702_v7  ;;  %v2396_v38 = vpop.xlane.xlu0 %2395  ;;  %v4253_v8 = vpop.eup %4252 }
 0x965   : > { %4262 = vrcp.f32 %v2396_v38  ;;  %v2430_v60 = vmul.f32 %v4253_v8, %v5693_v51 }
 0x966   : > { %v2408_v63 = vpop.xlane.xlu1 %2407  ;;  %v2443_v37 = vpack.c.bf16 %v2428_v14, %v2427_v45  ;;  %4264 = vrcp.f32 %v2392_v48 }
 0x967   : > { %v4255_v50 = vpop.eup %4254  ;;  %4266 = vrcp.f32 %v2398_v47 }
 0x968   : > { %3665 = vmatprep.mubr.bf16.mxu1 %v2443_v37  ;;  %v4257_v34 = vpop.eup %4256  ;;  %v2402_v59 = vpop.xlane.xlu0 %2401  ;;  %v2432_v61 = vmul.f32 %v4255_v50, %v5711_v27  ;;  %v6123_v37 = vpack.i.bf16 %v5635_v10, %v5631_v31 }
 0x969   : > { %v4259_v5 = vpop.eup %4258  ;;  %v2429_v7 = vmul.f32 %v4257_v34, %v5686_v49  ;;  %4268 = vrcp.f32 %v2402_v59 }
 0x96a   : > { %v2404_v42 = vpop.xlane.xlu1 %2403  ;;  %v2431_v46 = vmul.f32 %v4259_v5, %v5704_v15  ;;  %v4261_v22 = vpop.eup %4260  ;;  %4270 = vrcp.f32 %v2400_v19  ;;  %v4021_v19 = vld [vmem:[#allocation8 + $0x28] sm:$0xff]  }
 0x96b   : > { %v2444_v21 = vpack.c.bf16 %v2430_v60, %v2429_v7  ;;  %v2434_v36 = vmul.f32 %v4261_v22, %v5709_v55  ;;  %4272 = vrcp.f32 %v2404_v42  ;;  %v6124_v42 = vpack.i.bf16 %v5639_v0, %v5633_v4  ;;  %v6128_v7 = vld [vmem:[#allocation40_spill] sm:$0xff] }
 0x96c   : > { %v2445_v25 = vpack.c.bf16 %v2432_v61, %v2431_v46  ;;  %v6126_v61 = vld [vmem:[#allocation37_spill] sm:$0xff]  ;;  %v6129_v46 = vld [vmem:[#allocation38_spill] sm:$0xff] }
 0x96d   : > { %v6130_v4 = vpack.i.bf16 %v6128_v7, %v6129_v46 }
 0x96e   : > { %v2466_v23 = vpop.permute.xlu1 %2465 }
 0x96f   : > { %3663 = vmatprep.subr.bf16.mxu1 %v2466_v23  ;;  %v4263_v20 = vpop.eup %4262 }
 0x970   : > { %3664 = vmatpush3.bf16.msra.mxu1 %v2466_v23  ;;  %v4265_v12 = vpop.eup %4264  ;;  %v2435_v27 = vmul.f32 %v4263_v20, %v5721_v32  ;;  %v6125_v23 = vld [vmem:[#allocation39_spill] sm:$0xff]  ;;  %v6131_v20 = vpack.i.bf16 %v5647_v1, %v5643_v17 }
 0x971   : > { %v4267_v51 = vpop.eup %4266  ;;  %v2433_v49 = vmul.f32 %v4265_v12, %v5695_v13  ;;  %3681 = vmatprep.subr.bf16.mxu1 %v4016_v26  ;;  %v6127_v31 = vpack.i.bf16 %v6125_v23, %v6126_v61  ;;  %v6132_v12 = vpack.i.bf16 %v5651_v54, %v5645_v11 }
 0x972   : > { %v2436_v35 = vmul.f32 %v4267_v51, %v5718_v9 }
 0x973   : > { %3666 = vmatmul.mubr.bf16.vlgmr.msra.gmra.mrb[80].mxu1 %v2444_v21  ;;  %v2446_v16 = vpack.c.bf16 %v2434_v36, %v2433_v49  ;;  %v4269_v43 = vpop.eup %4268 }
 0x974   : > { %3669 = vmatprep.mubr.bf16.mxu1 %v2445_v25  ;;  %v2447_v15 = vpack.c.bf16 %v2436_v35, %v2435_v27  ;;  %v4271_v40 = vpop.eup %4270  ;;  %v2438_v2 = vmul.f32 %v4269_v43, %v5727_v33  ;;  %3682 = vmatpush3.bf16.msra.mxu1 %v4016_v26  ;;  %v6135_v26 = vld [vmem:[#allocation18_spill] sm:$0xff] }
 0x975   : > { %v2437_v62 = vmul.f32 %v4271_v40, %v5715_v28  ;;  %v4273_v13 = vpop.eup %4272  ;;  %3683 = vmatprep.subr.bf16.mxu1 %v4017_v24 }
 0x976   : > { %v2439_v3 = vmul.f32 %v4273_v13, %v5730_v58  ;;  %v4019_v58 = vld [vmem:[#allocation8 + $0x18] sm:$0xff]  }
 0x977   : > { %v2448_v41 = vpack.c.bf16 %v2438_v2, %v2437_v62 }
 0x978   : > { %3684 = vmatpush3.bf16.msra.mxu1 %v4017_v24 }
 0x979   : > { %3685 = vmatprep.subr.bf16.mxu1 %v4018_v30 }
 0x97b   : > { %3670 = vmatmul.mubr.bf16.gmra.mrb[84].mxu1 %v2446_v16 }
 0x97c   : > { %3673 = vmatprep.mubr.bf16.mxu1 %v2447_v15  ;;  %3686 = vmatpush3.bf16.msra.mxu1 %v4018_v30  ;;  %v3855_v15 = vpop.permute.xlu1 %3854  ;;  %v6136_v30 = vld [vmem:[#allocation30_spill] sm:$0xff] }
 0x97d   : > { %3687 = vmatprep.subr.bf16.mxu1 %v4019_v58  ;;  %v3857_v11 = vunpack.i.h.bf16 %v3855_v15  ;;  %v3856_v54 = vunpack.i.l.bf16 %v3855_v15 }
 0x980   : > { %3688 = vmatpush3.bf16.msra.mxu1 %v4019_v58  ;;  %v3860_v17 = vpop.permute.xlu1 %3859 }
 0x983   : > { %3674 = vmatmul.mubr.bf16.gmra.mrb[88].mxu1 %v2448_v41 }
 0x984   : > { %v3870_v2 = vpop.permute.xlu1 %3869 }
 0x988   : > { %v3880_v41 = vpop.permute.xlu1 %3879 }
 0x99b   : > { %v2406_v55 = vpop.xlane.xlu0 %2405 }
 0x99c   : > { %4274 = vrcp.f32 %v2406_v55 }
 0x99d   : > { %4276 = vrcp.f32 %v2408_v63 }
 0x99f   : > { %v2410_v32 = vpop.xlane.xlu0 %2409 }
 0x9a0   : > { %4278 = vrcp.f32 %v2410_v32 }
 0x9a3   : > { %v3850_v43 = vpop.permute.xlu0 %3849 }
 0x9a4   : > { %v3852_v55 = vunpack.i.h.bf16 %v3850_v43  ;;  %v3851_v32 = vunpack.i.l.bf16 %v3850_v43 }
 0x9a6   : > { %v4275_v9 = vpop.eup %4274  ;;  %v2765_v24 = vsel %vm803_vm0, %v6135_v26, %v3852_v55  ;;  %v2764_v58 = vsel %vm803_vm0, %v6136_v30, %v3851_v32  ;;  %v6141_v30 = vld [vmem:[#allocation29_spill] sm:$0xff] }
 0x9a7   : > { %v2440_v29 = vmul.f32 %v4275_v9, %v5757_v56  ;;  %v4277_v44 = vpop.eup %4276  ;;  %v4020_v56 = vld [vmem:[#allocation8 + $0x20] sm:$0xff]   ;;  %v3865_v40 = vpop.permute.xlu0 %3864 }
 0x9a8   : > { %v2441_v28 = vmul.f32 %v4277_v44, %v5724_v6  ;;  %3689 = vmatprep.subr.bf16.mxu1 %v4020_v56  ;;  %v4022_v6 = vld [vmem:[#allocation8 + $0x30] sm:$0xff]   ;;  %v5833_v9 = vpop.permute.xlu1 %3889  ;;  %v6133_v44 = vld [vmem:[#allocation19_spill] sm:$0xff] }
 0x9a9   : > { %v2449_v48 = vpack.c.bf16 %v2440_v29, %v2439_v3  ;;  %3690 = vmatpush3.bf16.msra.mxu1 %v4020_v56  ;;  %v3867_v3 = vunpack.i.h.bf16 %v3865_v40  ;;  %v3866_v29 = vunpack.i.l.bf16 %v3865_v40 }
 0x9aa   : > { %v4279_v39 = vpop.eup %4278  ;;  %3691 = vmatprep.subr.bf16.mxu1 %v4021_v19 }
 0x9ab   : > { %3677 = vmatprep.mubr.bf16.mxu1 %v2449_v48  ;;  %v2442_v33 = vmul.f32 %v4279_v39, %v5760_v52  ;;  %v4023_v52 = vld [vmem:[#allocation8 + $0x38] sm:$0xff]   ;;  %v3875_v1 = vpop.permute.xlu0 %3874  ;;  %v2767_v48 = vsel %vm803_vm0, %v6133_v44, %v3857_v11  ;;  %v6134_v39 = vld [vmem:[#allocation31_spill] sm:$0xff] }
 0x9ac   : > { %v3877_v23 = vunpack.i.h.bf16 %v3875_v1  ;;  %v3876_v61 = vunpack.i.l.bf16 %v3875_v1 }
 0x9ad   : > { %v2450_v53 = vpack.c.bf16 %v2442_v33, %v2441_v28  ;;  %3692 = vmatpush3.bf16.msra.mxu1 %v4021_v19  ;;  %v2766_v28 = vsel %vm803_vm0, %v6134_v39, %v3856_v54  ;;  %v3862_v33 = vunpack.i.h.bf16 %v3860_v17  ;;  %v3872_v19 = vunpack.i.h.bf16 %v3870_v2 }
 0x9ae   : > { %3693 = vmatprep.subr.bf16.mxu1 %v4022_v6  ;;  %v3891_v54 = vunpack.i.l.bf16 %v5833_v9 }
 0x9af   : > { %3678 = vmatmul.mubr.bf16.gmra.mrb[92].mxu1 %v2450_v53  ;;  %v3885_v62 = vpop.permute.xlu0 %3884  ;;  %v3861_v53 = vunpack.i.l.bf16 %v3860_v17 }
 0x9b0   : > { %v3887_v7 = vunpack.i.h.bf16 %v3885_v62  ;;  %v3886_v46 = vunpack.i.l.bf16 %v3885_v62  ;;  %v3892_v62 = vunpack.i.h.bf16 %v5833_v9 }
 0x9b1   : > { %3694 = vmatpush3.bf16.msra.mxu1 %v4022_v6  ;;  %v3871_v6 = vunpack.i.l.bf16 %v3870_v2 }
 0x9b2   : > { %3695 = vmatprep.subr.bf16.mxu1 %v4023_v52  ;;  %v2773_v9 = vsel %vm803_vm0, %v6141_v30, %v3892_v62 }
 0x9b3   : > { %v5831_v13 = vpop.permute.xlu0 %3894 }
 0x9b4   : > { %v3897_v44 = vunpack.i.h.bf16 %v5831_v13 }
 0x9b5   : > { %3696 = vmatpush3.bf16.msra.mxu1 %v4023_v52 }
 0xa46   : > { %v3667_v57 = vpop.f32.mrb[80].mxu1 }
 0xa47   : > { %v2509_v47 = vpop.f32.mrb[81].mxu1 }
 0xa48   : > { %v3668_v18 = vpop.f32.mrb[82].mxu1 }
 0xa49   : > { %v3898_v45 = vpack.i.bf16 %v3668_v18, %v3667_v57  ;;  %v2512_v14 = vpop.f32.mrb[83].mxu1  ;;  %v2783_v18 = vsel %vm2780_vm1, %v2766_v28, %v3866_v29 }
 0xa4a   : > { %v3903_v38 = vpack.i.bf16 %v2512_v14, %v2509_v47 }
 0xa4b   : > { %3899 = vrot.lane.b32.xlu0 %v3898_v45, %s4495_s23  ;;  %v2784_v45 = vsel %vm2780_vm1, %v2767_v48, %v3867_v3  ;;  %v3896_v48 = vunpack.i.l.bf16 %v5831_v13 }
 0xa4c   : > { %3904 = vrot.lane.b32.xlu1 %v3903_v38, %s4495_s23 }
 0xa4e   : > { %v3671_v63 = vpop.f32.mrb[84].mxu1 }
 0xa4f   : > { %3914 = vrot.lane.b32.xlu0 %v6123_v37, %s4496_s25  ;;  %v2525_v8 = vpop.f32.mrb[85].mxu1 }
 0xa50   : > { %3909 = vrot.lane.b32.xlu1 %v6124_v42, %s4496_s25  ;;  %v3672_v50 = vpop.f32.mrb[86].mxu1  ;;  %v2782_v42 = vsel %vm2780_vm1, %v2765_v24, %v3862_v33 }
 0xa51   : > { %v3918_v34 = vpack.i.bf16 %v3672_v50, %v3671_v63  ;;  %v2528_v5 = vpop.f32.mrb[87].mxu1  ;;  %v3881_v50 = vunpack.i.l.bf16 %v3880_v41 }
 0xa52   : > { %v3923_v60 = vpack.i.bf16 %v2528_v5, %v2525_v8  ;;  %v2781_v8 = vsel %vm2780_vm1, %v2764_v58, %v3861_v53  ;;  %v6142_v58 = vld [vmem:[#allocation21_spill] sm:$0xff] }
 0xa53   : > { %3919 = vrot.lane.b32.xlu0 %v3918_v34, %s4495_s23 }
 0xa54   : > { %3924 = vrot.lane.b32.xlu1 %v3923_v60, %s4495_s23 }
 0xa56   : > { %v3675_v59 = vpop.f32.mrb[88].mxu1 }
 0xa57   : > { %3934 = vrot.lane.b32.xlu0 %v6127_v31, %s4497_s27  ;;  %v2541_v10 = vpop.f32.mrb[89].mxu1 }
 0xa58   : > { %3929 = vrot.lane.b32.xlu1 %v6130_v4, %s4497_s27  ;;  %v3676_v0 = vpop.f32.mrb[90].mxu1  ;;  %v6137_v4 = vld [vmem:[#allocation22_spill] sm:$0xff] }
 0xa59   : > { %v3938_v21 = vpack.i.bf16 %v3676_v0, %v3675_v59  ;;  %v2544_v22 = vpop.f32.mrb[91].mxu1  ;;  %v2768_v0 = vsel %vm803_vm0, %v6137_v4, %v3871_v6  ;;  %v6143_v6 = vld [vmem:[#allocation27_spill] sm:$0xff] }
 0xa5a   : > { %v3943_v25 = vpack.i.bf16 %v2544_v22, %v2541_v10  ;;  %v6138_v22 = vld [vmem:[#allocation28_spill] sm:$0xff] }
 0xa5b   : > { %3939 = vrot.lane.b32.xlu0 %v3938_v21, %s4495_s23  ;;  %v3882_v21 = vunpack.i.h.bf16 %v3880_v41 }
 0xa5c   : > { %3944 = vrot.lane.b32.xlu1 %v3943_v25, %s4495_s23  ;;  %v2769_v25 = vsel %vm803_vm0, %v6138_v22, %v3872_v19 }
 0xa5d   : > { %v2786_v2 = vsel %vm2780_vm1, %v2769_v25, %v3882_v21 }
 0xa5f   : > { %3954 = vrot.lane.b32.xlu0 %v6131_v20, %s4496_s25  ;;  %v2785_v20 = vsel %vm2780_vm1, %v2768_v0, %v3881_v50 }
 0xa60   : > { %3949 = vrot.lane.b32.xlu1 %v6132_v12, %s4496_s25 }
 0xa82   : > { %v3679_v51 = vpop.f32.mrb[92].mxu1 }
 0xa83   : > { %v2557_v36 = vpop.f32.mrb[93].mxu1 }
 0xa84   : > { %v3680_v27 = vpop.f32.mrb[94].mxu1 }
 0xa85   : > { %v3963_v49 = vpack.i.bf16 %v3680_v27, %v3679_v51  ;;  %v2560_v35 = vpop.f32.mrb[95].mxu1  ;;  %v6139_v51 = vld [vmem:[#allocation25_spill] sm:$0xff]  ;;  %v6140_v27 = vld [vmem:[#allocation23_spill] sm:$0xff] }
 0xa86   : > { %v3958_v16 = vpack.i.bf16 %v2560_v35, %v2557_v36  ;;  %v2771_v36 = vsel %vm803_vm0, %v6139_v51, %v3877_v23  ;;  %v6146_v51 = vld [vmem:[#allocation32_spill] sm:$0xff] }
 0xa87   : > { %3964 = vrot.lane.b32.xlu0 %v3963_v49, %s4495_s23  ;;  %v2770_v49 = vsel %vm803_vm0, %v6140_v27, %v3876_v61  ;;  %v2788_v40 = vsel %vm2780_vm1, %v2771_v36, %v3887_v7 }
 0xa88   : > { %3959 = vrot.lane.b32.xlu1 %v3958_v16, %s4495_s23  ;;  %v2787_v15 = vsel %vm2780_vm1, %v2770_v49, %v3886_v46  ;;  %v6147_v49 = vld [vmem:[#allocation34_spill] sm:$0xff] }
 0xabd   : > { %v3900_v56 = vpop.permute.xlu0 %3899 }
 0xabe   : > { %v3902_v52 = vunpack.i.h.bf16 %v3900_v56  ;;  %v3901_v57 = vunpack.i.l.bf16 %v3900_v56  ;;  %v3905_v47 = vpop.permute.xlu1 %3904  ;;  %v2772_v56 = vsel %vm803_vm0, %v6142_v58, %v3891_v54 }
 0xabf   : > { %v3907_v14 = vunpack.i.h.bf16 %v3905_v47  ;;  %v3906_v38 = vunpack.i.l.bf16 %v3905_v47 }
 0xac0   : > { %v2800_v63 = vsel %vm2797_vm2, %v2783_v18, %v3901_v57  ;;  %v2801_v37 = vsel %vm2797_vm2, %v2784_v45, %v3902_v52  ;;  %v2775_v52 = vsel %vm803_vm0, %v6143_v6, %v3897_v44  ;;  %v6144_v57 = vld [vmem:[#allocation16_spill] sm:$0xff] }
 0xac1   : > { %v2815_v34 = vpack.c.bf16 %v2801_v37, %v2800_v63  ;;  %v3915_v5 = vpop.permute.xlu0 %3914  ;;  %v2798_v60 = vsel %vm2797_vm2, %v2781_v8, %v3906_v38  ;;  %v2799_v59 = vsel %vm2797_vm2, %v2782_v42, %v3907_v14  ;;  %v2774_v13 = vsel %vm803_vm0, %v6144_v57, %v3896_v48 }
 0xac2   : > { %v3910_v31 = vpop.permute.xlu1 %3909  ;;  %v2814_v10 = vpack.c.bf16 %v2799_v59, %v2798_v60  ;;  %v3917_v33 = vunpack.i.h.bf16 %v3915_v5  ;;  %v3916_v53 = vunpack.i.l.bf16 %v3915_v5 }
 0xac3   : > { %v3912_v26 = vunpack.i.h.bf16 %v3910_v31  ;;  %v3911_v24 = vunpack.i.l.bf16 %v3910_v31 }
 0xac4   : > { %3697 = vmatprep.mubr.bf16.mxu1 %v2814_v10  ;;  %v2792_v14 = vsel %vm2780_vm1, %v2775_v52, %v3917_v33  ;;  %v2791_v38 = vsel %vm2780_vm1, %v2774_v13, %v3916_v53 }
 0xac5   : > { %v3920_v12 = vpop.permute.xlu0 %3919  ;;  %3698 = vmatmul.mubr.bf16.vlgmr.msra.gmra.mrb[96].mxu1 %v2815_v34  ;;  %v2789_v8 = vsel %vm2780_vm1, %v2772_v56, %v3911_v24  ;;  %v2790_v42 = vsel %vm2780_vm1, %v2773_v9, %v3912_v26 }
 0xac6   : > { %v3922_v35 = vunpack.i.h.bf16 %v3920_v12  ;;  %v3921_v16 = vunpack.i.l.bf16 %v3920_v12  ;;  %v3925_v43 = vpop.permute.xlu1 %3924 }
 0xac7   : > { %v3927_v17 = vunpack.i.h.bf16 %v3925_v43  ;;  %v3926_v1 = vunpack.i.l.bf16 %v3925_v43 }
 0xac8   : > { %v2804_v41 = vsel %vm2797_vm2, %v2787_v15, %v3921_v16  ;;  %v2805_v11 = vsel %vm2797_vm2, %v2788_v40, %v3922_v35  ;;  %v6148_v16 = vld [vmem:[#allocation33_spill] sm:$0xff] }
 0xac9   : > { %v3935_v55 = vpop.permute.xlu0 %3934  ;;  %v2802_v32 = vsel %vm2797_vm2, %v2785_v20, %v3926_v1  ;;  %v2803_v3 = vsel %vm2797_vm2, %v2786_v2, %v3927_v17  ;;  %v2817_v29 = vpack.c.bf16 %v2805_v11, %v2804_v41  ;;  %v6145_v20 = vld [vmem:[#allocation35_spill] sm:$0xff] }
 0xaca   : > { %v3930_v39 = vpop.permute.xlu1 %3929  ;;  %v2816_v28 = vpack.c.bf16 %v2803_v3, %v2802_v32  ;;  %v3937_v31 = vunpack.i.h.bf16 %v3935_v55  ;;  %v3936_v10 = vunpack.i.l.bf16 %v3935_v55 }
 0xacb   : > { %v3932_v46 = vunpack.i.h.bf16 %v3930_v39  ;;  %v3931_v4 = vunpack.i.l.bf16 %v3930_v39 }
 0xacc   : > { %3701 = vmatprep.mubr.bf16.mxu1 %v2816_v28  ;;  %v2779_v12 = vsel %vm803_vm0, %v6145_v20, %v3937_v31  ;;  %v2778_v36 = vsel %vm803_vm0, %v6146_v51, %v3936_v10 }
 0xacd   : > { %v3940_v19 = vpop.permute.xlu0 %3939  ;;  %3702 = vmatmul.mubr.bf16.gmra.mrb[100].mxu1 %v2817_v29  ;;  %v2777_v35 = vsel %vm803_vm0, %v6147_v49, %v3932_v46  ;;  %v2776_v43 = vsel %vm803_vm0, %v6148_v16, %v3931_v4 }
 0xace   : > { %v3942_v47 = vunpack.i.h.bf16 %v3940_v19  ;;  %v3941_v18 = vunpack.i.l.bf16 %v3940_v19  ;;  %v3945_v45 = vpop.permute.xlu1 %3944 }
 0xacf   : > { %v3947_v63 = vunpack.i.h.bf16 %v3945_v45  ;;  %v3946_v37 = vunpack.i.l.bf16 %v3945_v45 }
 0xad0   : > { %v2808_v50 = vsel %vm2797_vm2, %v2791_v38, %v3941_v18  ;;  %v2809_v34 = vsel %vm2797_vm2, %v2792_v14, %v3942_v47 }
 0xad1   : > { %v2806_v5 = vsel %vm2797_vm2, %v2789_v8, %v3946_v37  ;;  %v2807_v60 = vsel %vm2797_vm2, %v2790_v42, %v3947_v63  ;;  %v2819_v59 = vpack.c.bf16 %v2809_v34, %v2808_v50  ;;  %v3955_v61 = vpop.permute.xlu0 %3954 }
 0xad2   : > { %v2818_v23 = vpack.c.bf16 %v2807_v60, %v2806_v5  ;;  %v3950_v7 = vpop.permute.xlu1 %3949  ;;  %v3957_v0 = vunpack.i.h.bf16 %v3955_v61  ;;  %v3956_v21 = vunpack.i.l.bf16 %v3955_v61 }
 0xad3   : > { %v3952_v22 = vunpack.i.h.bf16 %v3950_v7  ;;  %v3951_v25 = vunpack.i.l.bf16 %v3950_v7 }
 0xad4   : > { %3705 = vmatprep.mubr.bf16.mxu1 %v2818_v23  ;;  %v2796_v1 = vsel %vm2780_vm1, %v2779_v12, %v3957_v0  ;;  %v2795_v2 = vsel %vm2780_vm1, %v2778_v36, %v3956_v21 }
 0xad5   : > { %3706 = vmatmul.mubr.bf16.gmra.mrb[104].mxu1 %v2819_v59  ;;  %v2793_v11 = vsel %vm2780_vm1, %v2776_v43, %v3951_v25  ;;  %v2794_v54 = vsel %vm2780_vm1, %v2777_v35, %v3952_v22 }
 0xaf9   : > { %v3965_v27 = vpop.permute.xlu0 %3964 }
 0xafa   : > { %v3967_v15 = vunpack.i.h.bf16 %v3965_v27  ;;  %v3966_v40 = vunpack.i.l.bf16 %v3965_v27  ;;  %v3960_v17 = vpop.permute.xlu1 %3959 }
 0xafb   : > { %v3962_v62 = vunpack.i.h.bf16 %v3960_v17  ;;  %v3961_v41 = vunpack.i.l.bf16 %v3960_v17 }
 0xafc   : > { %v2812_v55 = vsel %vm2797_vm2, %v2795_v2, %v3966_v40  ;;  %v2813_v32 = vsel %vm2797_vm2, %v2796_v1, %v3967_v15 }
 0xafd   : > { %v2810_v3 = vsel %vm2797_vm2, %v2793_v11, %v3961_v41  ;;  %v2811_v29 = vsel %vm2797_vm2, %v2794_v54, %v3962_v62  ;;  %v2821_v44 = vpack.c.bf16 %v2813_v32, %v2812_v55 }
 0xafe   : > { %v2820_v48 = vpack.c.bf16 %v2811_v29, %v2810_v3 }
 0xb00   : > { %3709 = vmatprep.mubr.bf16.mxu1 %v2820_v48 }
 0xb01   : > { %3710 = vmatmul.mubr.bf16.gmra.mrb[108].mxu1 %v2821_v44 }
 0xb98   : > { %v3699_v39 = vpop.f32.mrb[96].mxu1 }
 0xb99   : > { %2985 = vst [vmem:[%s5904_s5 + $0x10] sm:$0xff] %v3699_v39  ;;  %v2920_v28 = vpop.f32.mrb[97].mxu1 }
 0xb9a   : > { %2983 = vst [vmem:[%s5904_s5] sm:$0xff] %v2920_v28  ;;  %v3700_v33 = vpop.f32.mrb[98].mxu1 }
 0xb9b   : > { %2986 = vst [vmem:[%s5904_s5 + $0x18] sm:$0xff] %v3700_v33  ;;  %v2923_v53 = vpop.f32.mrb[99].mxu1 }
 0xb9c   : > { %2984 = vst [vmem:[%s5904_s5 + $0x8] sm:$0xff] %v2923_v53 }
 0xba0   : > { %v3703_v26 = vpop.f32.mrb[100].mxu1 }
 0xba1   : > { %2989 = vst [vmem:[%s5904_s5 + $0x30] sm:$0xff] %v3703_v26  ;;  %v2936_v24 = vpop.f32.mrb[101].mxu1 }
 0xba2   : > { %2987 = vst [vmem:[%s5904_s5 + $0x20] sm:$0xff] %v2936_v24  ;;  %v3704_v30 = vpop.f32.mrb[102].mxu1 }
 0xba3   : > { %2990 = vst [vmem:[%s5904_s5 + $0x38] sm:$0xff] %v3704_v30  ;;  %v2939_v9 = vpop.f32.mrb[103].mxu1 }
 0xba4   : > { %2988 = vst [vmem:[%s5904_s5 + $0x28] sm:$0xff] %v2939_v9 }
 0xba8   : > { %v3707_v58 = vpop.f32.mrb[104].mxu1 }
 0xba9   : > { %2993 = vst [vmem:[%s5904_s5 + $0x50] sm:$0xff] %v3707_v58  ;;  %v2952_v56 = vpop.f32.mrb[105].mxu1 }
 0xbaa   : > { %2991 = vst [vmem:[%s5904_s5 + $0x40] sm:$0xff] %v2952_v56  ;;  %v3708_v19 = vpop.f32.mrb[106].mxu1 }
 0xbab   : > { %2994 = vst [vmem:[%s5904_s5 + $0x58] sm:$0xff] %v3708_v19  ;;  %v2955_v6 = vpop.f32.mrb[107].mxu1 }
 0xbac   : > { %2992 = vst [vmem:[%s5904_s5 + $0x48] sm:$0xff] %v2955_v6 }
 0xbd4   : > { %v3711_v52 = vpop.f32.mrb[108].mxu1 }
 0xbd5   : > { %2997 = vst [vmem:[%s5904_s5 + $0x70] sm:$0xff] %v3711_v52  ;;  %v2968_v57 = vpop.f32.mrb[109].mxu1 }
 0xbd6   : > { %2995 = vst [vmem:[%s5904_s5 + $0x60] sm:$0xff] %v2968_v57  ;;  %v3712_v13 = vpop.f32.mrb[110].mxu1 }
 0xbd7   : > { %2998 = vst [vmem:[%s5904_s5 + $0x78] sm:$0xff] %v3712_v13  ;;  %v2971_v47 = vpop.f32.mrb[111].mxu1 }
 0xbd8   : > { %2996 = vst [vmem:[%s5904_s5 + $0x68] sm:$0xff] %v2971_v47 }
 0xbd9   : > { %4407 = shalt.err (!%p4404_p0)
}
 0xbda   : > { %s4408_s21 = scalar_lea.hbm %s5924_s10, 2048  ;;  %s4412_s25 = scalar_lea.hbm %s5982_s4, 4096 }
 0xbdb   : > { %p4409_p4 = scmp.ne.s32.totalorder %s5924_s10, %s4408_s21  ;;  %p4413_p12 = scmp.lt.u32.totalorder %s5924_s10, %s5982_s4 }
 0xbdc   : > { %p4414_p1 = scmp.lt.u32.totalorder %s4412_s25, %s4408_s21  ;;  %p4416_p13 = scmp.lt.u32.totalorder %s4408_s21, %s5924_s10 }
 0xbdd   : > { %p4410_p2 = pnand %p4409_p4, %p4686_p3 }
 0xbde   : > { %p4415_p7 = por %p4414_p1, %p4413_p12 }
 0xbdf   : > { %p4411_p8 = pneg %p4410_p2 }
 0xbe0   : > { %p4417_p6 = por %p4416_p13, %p4415_p7 }
 0xbe2   : > { %p4418_p10 = pnand %p4417_p6, %p4411_p8 }
 0xbe4   : > { %4421 = shalt.err (!%p4418_p10)
}
 0xbe5   : > { %s4499_s5 = smov 128   ;;  %s4500_s6 = smov 8  }
 0xbe6   : > { %3759 = dma.vmem_to_hbm [thread:$0]  (%p4686_p3), %s5926_s1, 2048, %s5924_s10, %s3000_s18, %s4499_s5, %s4499_s5, %s4500_s6  }
 0xbe7 PF: > { %s3030_s28 = sand.u32 1, %s4464_s15   ;;  %p6149_p11 = scmp.ne.s32.totalorder %s6035_s26, 0 }
 0xbe8   : > { %p6150_p5 = scmp.ge.s32.totalorder %s4484_s20, 2  ;;  %s3031_s30 = scalar_lea.sflag [#allocation4], %s3030_s28 }
 0xbea   : > { %p3776_p9 = pnand %p6150_p5, %p6149_p11 }
 0xbec   : > { %4459 = dma.done.wait (!%p3776_p9), %s3031_s30, 2048  }
 0xbed   : > { %4461 = vsyncadd (!%p3776_p9), %s3031_s30, 4294965248  ;;  %s22_s20 = sadd.s32 1, %s4484_s20   ;;  %s6151_s15 = smov %s4468_s16 }
 0xbee   : > { %p19_p0 = scmp.ge.s32.totalorder %s22_s20, 4   ;;  %s6152_s16 = smov %s4472_s17 }
 0xbef   : > { %s6153_s17 = smov %s4695_s13  ;;  %s6154_s18 = smov %s4480_s19 }
 0xbf0   : > { %s6155_s19 = smov %s6157_s12  ;;  %21 = sbr.rel (!%p19_p0) target bundleno = 10 (0xa), region = 94 }
 0xbf7   :  { %3036 = vsyncpa [#allocation3], 1 }
 0xbf8   :  { %3038 = vsyncpa [#allocation3 + $0x1], 1 }
 0xbf9   :  { %3039 = vsyncpa [#allocation6], 1 }
 0xbfa   :  { %3040 = vsyncpa [#allocation9], 1 }
 0xbfb   :  { %3041 = vsyncpa [#allocation4], 1 }
 0xbfc   :  { %3043 = vsyncpa [#allocation4 + $0x1], 1 }

</bundles_post_ra>
